<compile_context>
chip_gen: v5e
topology: v5e:2x2
jax: 0.10.0
libtpu: 0.0.40
codegen_flags: <defaults>
</compile_context>

<pallas_src>
import jax
import jax.numpy as jnp
from jax.experimental import pallas as pl
from jax.experimental.pallas import tpu as pltpu

BN_EPS = 1e-5


# ------------------------------- kernel ------------------------------------ #

def convnet_kernel(x_ref, t1_ref, b1_ref, s1_ref, t2_ref, b2_ref, s2_ref,
                   fcw_ref, fcb_ref, o_ref, p1_ref):
    f32 = jnp.float32
    bf16 = jnp.bfloat16

    # ---- layer 1: conv 1->16 (5x5, pad 2) with folded BN, + ReLU -----------
    # x_ref block: (1, 32, 28) -- rows pre-padded by 2 (top/bottom), width raw.
    x = x_ref[0]                                          # (32, 28) f32
    acc1 = jnp.zeros((28, 28 * 16), f32)
    for ki in range(5):
        acc1 = acc1 + jnp.dot(x[ki:ki + 28, :].astype(bf16), t1_ref[ki],
                              preferred_element_type=f32)
    y1 = jnp.maximum(acc1 + b1_ref[...], 0.0)             # (28, 448) = (H, W*16)

    # ---- maxpool 2x2 #1 (W via selection matmuls, H via row pairs) ---------
    y1b = y1.astype(bf16)
    ea = jnp.dot(y1b, s1_ref[0], preferred_element_type=f32)   # even W columns
    eb = jnp.dot(y1b, s1_ref[1], preferred_element_type=f32)   # odd  W columns
    wp1 = jnp.maximum(ea, eb)                             # (28, 224) = (H, Wp*16)

    # p1 scratch = zero-padded (rows) input of conv2: (18, 14*16)
    p1_ref[0:2, :] = jnp.zeros((2, 14 * 16), f32)
    p1_ref[16:18, :] = jnp.zeros((2, 14 * 16), f32)
    for rp in range(14):
        row = jnp.maximum(wp1[2 * rp:2 * rp + 1, :],
                          wp1[2 * rp + 1:2 * rp + 2, :])  # (1, 224)
        p1_ref[2 + rp:3 + rp, :] = row

    # ---- layer 2: conv 16->32 (5x5, pad 2) with folded BN, + ReLU ----------
    acc2 = jnp.zeros((14, 14 * 32), f32)
    for ki in range(5):
        acc2 = acc2 + jnp.dot(p1_ref[ki:ki + 14, :].astype(bf16), t2_ref[ki],
                              preferred_element_type=f32)
    y2 = jnp.maximum(acc2 + b2_ref[...], 0.0)             # (14, 448) = (H, W*32)

    # ---- maxpool 2x2 #2 fused with the fc layer ----------------------------
    y2b = y2.astype(bf16)
    ea2 = jnp.dot(y2b, s2_ref[0], preferred_element_type=f32)
    eb2 = jnp.dot(y2b, s2_ref[1], preferred_element_type=f32)
    wp2 = jnp.maximum(ea2, eb2)                           # (14, 224) = (H, Wp*32)

    logits = fcb_ref[...]                                 # (1, 128)
    for hp in range(7):
        row = jnp.maximum(wp2[2 * hp:2 * hp + 1, :],
                          wp2[2 * hp + 1:2 * hp + 2, :])  # (1, 224) NHWC-flat
        logits = logits + jnp.dot(row.astype(bf16), fcw_ref[hp],
                                  preferred_element_type=f32)
    o_ref[0] = logits                                     # lane-dense (1, 128)


# --------------------------- trace-time weight prep ------------------------ #

def _fold_bn(w, b, gamma, beta, mean, var):
    scale = gamma * jax.lax.rsqrt(var + BN_EPS)
    w_f = w * scale[:, None, None, None]
    b_f = (b - mean) * scale + beta
    return w_f, b_f


def _conv_toeplitz(w_fold, w_sp):
    """(Cout, Cin, 5, 5) -> (5, w_sp*Cin, w_sp*Cout) block-Toeplitz per row-tap.

    T[ki, c'*Cin + i, c*Cout + o] = w_fold[o, i, ki, c'-c+2]  (band truncated at
    the borders == implicit zero padding of 2 along W).
    """
    c_out, c_in, kh, kw = w_fold.shape
    t = jnp.zeros((kh, w_sp, c_in, w_sp, c_out), jnp.float32)
    for kj in range(kw):
        eye = jnp.eye(w_sp, k=2 - kj, dtype=jnp.float32)          # [c', c]
        wk = jnp.transpose(w_fold[:, :, :, kj], (2, 1, 0))        # (kh, Cin, Cout)
        t = t + eye[None, :, None, :, None] * wk[:, None, :, None, :]
    return t.reshape(kh, w_sp * c_in, w_sp * c_out)


def _pool_select(w_out, c):
    """0/1 matrices (2, 2*w_out*c, w_out*c) picking even / odd W channel-blocks."""
    n_in = 2 * w_out * c
    n_out = w_out * c
    cols = jnp.arange(n_out)
    src_even = 2 * (cols // c) * c + (cols % c)
    rows = jnp.arange(n_in)[:, None]
    a = (rows == src_even[None, :]).astype(jnp.float32)
    b = (rows == (src_even + c)[None, :]).astype(jnp.float32)
    return jnp.stack([a, b], axis=0)


def _prep_fc(fc_w):
    """(nc, 32*7*7) torch NCHW-flatten order -> (7, 7*32, 128) NHWC order, padded."""
    nc = fc_w.shape[0]
    w = fc_w.reshape(nc, 32, 7, 7)                 # [d, c, h, w]
    w = jnp.transpose(w, (2, 3, 1, 0))             # [h, w, c, d]
    w = w.reshape(7, 7 * 32, nc)                   # [h, w*32 + c, d]
    return jnp.pad(w, ((0, 0), (0, 0), (0, 128 - nc)))


# ------------------------------- forward ----------------------------------- #

def convnet_forward(x_nchw, params):
    bf16 = jnp.bfloat16
    B = x_nchw.shape[0]
    nc = params["fc_b"].shape[0]

    # Fold BN into conv weights/biases (inference running stats).
    w1f, b1f = _fold_bn(params["w1"], params["b1"], params["g1"],
                        params["beta1"], params["mu1"], params["var1"])
    w2f, b2f = _fold_bn(params["w2"], params["b2"], params["g2"],
                        params["beta2"], params["mu2"], params["var2"])

    t1 = _conv_toeplitz(w1f, 28).astype(bf16)            # (5, 28, 448)
    t2 = _conv_toeplitz(w2f, 14).astype(bf16)            # (5, 224, 448)
    b1t = jnp.tile(b1f, 28).reshape(1, 448).astype(jnp.float32)
    b2t = jnp.tile(b2f, 14).reshape(1, 448).astype(jnp.float32)
    s1m = _pool_select(14, 16).astype(bf16)              # (2, 448, 224)
    s2m = _pool_select(7, 32).astype(bf16)               # (2, 448, 224)
    fcw = _prep_fc(params["fc_w"]).astype(bf16)          # (7, 224, 128)
    fcb = jnp.pad(params["fc_b"], (0, 128 - nc)).reshape(1, 128).astype(jnp.float32)

    # Rows padded by 2 (conv H padding); W padding is folded into the Toeplitz.
    xpad = jnp.pad(x_nchw[:, 0, :, :].astype(jnp.float32),
                   ((0, 0), (2, 2), (0, 0)))             # (B, 32, 28)

    out = pl.pallas_call(
        convnet_kernel,
        out_shape=jax.ShapeDtypeStruct((B, 1, 128), jnp.float32),
        grid=(B,),
        in_specs=[
            pl.BlockSpec((1, 32, 28), lambda b: (b, 0, 0)),      # x (per image)
            pl.BlockSpec((5, 28, 448), lambda b: (0, 0, 0)),     # t1
            pl.BlockSpec((1, 448), lambda b: (0, 0)),            # b1
            pl.BlockSpec((2, 448, 224), lambda b: (0, 0, 0)),    # pool1 select
            pl.BlockSpec((5, 224, 448), lambda b: (0, 0, 0)),    # t2
            pl.BlockSpec((1, 448), lambda b: (0, 0)),            # b2
            pl.BlockSpec((2, 448, 224), lambda b: (0, 0, 0)),    # pool2 select
            pl.BlockSpec((7, 224, 128), lambda b: (0, 0, 0)),    # fc w
            pl.BlockSpec((1, 128), lambda b: (0, 0)),            # fc b
        ],
        out_specs=pl.BlockSpec((1, 1, 128), lambda b: (b, 0, 0)),
        scratch_shapes=[pltpu.VMEM((18, 14 * 16), jnp.float32)],  # padded pool1
        compiler_params=pltpu.CompilerParams(
            dimension_semantics=("parallel",)),
    )(xpad, t1, b1t, s1m, t2, b2t, s2m, fcw, fcb)

    return out[:, 0, :nc]


# ------------------------------- params ------------------------------------ #

def init_params(key, num_classes=10):
    ks = jax.random.split(key, 6)

    def u(k, shape, fan_in):
        bound = 1.0 / jnp.sqrt(jnp.float32(fan_in))
        return jax.random.uniform(k, shape, jnp.float32, -bound, bound)

    p = {}
    p["w1"] = u(ks[0], (16, 1, 5, 5), 1 * 25)
    p["b1"] = u(ks[1], (16,), 1 * 25)
    p["g1"] = jnp.ones((16,), jnp.float32)
    p["beta1"] = jnp.zeros((16,), jnp.float32)
    p["mu1"] = jnp.zeros((16,), jnp.float32)
    p["var1"] = jnp.ones((16,), jnp.float32)

    p["w2"] = u(ks[2], (32, 16, 5, 5), 16 * 25)
    p["b2"] = u(ks[3], (32,), 16 * 25)
    p["g2"] = jnp.ones((32,), jnp.float32)
    p["beta2"] = jnp.zeros((32,), jnp.float32)
    p["mu2"] = jnp.zeros((32,), jnp.float32)
    p["var2"] = jnp.ones((32,), jnp.float32)

    p["fc_w"] = u(ks[4], (num_classes, 7 * 7 * 32), 7 * 7 * 32)
    p["fc_b"] = u(ks[5], (num_classes,), 7 * 7 * 32)
    return p


if __name__ == "__main__":
    key = jax.random.PRNGKey(0)
    kx, kp = jax.random.split(key)
    # MNIST-shaped input: the fc layer (7*7*32) pins spatial size to 28x28.
    x = jax.random.normal(kx, (2, 1, 28, 28), jnp.float32)
    params = init_params(kp, num_classes=10)

    logits = jax.jit(convnet_forward)(x, params)
    jax.block_until_ready(logits)
    assert logits.shape == (2, 10)
    print("KERNEL_OK")
</pallas_src>

<mosaic_0001>
module attributes {stable_mosaic.version = 11 : i64} {
  func.func @convnet_kernel(%arg0: i32, %arg1: memref<1x32x28xf32, #tpu.memory_space<vmem>>, %arg2: memref<5x28x448xbf16, #tpu.memory_space<vmem>>, %arg3: memref<1x448xf32, #tpu.memory_space<vmem>>, %arg4: memref<2x448x224xbf16, #tpu.memory_space<vmem>>, %arg5: memref<5x224x448xbf16, #tpu.memory_space<vmem>>, %arg6: memref<1x448xf32, #tpu.memory_space<vmem>>, %arg7: memref<2x448x224xbf16, #tpu.memory_space<vmem>>, %arg8: memref<7x224x128xbf16, #tpu.memory_space<vmem>>, %arg9: memref<1x128xf32, #tpu.memory_space<vmem>>, %arg10: memref<1x1x128xf32, #tpu.memory_space<vmem>>, %arg11: memref<18x224xf32, #tpu.memory_space<vmem>>) attributes {dimension_semantics = [#tpu.dimension_semantics<parallel>], iteration_bounds = array<i64: 2>, scalar_prefetch = 0 : i64, scratch_operands = 1 : i64, tpu.core_type = #tpu.core_type<tc>, window_params = [{transform_indices = @transform_0, window_bounds = array<i64: 1, 32, 28>}, {pipeline_mode = #tpu.pipeline_mode<synchronous>, transform_indices = @transform_1, window_bounds = array<i64: 5, 28, 448>}, {pipeline_mode = #tpu.pipeline_mode<synchronous>, transform_indices = @transform_2, window_bounds = array<i64: 1, 448>}, {pipeline_mode = #tpu.pipeline_mode<synchronous>, transform_indices = @transform_3, window_bounds = array<i64: 2, 448, 224>}, {pipeline_mode = #tpu.pipeline_mode<synchronous>, transform_indices = @transform_4, window_bounds = array<i64: 5, 224, 448>}, {pipeline_mode = #tpu.pipeline_mode<synchronous>, transform_indices = @transform_5, window_bounds = array<i64: 1, 448>}, {pipeline_mode = #tpu.pipeline_mode<synchronous>, transform_indices = @transform_6, window_bounds = array<i64: 2, 448, 224>}, {pipeline_mode = #tpu.pipeline_mode<synchronous>, transform_indices = @transform_7, window_bounds = array<i64: 7, 224, 128>}, {pipeline_mode = #tpu.pipeline_mode<synchronous>, transform_indices = @transform_8, window_bounds = array<i64: 1, 128>}, {transform_indices = @transform_9, window_bounds = array<i64: 1, 1, 128>}]} {
    %c0 = arith.constant 0 : index
    %c0_0 = arith.constant 0 : index
    %c0_1 = arith.constant 0 : index
    %0 = vector.load %arg1[%c0, %c0_0, %c0_1] : memref<1x32x28xf32, #tpu.memory_space<vmem>>, vector<1x32x28xf32>
    %1 = vector.shape_cast %0 : vector<1x32x28xf32> to vector<32x28xf32>
    %cst = arith.constant 0.000000e+00 : f32
    %2 = vector.broadcast %cst : f32 to vector<28x448xf32>
    %3 = vector.extract_strided_slice %1 {offsets = [0, 0], sizes = [28, 28], strides = [1, 1]} : vector<32x28xf32> to vector<28x28xf32>
    %4 = arith.truncf %3 : vector<28x28xf32> to vector<28x28xbf16>
    %c0_2 = arith.constant 0 : index
    %c0_3 = arith.constant 0 : index
    %c0_4 = arith.constant 0 : index
    %5 = vector.load %arg2[%c0_2, %c0_3, %c0_4] : memref<5x28x448xbf16, #tpu.memory_space<vmem>>, vector<1x28x448xbf16>
    %6 = vector.shape_cast %5 : vector<1x28x448xbf16> to vector<28x448xbf16>
    %cst_5 = arith.constant dense<0.000000e+00> : vector<28x448xf32>
    %7 = tpu.matmul %4, %6, %cst_5 {dimension_numbers = #tpu.dot_dimension_numbers<[1], [0], [0], [1], [0, 0, 1, 1], [], []>} : vector<28x28xbf16>, vector<28x448xbf16>, vector<28x448xf32> -> vector<28x448xf32>
    %8 = arith.addf %2, %7 : vector<28x448xf32>
    %9 = vector.extract_strided_slice %1 {offsets = [1, 0], sizes = [28, 28], strides = [1, 1]} : vector<32x28xf32> to vector<28x28xf32>
    %10 = arith.truncf %9 : vector<28x28xf32> to vector<28x28xbf16>
    %c1 = arith.constant 1 : index
    %c0_6 = arith.constant 0 : index
    %c0_7 = arith.constant 0 : index
    %11 = vector.load %arg2[%c1, %c0_6, %c0_7] : memref<5x28x448xbf16, #tpu.memory_space<vmem>>, vector<1x28x448xbf16>
    %12 = vector.shape_cast %11 : vector<1x28x448xbf16> to vector<28x448xbf16>
    %cst_8 = arith.constant dense<0.000000e+00> : vector<28x448xf32>
    %13 = tpu.matmul %10, %12, %cst_8 {dimension_numbers = #tpu.dot_dimension_numbers<[1], [0], [0], [1], [0, 0, 1, 1], [], []>} : vector<28x28xbf16>, vector<28x448xbf16>, vector<28x448xf32> -> vector<28x448xf32>
    %14 = arith.addf %8, %13 : vector<28x448xf32>
    %15 = vector.extract_strided_slice %1 {offsets = [2, 0], sizes = [28, 28], strides = [1, 1]} : vector<32x28xf32> to vector<28x28xf32>
    %16 = arith.truncf %15 : vector<28x28xf32> to vector<28x28xbf16>
    %c2 = arith.constant 2 : index
    %c0_9 = arith.constant 0 : index
    %c0_10 = arith.constant 0 : index
    %17 = vector.load %arg2[%c2, %c0_9, %c0_10] : memref<5x28x448xbf16, #tpu.memory_space<vmem>>, vector<1x28x448xbf16>
    %18 = vector.shape_cast %17 : vector<1x28x448xbf16> to vector<28x448xbf16>
    %cst_11 = arith.constant dense<0.000000e+00> : vector<28x448xf32>
    %19 = tpu.matmul %16, %18, %cst_11 {dimension_numbers = #tpu.dot_dimension_numbers<[1], [0], [0], [1], [0, 0, 1, 1], [], []>} : vector<28x28xbf16>, vector<28x448xbf16>, vector<28x448xf32> -> vector<28x448xf32>
    %20 = arith.addf %14, %19 : vector<28x448xf32>
    %21 = vector.extract_strided_slice %1 {offsets = [3, 0], sizes = [28, 28], strides = [1, 1]} : vector<32x28xf32> to vector<28x28xf32>
    %22 = arith.truncf %21 : vector<28x28xf32> to vector<28x28xbf16>
    %c3 = arith.constant 3 : index
    %c0_12 = arith.constant 0 : index
    %c0_13 = arith.constant 0 : index
    %23 = vector.load %arg2[%c3, %c0_12, %c0_13] : memref<5x28x448xbf16, #tpu.memory_space<vmem>>, vector<1x28x448xbf16>
    %24 = vector.shape_cast %23 : vector<1x28x448xbf16> to vector<28x448xbf16>
    %cst_14 = arith.constant dense<0.000000e+00> : vector<28x448xf32>
    %25 = tpu.matmul %22, %24, %cst_14 {dimension_numbers = #tpu.dot_dimension_numbers<[1], [0], [0], [1], [0, 0, 1, 1], [], []>} : vector<28x28xbf16>, vector<28x448xbf16>, vector<28x448xf32> -> vector<28x448xf32>
    %26 = arith.addf %20, %25 : vector<28x448xf32>
    %27 = vector.extract_strided_slice %1 {offsets = [4, 0], sizes = [28, 28], strides = [1, 1]} : vector<32x28xf32> to vector<28x28xf32>
    %28 = arith.truncf %27 : vector<28x28xf32> to vector<28x28xbf16>
    %c4 = arith.constant 4 : index
    %c0_15 = arith.constant 0 : index
    %c0_16 = arith.constant 0 : index
    %29 = vector.load %arg2[%c4, %c0_15, %c0_16] : memref<5x28x448xbf16, #tpu.memory_space<vmem>>, vector<1x28x448xbf16>
    %30 = vector.shape_cast %29 : vector<1x28x448xbf16> to vector<28x448xbf16>
    %cst_17 = arith.constant dense<0.000000e+00> : vector<28x448xf32>
    %31 = tpu.matmul %28, %30, %cst_17 {dimension_numbers = #tpu.dot_dimension_numbers<[1], [0], [0], [1], [0, 0, 1, 1], [], []>} : vector<28x28xbf16>, vector<28x448xbf16>, vector<28x448xf32> -> vector<28x448xf32>
    %32 = arith.addf %26, %31 : vector<28x448xf32>
    %c0_18 = arith.constant 0 : index
    %c0_19 = arith.constant 0 : index
    %33 = vector.load %arg3[%c0_18, %c0_19] : memref<1x448xf32, #tpu.memory_space<vmem>>, vector<1x448xf32>
    %34 = vector.broadcast %33 : vector<1x448xf32> to vector<28x448xf32>
    %35 = arith.addf %32, %34 : vector<28x448xf32>
    %cst_20 = arith.constant 0.000000e+00 : f32
    %36 = vector.broadcast %cst_20 : f32 to vector<28x448xf32>
    %37 = arith.maximumf %35, %36 : vector<28x448xf32>
    %38 = arith.truncf %37 : vector<28x448xf32> to vector<28x448xbf16>
    %c0_21 = arith.constant 0 : index
    %c0_22 = arith.constant 0 : index
    %c0_23 = arith.constant 0 : index
    %39 = vector.load %arg4[%c0_21, %c0_22, %c0_23] : memref<2x448x224xbf16, #tpu.memory_space<vmem>>, vector<1x448x224xbf16>
    %40 = vector.shape_cast %39 : vector<1x448x224xbf16> to vector<448x224xbf16>
    %cst_24 = arith.constant dense<0.000000e+00> : vector<28x224xf32>
    %41 = tpu.matmul %38, %40, %cst_24 {dimension_numbers = #tpu.dot_dimension_numbers<[1], [0], [0], [1], [0, 0, 1, 1], [], []>} : vector<28x448xbf16>, vector<448x224xbf16>, vector<28x224xf32> -> vector<28x224xf32>
    %c1_25 = arith.constant 1 : index
    %c0_26 = arith.constant 0 : index
    %c0_27 = arith.constant 0 : index
    %42 = vector.load %arg4[%c1_25, %c0_26, %c0_27] : memref<2x448x224xbf16, #tpu.memory_space<vmem>>, vector<1x448x224xbf16>
    %43 = vector.shape_cast %42 : vector<1x448x224xbf16> to vector<448x224xbf16>
    %cst_28 = arith.constant dense<0.000000e+00> : vector<28x224xf32>
    %44 = tpu.matmul %38, %43, %cst_28 {dimension_numbers = #tpu.dot_dimension_numbers<[1], [0], [0], [1], [0, 0, 1, 1], [], []>} : vector<28x448xbf16>, vector<448x224xbf16>, vector<28x224xf32> -> vector<28x224xf32>
    %45 = arith.maximumf %41, %44 : vector<28x224xf32>
    %cst_29 = arith.constant 0.000000e+00 : f32
    %46 = vector.broadcast %cst_29 : f32 to vector<2x224xf32>
    %c0_30 = arith.constant 0 : index
    %c0_31 = arith.constant 0 : index
    %47 = vector.load %arg11[%c0_30, %c0_31] : memref<18x224xf32, #tpu.memory_space<vmem>>, vector<2x224xf32>
    tpu.vector_store %arg11[%c0_30, %c0_31], %46 {strides = array<i32>} : memref<18x224xf32, #tpu.memory_space<vmem>>, vector<2x224xf32>,
    %cst_32 = arith.constant 0.000000e+00 : f32
    %48 = vector.broadcast %cst_32 : f32 to vector<2x224xf32>
    %c16 = arith.constant 16 : index
    %c0_33 = arith.constant 0 : index
    %49 = vector.load %arg11[%c16, %c0_33] : memref<18x224xf32, #tpu.memory_space<vmem>>, vector<2x224xf32>
    tpu.vector_store %arg11[%c16, %c0_33], %48 {strides = array<i32>} : memref<18x224xf32, #tpu.memory_space<vmem>>, vector<2x224xf32>,
    %50 = vector.extract_strided_slice %45 {offsets = [0, 0], sizes = [1, 224], strides = [1, 1]} : vector<28x224xf32> to vector<1x224xf32>
    %51 = vector.extract_strided_slice %45 {offsets = [1, 0], sizes = [1, 224], strides = [1, 1]} : vector<28x224xf32> to vector<1x224xf32>
    %52 = arith.maximumf %50, %51 : vector<1x224xf32>
    %c2_34 = arith.constant 2 : index
    %c0_35 = arith.constant 0 : index
    %53 = vector.load %arg11[%c2_34, %c0_35] : memref<18x224xf32, #tpu.memory_space<vmem>>, vector<1x224xf32>
    tpu.vector_store %arg11[%c2_34, %c0_35], %52 {strides = array<i32>} : memref<18x224xf32, #tpu.memory_space<vmem>>, vector<1x224xf32>,
    %54 = vector.extract_strided_slice %45 {offsets = [2, 0], sizes = [1, 224], strides = [1, 1]} : vector<28x224xf32> to vector<1x224xf32>
    %55 = vector.extract_strided_slice %45 {offsets = [3, 0], sizes = [1, 224], strides = [1, 1]} : vector<28x224xf32> to vector<1x224xf32>
    %56 = arith.maximumf %54, %55 : vector<1x224xf32>
    %c3_36 = arith.constant 3 : index
    %c0_37 = arith.constant 0 : index
    %57 = vector.load %arg11[%c3_36, %c0_37] : memref<18x224xf32, #tpu.memory_space<vmem>>, vector<1x224xf32>
    tpu.vector_store %arg11[%c3_36, %c0_37], %56 {strides = array<i32>} : memref<18x224xf32, #tpu.memory_space<vmem>>, vector<1x224xf32>,
    %58 = vector.extract_strided_slice %45 {offsets = [4, 0], sizes = [1, 224], strides = [1, 1]} : vector<28x224xf32> to vector<1x224xf32>
    %59 = vector.extract_strided_slice %45 {offsets = [5, 0], sizes = [1, 224], strides = [1, 1]} : vector<28x224xf32> to vector<1x224xf32>
    %60 = arith.maximumf %58, %59 : vector<1x224xf32>
    %c4_38 = arith.constant 4 : index
    %c0_39 = arith.constant 0 : index
    %61 = vector.load %arg11[%c4_38, %c0_39] : memref<18x224xf32, #tpu.memory_space<vmem>>, vector<1x224xf32>
    tpu.vector_store %arg11[%c4_38, %c0_39], %60 {strides = array<i32>} : memref<18x224xf32, #tpu.memory_space<vmem>>, vector<1x224xf32>,
    %62 = vector.extract_strided_slice %45 {offsets = [6, 0], sizes = [1, 224], strides = [1, 1]} : vector<28x224xf32> to vector<1x224xf32>
    %63 = vector.extract_strided_slice %45 {offsets = [7, 0], sizes = [1, 224], strides = [1, 1]} : vector<28x224xf32> to vector<1x224xf32>
    %64 = arith.maximumf %62, %63 : vector<1x224xf32>
    %c5 = arith.constant 5 : index
    %c0_40 = arith.constant 0 : index
    %65 = vector.load %arg11[%c5, %c0_40] : memref<18x224xf32, #tpu.memory_space<vmem>>, vector<1x224xf32>
    tpu.vector_store %arg11[%c5, %c0_40], %64 {strides = array<i32>} : memref<18x224xf32, #tpu.memory_space<vmem>>, vector<1x224xf32>,
    %66 = vector.extract_strided_slice %45 {offsets = [8, 0], sizes = [1, 224], strides = [1, 1]} : vector<28x224xf32> to vector<1x224xf32>
    %67 = vector.extract_strided_slice %45 {offsets = [9, 0], sizes = [1, 224], strides = [1, 1]} : vector<28x224xf32> to vector<1x224xf32>
    %68 = arith.maximumf %66, %67 : vector<1x224xf32>
    %c6 = arith.constant 6 : index
    %c0_41 = arith.constant 0 : index
    %69 = vector.load %arg11[%c6, %c0_41] : memref<18x224xf32, #tpu.memory_space<vmem>>, vector<1x224xf32>
    tpu.vector_store %arg11[%c6, %c0_41], %68 {strides = array<i32>} : memref<18x224xf32, #tpu.memory_space<vmem>>, vector<1x224xf32>,
    %70 = vector.extract_strided_slice %45 {offsets = [10, 0], sizes = [1, 224], strides = [1, 1]} : vector<28x224xf32> to vector<1x224xf32>
    %71 = vector.extract_strided_slice %45 {offsets = [11, 0], sizes = [1, 224], strides = [1, 1]} : vector<28x224xf32> to vector<1x224xf32>
    %72 = arith.maximumf %70, %71 : vector<1x224xf32>
    %c7 = arith.constant 7 : index
    %c0_42 = arith.constant 0 : index
    %73 = vector.load %arg11[%c7, %c0_42] : memref<18x224xf32, #tpu.memory_space<vmem>>, vector<1x224xf32>
    tpu.vector_store %arg11[%c7, %c0_42], %72 {strides = array<i32>} : memref<18x224xf32, #tpu.memory_space<vmem>>, vector<1x224xf32>,
    %74 = vector.extract_strided_slice %45 {offsets = [12, 0], sizes = [1, 224], strides = [1, 1]} : vector<28x224xf32> to vector<1x224xf32>
    %75 = vector.extract_strided_slice %45 {offsets = [13, 0], sizes = [1, 224], strides = [1, 1]} : vector<28x224xf32> to vector<1x224xf32>
    %76 = arith.maximumf %74, %75 : vector<1x224xf32>
    %c8 = arith.constant 8 : index
    %c0_43 = arith.constant 0 : index
    %77 = vector.load %arg11[%c8, %c0_43] : memref<18x224xf32, #tpu.memory_space<vmem>>, vector<1x224xf32>
    tpu.vector_store %arg11[%c8, %c0_43], %76 {strides = array<i32>} : memref<18x224xf32, #tpu.memory_space<vmem>>, vector<1x224xf32>,
    %78 = vector.extract_strided_slice %45 {offsets = [14, 0], sizes = [1, 224], strides = [1, 1]} : vector<28x224xf32> to vector<1x224xf32>
    %79 = vector.extract_strided_slice %45 {offsets = [15, 0], sizes = [1, 224], strides = [1, 1]} : vector<28x224xf32> to vector<1x224xf32>
    %80 = arith.maximumf %78, %79 : vector<1x224xf32>
    %c9 = arith.constant 9 : index
    %c0_44 = arith.constant 0 : index
    %81 = vector.load %arg11[%c9, %c0_44] : memref<18x224xf32, #tpu.memory_space<vmem>>, vector<1x224xf32>
    tpu.vector_store %arg11[%c9, %c0_44], %80 {strides = array<i32>} : memref<18x224xf32, #tpu.memory_space<vmem>>, vector<1x224xf32>,
    %82 = vector.extract_strided_slice %45 {offsets = [16, 0], sizes = [1, 224], strides = [1, 1]} : vector<28x224xf32> to vector<1x224xf32>
    %83 = vector.extract_strided_slice %45 {offsets = [17, 0], sizes = [1, 224], strides = [1, 1]} : vector<28x224xf32> to vector<1x224xf32>
    %84 = arith.maximumf %82, %83 : vector<1x224xf32>
    %c10 = arith.constant 10 : index
    %c0_45 = arith.constant 0 : index
    %85 = vector.load %arg11[%c10, %c0_45] : memref<18x224xf32, #tpu.memory_space<vmem>>, vector<1x224xf32>
    tpu.vector_store %arg11[%c10, %c0_45], %84 {strides = array<i32>} : memref<18x224xf32, #tpu.memory_space<vmem>>, vector<1x224xf32>,
    %86 = vector.extract_strided_slice %45 {offsets = [18, 0], sizes = [1, 224], strides = [1, 1]} : vector<28x224xf32> to vector<1x224xf32>
    %87 = vector.extract_strided_slice %45 {offsets = [19, 0], sizes = [1, 224], strides = [1, 1]} : vector<28x224xf32> to vector<1x224xf32>
    %88 = arith.maximumf %86, %87 : vector<1x224xf32>
    %c11 = arith.constant 11 : index
    %c0_46 = arith.constant 0 : index
    %89 = vector.load %arg11[%c11, %c0_46] : memref<18x224xf32, #tpu.memory_space<vmem>>, vector<1x224xf32>
    tpu.vector_store %arg11[%c11, %c0_46], %88 {strides = array<i32>} : memref<18x224xf32, #tpu.memory_space<vmem>>, vector<1x224xf32>,
    %90 = vector.extract_strided_slice %45 {offsets = [20, 0], sizes = [1, 224], strides = [1, 1]} : vector<28x224xf32> to vector<1x224xf32>
    %91 = vector.extract_strided_slice %45 {offsets = [21, 0], sizes = [1, 224], strides = [1, 1]} : vector<28x224xf32> to vector<1x224xf32>
    %92 = arith.maximumf %90, %91 : vector<1x224xf32>
    %c12 = arith.constant 12 : index
    %c0_47 = arith.constant 0 : index
    %93 = vector.load %arg11[%c12, %c0_47] : memref<18x224xf32, #tpu.memory_space<vmem>>, vector<1x224xf32>
    tpu.vector_store %arg11[%c12, %c0_47], %92 {strides = array<i32>} : memref<18x224xf32, #tpu.memory_space<vmem>>, vector<1x224xf32>,
    %94 = vector.extract_strided_slice %45 {offsets = [22, 0], sizes = [1, 224], strides = [1, 1]} : vector<28x224xf32> to vector<1x224xf32>
    %95 = vector.extract_strided_slice %45 {offsets = [23, 0], sizes = [1, 224], strides = [1, 1]} : vector<28x224xf32> to vector<1x224xf32>
    %96 = arith.maximumf %94, %95 : vector<1x224xf32>
    %c13 = arith.constant 13 : index
    %c0_48 = arith.constant 0 : index
    %97 = vector.load %arg11[%c13, %c0_48] : memref<18x224xf32, #tpu.memory_space<vmem>>, vector<1x224xf32>
    tpu.vector_store %arg11[%c13, %c0_48], %96 {strides = array<i32>} : memref<18x224xf32, #tpu.memory_space<vmem>>, vector<1x224xf32>,
    %98 = vector.extract_strided_slice %45 {offsets = [24, 0], sizes = [1, 224], strides = [1, 1]} : vector<28x224xf32> to vector<1x224xf32>
    %99 = vector.extract_strided_slice %45 {offsets = [25, 0], sizes = [1, 224], strides = [1, 1]} : vector<28x224xf32> to vector<1x224xf32>
    %100 = arith.maximumf %98, %99 : vector<1x224xf32>
    %c14 = arith.constant 14 : index
    %c0_49 = arith.constant 0 : index
    %101 = vector.load %arg11[%c14, %c0_49] : memref<18x224xf32, #tpu.memory_space<vmem>>, vector<1x224xf32>
    tpu.vector_store %arg11[%c14, %c0_49], %100 {strides = array<i32>} : memref<18x224xf32, #tpu.memory_space<vmem>>, vector<1x224xf32>,
    %102 = vector.extract_strided_slice %45 {offsets = [26, 0], sizes = [1, 224], strides = [1, 1]} : vector<28x224xf32> to vector<1x224xf32>
    %103 = vector.extract_strided_slice %45 {offsets = [27, 0], sizes = [1, 224], strides = [1, 1]} : vector<28x224xf32> to vector<1x224xf32>
    %104 = arith.maximumf %102, %103 : vector<1x224xf32>
    %c15 = arith.constant 15 : index
    %c0_50 = arith.constant 0 : index
    %105 = vector.load %arg11[%c15, %c0_50] : memref<18x224xf32, #tpu.memory_space<vmem>>, vector<1x224xf32>
    tpu.vector_store %arg11[%c15, %c0_50], %104 {strides = array<i32>} : memref<18x224xf32, #tpu.memory_space<vmem>>, vector<1x224xf32>,
    %cst_51 = arith.constant 0.000000e+00 : f32
    %106 = vector.broadcast %cst_51 : f32 to vector<14x448xf32>
    %c0_52 = arith.constant 0 : index
    %c0_53 = arith.constant 0 : index
    %107 = vector.load %arg11[%c0_52, %c0_53] : memref<18x224xf32, #tpu.memory_space<vmem>>, vector<14x224xf32>
    %108 = arith.truncf %107 : vector<14x224xf32> to vector<14x224xbf16>
    %c0_54 = arith.constant 0 : index
    %c0_55 = arith.constant 0 : index
    %c0_56 = arith.constant 0 : index
    %109 = vector.load %arg5[%c0_54, %c0_55, %c0_56] : memref<5x224x448xbf16, #tpu.memory_space<vmem>>, vector<1x224x448xbf16>
    %110 = vector.shape_cast %109 : vector<1x224x448xbf16> to vector<224x448xbf16>
    %cst_57 = arith.constant dense<0.000000e+00> : vector<14x448xf32>
    %111 = tpu.matmul %108, %110, %cst_57 {dimension_numbers = #tpu.dot_dimension_numbers<[1], [0], [0], [1], [0, 0, 1, 1], [], []>} : vector<14x224xbf16>, vector<224x448xbf16>, vector<14x448xf32> -> vector<14x448xf32>
    %112 = arith.addf %106, %111 : vector<14x448xf32>
    %c1_58 = arith.constant 1 : index
    %c0_59 = arith.constant 0 : index
    %113 = vector.load %arg11[%c1_58, %c0_59] : memref<18x224xf32, #tpu.memory_space<vmem>>, vector<14x224xf32>
    %114 = arith.truncf %113 : vector<14x224xf32> to vector<14x224xbf16>
    %c1_60 = arith.constant 1 : index
    %c0_61 = arith.constant 0 : index
    %c0_62 = arith.constant 0 : index
    %115 = vector.load %arg5[%c1_60, %c0_61, %c0_62] : memref<5x224x448xbf16, #tpu.memory_space<vmem>>, vector<1x224x448xbf16>
    %116 = vector.shape_cast %115 : vector<1x224x448xbf16> to vector<224x448xbf16>
    %cst_63 = arith.constant dense<0.000000e+00> : vector<14x448xf32>
    %117 = tpu.matmul %114, %116, %cst_63 {dimension_numbers = #tpu.dot_dimension_numbers<[1], [0], [0], [1], [0, 0, 1, 1], [], []>} : vector<14x224xbf16>, vector<224x448xbf16>, vector<14x448xf32> -> vector<14x448xf32>
    %118 = arith.addf %112, %117 : vector<14x448xf32>
    %c2_64 = arith.constant 2 : index
    %c0_65 = arith.constant 0 : index
    %119 = vector.load %arg11[%c2_64, %c0_65] : memref<18x224xf32, #tpu.memory_space<vmem>>, vector<14x224xf32>
    %120 = arith.truncf %119 : vector<14x224xf32> to vector<14x224xbf16>
    %c2_66 = arith.constant 2 : index
    %c0_67 = arith.constant 0 : index
    %c0_68 = arith.constant 0 : index
    %121 = vector.load %arg5[%c2_66, %c0_67, %c0_68] : memref<5x224x448xbf16, #tpu.memory_space<vmem>>, vector<1x224x448xbf16>
    %122 = vector.shape_cast %121 : vector<1x224x448xbf16> to vector<224x448xbf16>
    %cst_69 = arith.constant dense<0.000000e+00> : vector<14x448xf32>
    %123 = tpu.matmul %120, %122, %cst_69 {dimension_numbers = #tpu.dot_dimension_numbers<[1], [0], [0], [1], [0, 0, 1, 1], [], []>} : vector<14x224xbf16>, vector<224x448xbf16>, vector<14x448xf32> -> vector<14x448xf32>
    %124 = arith.addf %118, %123 : vector<14x448xf32>
    %c3_70 = arith.constant 3 : index
    %c0_71 = arith.constant 0 : index
    %125 = vector.load %arg11[%c3_70, %c0_71] : memref<18x224xf32, #tpu.memory_space<vmem>>, vector<14x224xf32>
    %126 = arith.truncf %125 : vector<14x224xf32> to vector<14x224xbf16>
    %c3_72 = arith.constant 3 : index
    %c0_73 = arith.constant 0 : index
    %c0_74 = arith.constant 0 : index
    %127 = vector.load %arg5[%c3_72, %c0_73, %c0_74] : memref<5x224x448xbf16, #tpu.memory_space<vmem>>, vector<1x224x448xbf16>
    %128 = vector.shape_cast %127 : vector<1x224x448xbf16> to vector<224x448xbf16>
    %cst_75 = arith.constant dense<0.000000e+00> : vector<14x448xf32>
    %129 = tpu.matmul %126, %128, %cst_75 {dimension_numbers = #tpu.dot_dimension_numbers<[1], [0], [0], [1], [0, 0, 1, 1], [], []>} : vector<14x224xbf16>, vector<224x448xbf16>, vector<14x448xf32> -> vector<14x448xf32>
    %130 = arith.addf %124, %129 : vector<14x448xf32>
    %c4_76 = arith.constant 4 : index
    %c0_77 = arith.constant 0 : index
    %131 = vector.load %arg11[%c4_76, %c0_77] : memref<18x224xf32, #tpu.memory_space<vmem>>, vector<14x224xf32>
    %132 = arith.truncf %131 : vector<14x224xf32> to vector<14x224xbf16>
    %c4_78 = arith.constant 4 : index
    %c0_79 = arith.constant 0 : index
    %c0_80 = arith.constant 0 : index
    %133 = vector.load %arg5[%c4_78, %c0_79, %c0_80] : memref<5x224x448xbf16, #tpu.memory_space<vmem>>, vector<1x224x448xbf16>
    %134 = vector.shape_cast %133 : vector<1x224x448xbf16> to vector<224x448xbf16>
    %cst_81 = arith.constant dense<0.000000e+00> : vector<14x448xf32>
    %135 = tpu.matmul %132, %134, %cst_81 {dimension_numbers = #tpu.dot_dimension_numbers<[1], [0], [0], [1], [0, 0, 1, 1], [], []>} : vector<14x224xbf16>, vector<224x448xbf16>, vector<14x448xf32> -> vector<14x448xf32>
    %136 = arith.addf %130, %135 : vector<14x448xf32>
    %c0_82 = arith.constant 0 : index
    %c0_83 = arith.constant 0 : index
    %137 = vector.load %arg6[%c0_82, %c0_83] : memref<1x448xf32, #tpu.memory_space<vmem>>, vector<1x448xf32>
    %138 = vector.broadcast %137 : vector<1x448xf32> to vector<14x448xf32>
    %139 = arith.addf %136, %138 : vector<14x448xf32>
    %cst_84 = arith.constant 0.000000e+00 : f32
    %140 = vector.broadcast %cst_84 : f32 to vector<14x448xf32>
    %141 = arith.maximumf %139, %140 : vector<14x448xf32>
    %142 = arith.truncf %141 : vector<14x448xf32> to vector<14x448xbf16>
    %c0_85 = arith.constant 0 : index
    %c0_86 = arith.constant 0 : index
    %c0_87 = arith.constant 0 : index
    %143 = vector.load %arg7[%c0_85, %c0_86, %c0_87] : memref<2x448x224xbf16, #tpu.memory_space<vmem>>, vector<1x448x224xbf16>
    %144 = vector.shape_cast %143 : vector<1x448x224xbf16> to vector<448x224xbf16>
    %cst_88 = arith.constant dense<0.000000e+00> : vector<14x224xf32>
    %145 = tpu.matmul %142, %144, %cst_88 {dimension_numbers = #tpu.dot_dimension_numbers<[1], [0], [0], [1], [0, 0, 1, 1], [], []>} : vector<14x448xbf16>, vector<448x224xbf16>, vector<14x224xf32> -> vector<14x224xf32>
    %c1_89 = arith.constant 1 : index
    %c0_90 = arith.constant 0 : index
    %c0_91 = arith.constant 0 : index
    %146 = vector.load %arg7[%c1_89, %c0_90, %c0_91] : memref<2x448x224xbf16, #tpu.memory_space<vmem>>, vector<1x448x224xbf16>
    %147 = vector.shape_cast %146 : vector<1x448x224xbf16> to vector<448x224xbf16>
    %cst_92 = arith.constant dense<0.000000e+00> : vector<14x224xf32>
    %148 = tpu.matmul %142, %147, %cst_92 {dimension_numbers = #tpu.dot_dimension_numbers<[1], [0], [0], [1], [0, 0, 1, 1], [], []>} : vector<14x448xbf16>, vector<448x224xbf16>, vector<14x224xf32> -> vector<14x224xf32>
    %149 = arith.maximumf %145, %148 : vector<14x224xf32>
    %c0_93 = arith.constant 0 : index
    %c0_94 = arith.constant 0 : index
    %150 = vector.load %arg9[%c0_93, %c0_94] : memref<1x128xf32, #tpu.memory_space<vmem>>, vector<1x128xf32>
    %151 = vector.extract_strided_slice %149 {offsets = [0, 0], sizes = [1, 224], strides = [1, 1]} : vector<14x224xf32> to vector<1x224xf32>
    %152 = vector.extract_strided_slice %149 {offsets = [1, 0], sizes = [1, 224], strides = [1, 1]} : vector<14x224xf32> to vector<1x224xf32>
    %153 = arith.maximumf %151, %152 : vector<1x224xf32>
    %154 = arith.truncf %153 : vector<1x224xf32> to vector<1x224xbf16>
    %c0_95 = arith.constant 0 : index
    %c0_96 = arith.constant 0 : index
    %c0_97 = arith.constant 0 : index
    %155 = vector.load %arg8[%c0_95, %c0_96, %c0_97] : memref<7x224x128xbf16, #tpu.memory_space<vmem>>, vector<1x224x128xbf16>
    %156 = vector.shape_cast %155 : vector<1x224x128xbf16> to vector<224x128xbf16>
    %cst_98 = arith.constant dense<0.000000e+00> : vector<1x128xf32>
    %157 = tpu.matmul %154, %156, %cst_98 {dimension_numbers = #tpu.dot_dimension_numbers<[1], [0], [0], [1], [0, 0, 1, 1], [], []>} : vector<1x224xbf16>, vector<224x128xbf16>, vector<1x128xf32> -> vector<1x128xf32>
    %158 = arith.addf %150, %157 : vector<1x128xf32>
    %159 = vector.extract_strided_slice %149 {offsets = [2, 0], sizes = [1, 224], strides = [1, 1]} : vector<14x224xf32> to vector<1x224xf32>
    %160 = vector.extract_strided_slice %149 {offsets = [3, 0], sizes = [1, 224], strides = [1, 1]} : vector<14x224xf32> to vector<1x224xf32>
    %161 = arith.maximumf %159, %160 : vector<1x224xf32>
    %162 = arith.truncf %161 : vector<1x224xf32> to vector<1x224xbf16>
    %c1_99 = arith.constant 1 : index
    %c0_100 = arith.constant 0 : index
    %c0_101 = arith.constant 0 : index
    %163 = vector.load %arg8[%c1_99, %c0_100, %c0_101] : memref<7x224x128xbf16, #tpu.memory_space<vmem>>, vector<1x224x128xbf16>
    %164 = vector.shape_cast %163 : vector<1x224x128xbf16> to vector<224x128xbf16>
    %cst_102 = arith.constant dense<0.000000e+00> : vector<1x128xf32>
    %165 = tpu.matmul %162, %164, %cst_102 {dimension_numbers = #tpu.dot_dimension_numbers<[1], [0], [0], [1], [0, 0, 1, 1], [], []>} : vector<1x224xbf16>, vector<224x128xbf16>, vector<1x128xf32> -> vector<1x128xf32>
    %166 = arith.addf %158, %165 : vector<1x128xf32>
    %167 = vector.extract_strided_slice %149 {offsets = [4, 0], sizes = [1, 224], strides = [1, 1]} : vector<14x224xf32> to vector<1x224xf32>
    %168 = vector.extract_strided_slice %149 {offsets = [5, 0], sizes = [1, 224], strides = [1, 1]} : vector<14x224xf32> to vector<1x224xf32>
    %169 = arith.maximumf %167, %168 : vector<1x224xf32>
    %170 = arith.truncf %169 : vector<1x224xf32> to vector<1x224xbf16>
    %c2_103 = arith.constant 2 : index
    %c0_104 = arith.constant 0 : index
    %c0_105 = arith.constant 0 : index
    %171 = vector.load %arg8[%c2_103, %c0_104, %c0_105] : memref<7x224x128xbf16, #tpu.memory_space<vmem>>, vector<1x224x128xbf16>
    %172 = vector.shape_cast %171 : vector<1x224x128xbf16> to vector<224x128xbf16>
    %cst_106 = arith.constant dense<0.000000e+00> : vector<1x128xf32>
    %173 = tpu.matmul %170, %172, %cst_106 {dimension_numbers = #tpu.dot_dimension_numbers<[1], [0], [0], [1], [0, 0, 1, 1], [], []>} : vector<1x224xbf16>, vector<224x128xbf16>, vector<1x128xf32> -> vector<1x128xf32>
    %174 = arith.addf %166, %173 : vector<1x128xf32>
    %175 = vector.extract_strided_slice %149 {offsets = [6, 0], sizes = [1, 224], strides = [1, 1]} : vector<14x224xf32> to vector<1x224xf32>
    %176 = vector.extract_strided_slice %149 {offsets = [7, 0], sizes = [1, 224], strides = [1, 1]} : vector<14x224xf32> to vector<1x224xf32>
    %177 = arith.maximumf %175, %176 : vector<1x224xf32>
    %178 = arith.truncf %177 : vector<1x224xf32> to vector<1x224xbf16>
    %c3_107 = arith.constant 3 : index
    %c0_108 = arith.constant 0 : index
    %c0_109 = arith.constant 0 : index
    %179 = vector.load %arg8[%c3_107, %c0_108, %c0_109] : memref<7x224x128xbf16, #tpu.memory_space<vmem>>, vector<1x224x128xbf16>
    %180 = vector.shape_cast %179 : vector<1x224x128xbf16> to vector<224x128xbf16>
    %cst_110 = arith.constant dense<0.000000e+00> : vector<1x128xf32>
    %181 = tpu.matmul %178, %180, %cst_110 {dimension_numbers = #tpu.dot_dimension_numbers<[1], [0], [0], [1], [0, 0, 1, 1], [], []>} : vector<1x224xbf16>, vector<224x128xbf16>, vector<1x128xf32> -> vector<1x128xf32>
    %182 = arith.addf %174, %181 : vector<1x128xf32>
    %183 = vector.extract_strided_slice %149 {offsets = [8, 0], sizes = [1, 224], strides = [1, 1]} : vector<14x224xf32> to vector<1x224xf32>
    %184 = vector.extract_strided_slice %149 {offsets = [9, 0], sizes = [1, 224], strides = [1, 1]} : vector<14x224xf32> to vector<1x224xf32>
    %185 = arith.maximumf %183, %184 : vector<1x224xf32>
    %186 = arith.truncf %185 : vector<1x224xf32> to vector<1x224xbf16>
    %c4_111 = arith.constant 4 : index
    %c0_112 = arith.constant 0 : index
    %c0_113 = arith.constant 0 : index
    %187 = vector.load %arg8[%c4_111, %c0_112, %c0_113] : memref<7x224x128xbf16, #tpu.memory_space<vmem>>, vector<1x224x128xbf16>
    %188 = vector.shape_cast %187 : vector<1x224x128xbf16> to vector<224x128xbf16>
    %cst_114 = arith.constant dense<0.000000e+00> : vector<1x128xf32>
    %189 = tpu.matmul %186, %188, %cst_114 {dimension_numbers = #tpu.dot_dimension_numbers<[1], [0], [0], [1], [0, 0, 1, 1], [], []>} : vector<1x224xbf16>, vector<224x128xbf16>, vector<1x128xf32> -> vector<1x128xf32>
    %190 = arith.addf %182, %189 : vector<1x128xf32>
    %191 = vector.extract_strided_slice %149 {offsets = [10, 0], sizes = [1, 224], strides = [1, 1]} : vector<14x224xf32> to vector<1x224xf32>
    %192 = vector.extract_strided_slice %149 {offsets = [11, 0], sizes = [1, 224], strides = [1, 1]} : vector<14x224xf32> to vector<1x224xf32>
    %193 = arith.maximumf %191, %192 : vector<1x224xf32>
    %194 = arith.truncf %193 : vector<1x224xf32> to vector<1x224xbf16>
    %c5_115 = arith.constant 5 : index
    %c0_116 = arith.constant 0 : index
    %c0_117 = arith.constant 0 : index
    %195 = vector.load %arg8[%c5_115, %c0_116, %c0_117] : memref<7x224x128xbf16, #tpu.memory_space<vmem>>, vector<1x224x128xbf16>
    %196 = vector.shape_cast %195 : vector<1x224x128xbf16> to vector<224x128xbf16>
    %cst_118 = arith.constant dense<0.000000e+00> : vector<1x128xf32>
    %197 = tpu.matmul %194, %196, %cst_118 {dimension_numbers = #tpu.dot_dimension_numbers<[1], [0], [0], [1], [0, 0, 1, 1], [], []>} : vector<1x224xbf16>, vector<224x128xbf16>, vector<1x128xf32> -> vector<1x128xf32>
    %198 = arith.addf %190, %197 : vector<1x128xf32>
    %199 = vector.extract_strided_slice %149 {offsets = [12, 0], sizes = [1, 224], strides = [1, 1]} : vector<14x224xf32> to vector<1x224xf32>
    %200 = vector.extract_strided_slice %149 {offsets = [13, 0], sizes = [1, 224], strides = [1, 1]} : vector<14x224xf32> to vector<1x224xf32>
    %201 = arith.maximumf %199, %200 : vector<1x224xf32>
    %202 = arith.truncf %201 : vector<1x224xf32> to vector<1x224xbf16>
    %c6_119 = arith.constant 6 : index
    %c0_120 = arith.constant 0 : index
    %c0_121 = arith.constant 0 : index
    %203 = vector.load %arg8[%c6_119, %c0_120, %c0_121] : memref<7x224x128xbf16, #tpu.memory_space<vmem>>, vector<1x224x128xbf16>
    %204 = vector.shape_cast %203 : vector<1x224x128xbf16> to vector<224x128xbf16>
    %cst_122 = arith.constant dense<0.000000e+00> : vector<1x128xf32>
    %205 = tpu.matmul %202, %204, %cst_122 {dimension_numbers = #tpu.dot_dimension_numbers<[1], [0], [0], [1], [0, 0, 1, 1], [], []>} : vector<1x224xbf16>, vector<224x128xbf16>, vector<1x128xf32> -> vector<1x128xf32>
    %206 = arith.addf %198, %205 : vector<1x128xf32>
    %c0_123 = arith.constant 0 : index
    %c0_124 = arith.constant 0 : index
    %c0_125 = arith.constant 0 : index
    %207 = vector.load %arg10[%c0_123, %c0_124, %c0_125] : memref<1x1x128xf32, #tpu.memory_space<vmem>>, vector<1x1x128xf32>
    %208 = vector.shape_cast %207 : vector<1x1x128xf32> to vector<1x128xf32>
    %209 = vector.shape_cast %206 : vector<1x128xf32> to vector<1x1x128xf32>
    tpu.vector_store %arg10[%c0_123, %c0_124, %c0_125], %209 {strides = array<i32>} : memref<1x1x128xf32, #tpu.memory_space<vmem>>, vector<1x1x128xf32>,
    return
  }
  func.func @transform_0(%arg0: i32) -> (i32, i32, i32) {
    %c0_i32 = arith.constant 0 : i32
    %c0_i32_0 = arith.constant 0 : i32
    %c0_i32_1 = arith.constant 0 : i32
    return %arg0, %c0_i32, %c0_i32_0 : i32, i32, i32
  }
  func.func @transform_1(%arg0: i32) -> (i32, i32, i32) {
    %c0_i32 = arith.constant 0 : i32
    %c0_i32_0 = arith.constant 0 : i32
    %c0_i32_1 = arith.constant 0 : i32
    %c0_i32_2 = arith.constant 0 : i32
    return %c0_i32, %c0_i32_0, %c0_i32_1 : i32, i32, i32
  }
  func.func @transform_2(%arg0: i32) -> (i32, i32) {
    %c0_i32 = arith.constant 0 : i32
    %c0_i32_0 = arith.constant 0 : i32
    %c0_i32_1 = arith.constant 0 : i32
    return %c0_i32, %c0_i32_0 : i32, i32
  }
  func.func @transform_3(%arg0: i32) -> (i32, i32, i32) {
    %c0_i32 = arith.constant 0 : i32
    %c0_i32_0 = arith.constant 0 : i32
    %c0_i32_1 = arith.constant 0 : i32
    %c0_i32_2 = arith.constant 0 : i32
    return %c0_i32, %c0_i32_0, %c0_i32_1 : i32, i32, i32
  }
  func.func @transform_4(%arg0: i32) -> (i32, i32, i32) {
    %c0_i32 = arith.constant 0 : i32
    %c0_i32_0 = arith.constant 0 : i32
    %c0_i32_1 = arith.constant 0 : i32
    %c0_i32_2 = arith.constant 0 : i32
    return %c0_i32, %c0_i32_0, %c0_i32_1 : i32, i32, i32
  }
  func.func @transform_5(%arg0: i32) -> (i32, i32) {
    %c0_i32 = arith.constant 0 : i32
    %c0_i32_0 = arith.constant 0 : i32
    %c0_i32_1 = arith.constant 0 : i32
    return %c0_i32, %c0_i32_0 : i32, i32
  }
  func.func @transform_6(%arg0: i32) -> (i32, i32, i32) {
    %c0_i32 = arith.constant 0 : i32
    %c0_i32_0 = arith.constant 0 : i32
    %c0_i32_1 = arith.constant 0 : i32
    %c0_i32_2 = arith.constant 0 : i32
    return %c0_i32, %c0_i32_0, %c0_i32_1 : i32, i32, i32
  }
  func.func @transform_7(%arg0: i32) -> (i32, i32, i32) {
    %c0_i32 = arith.constant 0 : i32
    %c0_i32_0 = arith.constant 0 : i32
    %c0_i32_1 = arith.constant 0 : i32
    %c0_i32_2 = arith.constant 0 : i32
    return %c0_i32, %c0_i32_0, %c0_i32_1 : i32, i32, i32
  }
  func.func @transform_8(%arg0: i32) -> (i32, i32) {
    %c0_i32 = arith.constant 0 : i32
    %c0_i32_0 = arith.constant 0 : i32
    %c0_i32_1 = arith.constant 0 : i32
    return %c0_i32, %c0_i32_0 : i32, i32
  }
  func.func @transform_9(%arg0: i32) -> (i32, i32, i32) {
    %c0_i32 = arith.constant 0 : i32
    %c0_i32_0 = arith.constant 0 : i32
    %c0_i32_1 = arith.constant 0 : i32
    return %arg0, %c0_i32, %c0_i32_0 : i32, i32, i32
  }
}

</mosaic_0001>

<bundles_post_ra>
// kernel: tile.13
= control target key start
LH: loop header
LB: loop body
LE: loop exit
PB: predicated region body
PF: predicated region fallthrough
CT: control target
= control target key end

     0   :  { %s40_s0 = inlined_call_operand.vmem [shape: f32[16], index: 0, kind: input, shape index: {}]   ;;  %s41_s1 = inlined_call_operand.vmem [shape: f32[28,16], index: 1, kind: output, shape index: {}]  }
   0x1   :  { %v4_v0 = vld [vmem:[%s40_s0] ss:$0 sm:$0xff] }
   0x2   :  { %5 = vst [vmem:[%s41_s1] sm:$0xff] %v4_v0 }
   0x3   :  { %12 = vst [vmem:[%s41_s1 + $0x8] sm:$0xff] %v4_v0 }
   0x4   :  { %13 = vst [vmem:[%s41_s1 + $0x10] sm:$0xff] %v4_v0 }
   0x5   :  { %14 = vst [vmem:[%s41_s1 + $0x18] sm:$0xff] %v4_v0 }

// kernel: tile.14
= control target key start
LH: loop header
LB: loop body
LE: loop exit
PB: predicated region body
PF: predicated region fallthrough
CT: control target
= control target key end

     0   :  { %s88_s8 = smov 112   ;;  %s89_s11 = smov 80   ;;  %vm3_vm0 = vcmask 130048   ;;  %vm9_vm1 = vcmask 1048448   ;;  %vm15_vm2 = vcmask 917248   ;;  %vm21_vm3 = vcmask 786048   ;;  %s141_s0 = inlined_call_operand.vmem [shape: f32[28,16], index: 0, kind: input, shape index: {}]   ;;  %s142_s1 = inlined_call_operand.vmem [shape: f32[1,448], index: 1, kind: output, shape index: {}]  }
   0x1   :  { %v71_v0 = vld [vmem:[%s141_s0 + $0x7] ss:$8 sm:$0x7]   ;;  %v73_v1 = vld [vmem:[%s141_s0 + $0x5] ss:$8 sm:$0x7]  }
   0x2   :  { %7 = vrot.lane.b32.xlu0 %v71_v0, %s88_s8  ;;  %19 = vrot.lane.b32.xlu1 %v73_v1, %s89_s11  ;;  %v75_v2 = vld [vmem:[%s141_s0 + $0x3] ss:$8 sm:$0xf]   ;;  %s90_s14 = smov 48   ;;  %s91_s19 = smov 96   ;;  %vm27_vm4 = vcmask 654848  }
   0x3   :  { %31 = vrot.lane.b32.xlu2 %v75_v2, %s90_s14  ;;  %v72_v3 = vld [vmem:[%s141_s0 + $0x6] ss:$8 sm:$0x7]   ;;  %v74_v4 = vld [vmem:[%s141_s0 + $0x4] ss:$8 sm:$0x7]  }
   0x4   :  { %s92_s20 = smov 64   ;;  %v76_v5 = vld [vmem:[%s141_s0 + $0x2] ss:$8 sm:$0xf]   ;;  %s93_s23 = smov 32   ;;  %vm33_vm5 = vcmask 523648  }
   0x5   :  { %v77_v6 = vld [vmem:[%s141_s0 + $0x1] ss:$8 sm:$0xf]   ;;  %s94_s26 = smov 16   ;;  %vm39_vm6 = vcmask 392448   ;;  %vm45_vm7 = vcmask 261248  }
   0x6   :  { %v2_v7 = vld [vmem:[%s141_s0] ss:$8 sm:$0xf]  }
   0x7   :  { %4 = vst.msk [vmem:[#allocation0] ss:$8 sm:$0xf] %vm3_vm0, %v2_v7  }
   0xa   :  { %13 = vrot.lane.b32.xlu0 %v72_v3, %s91_s19  ;;  %25 = vrot.lane.b32.xlu1 %v74_v4, %s92_s20 }
   0xb   :  { %37 = vrot.lane.b32.xlu2 %v76_v5, %s93_s23 }
  0x12   :  { %43 = vrot.lane.b32.xlu0 %v77_v6, %s94_s26 }
  0x5d   :  { %v32_v8 = vpop.permute.xlu2 %31  }
  0x65   :  { %v38_v9 = vpop.permute.xlu2 %37  }
  0x74   :  { %v8_v10 = vpop.permute.xlu0 %7   ;;  %v20_v11 = vpop.permute.xlu1 %19  }
  0x75   :  { %10 = vst.msk [vmem:[#allocation0] ss:$8 sm:$0x7] %vm9_vm1, %v8_v10  }
  0x7c   :  { %v14_v12 = vpop.permute.xlu0 %13   ;;  %v26_v13 = vpop.permute.xlu1 %25  }
  0x7d   :  { %16 = vst.msk [vmem:[#allocation0] ss:$8 sm:$0x7] %vm15_vm2, %v14_v12  }
  0x7e   :  { %22 = vst.msk [vmem:[#allocation0] ss:$8 sm:$0x7] %vm21_vm3, %v20_v11  }
  0x7f   :  { %28 = vst.msk [vmem:[#allocation0] ss:$8 sm:$0x7] %vm27_vm4, %v26_v13  }
  0x80   :  { %34 = vst.msk [vmem:[#allocation0] ss:$8 sm:$0xf] %vm33_vm5, %v32_v8  }
  0x81   :  { %40 = vst.msk [vmem:[#allocation0] ss:$8 sm:$0xf] %vm39_vm6, %v38_v9  }
  0x84   :  { %v44_v14 = vpop.permute.xlu0 %43  }
  0x85   :  { %46 = vst.msk [vmem:[#allocation0] ss:$8 sm:$0xf] %vm45_vm7, %v44_v14  }
  0x8c   :  { %v49_v15 = vld [vmem:[#allocation0] sm:$0x1]  ;;  %v54_v16 = vld [vmem:[#allocation0 + $0x8] sm:$0x1]  ;;  %v60_v17 = vld [vmem:[#allocation0 + $0x10] sm:$0x1] }
  0x8d   :  { %52 = vst [vmem:[%s142_s1] sm:$0x1] %v49_v15  ;;  %v66_v18 = vld [vmem:[#allocation0 + $0x18] sm:$0x1] }
  0x8e   :  { %78 = vst [vmem:[%s142_s1 + $0x1] sm:$0x1] %v54_v16 }
  0x8f   :  { %79 = vst [vmem:[%s142_s1 + $0x2] sm:$0x1] %v60_v17 }
  0x90   :  { %80 = vst [vmem:[%s142_s1 + $0x3] sm:$0x1] %v66_v18 }

// kernel: tile.18
= control target key start
LH: loop header
LB: loop body
LE: loop exit
PB: predicated region body
PF: predicated region fallthrough
CT: control target
= control target key end

     0   :  { %s28_s0 = inlined_call_operand.vmem [shape: f32[32], index: 0, kind: input, shape index: {}]   ;;  %s29_s1 = inlined_call_operand.vmem [shape: f32[14,32], index: 1, kind: output, shape index: {}]  }
   0x1   :  { %v4_v0 = vld [vmem:[%s28_s0] ss:$0 sm:$0xff] }
   0x2   :  { %5 = vst [vmem:[%s29_s1] sm:$0xff] %v4_v0 }
   0x3   :  { %8 = vst [vmem:[%s29_s1 + $0x8] sm:$0xff] %v4_v0 }

// kernel: tile.19
= control target key start
LH: loop header
LB: loop body
LE: loop exit
PB: predicated region body
PF: predicated region fallthrough
CT: control target
= control target key end

     0   :  { %s56_s8 = smov 96   ;;  %s57_s11 = smov 32   ;;  %vm3_vm0 = vcmask 261120   ;;  %vm9_vm1 = vcmask 1048320   ;;  %vm15_vm2 = vcmask 785920   ;;  %vm21_vm3 = vcmask 523520   ;;  %s93_s0 = inlined_call_operand.vmem [shape: f32[14,32], index: 0, kind: input, shape index: {}]   ;;  %s94_s1 = inlined_call_operand.vmem [shape: f32[1,448], index: 1, kind: output, shape index: {}]  }
   0x1   :  { %v47_v0 = vld [vmem:[%s93_s0 + $0x3] ss:$4 sm:$0x7]   ;;  %v49_v1 = vld [vmem:[%s93_s0 + $0x1] ss:$4 sm:$0xf]  }
   0x2   :  { %7 = vrot.lane.b32.xlu0 %v47_v0, %s56_s8  ;;  %19 = vrot.lane.b32.xlu1 %v49_v1, %s57_s11  ;;  %v48_v2 = vld [vmem:[%s93_s0 + $0x2] ss:$4 sm:$0x7]   ;;  %s58_s14 = smov 64  }
   0x3   :  { %v2_v3 = vld [vmem:[%s93_s0] ss:$4 sm:$0xf]  }
   0x4   :  { %4 = vst.msk [vmem:[#allocation0] ss:$8 sm:$0xf] %vm3_vm0, %v2_v3  }
   0xa   :  { %13 = vrot.lane.b32.xlu0 %v48_v2, %s58_s14 }
  0x74   :  { %v8_v4 = vpop.permute.xlu0 %7   ;;  %v20_v5 = vpop.permute.xlu1 %19  }
  0x75   :  { %10 = vst.msk [vmem:[#allocation0] ss:$8 sm:$0x7] %vm9_vm1, %v8_v4  }
  0x7c   :  { %v14_v6 = vpop.permute.xlu0 %13  }
  0x7d   :  { %16 = vst.msk [vmem:[#allocation0] ss:$8 sm:$0x7] %vm15_vm2, %v14_v6  }
  0x7e   :  { %22 = vst.msk [vmem:[#allocation0] ss:$8 sm:$0xf] %vm21_vm3, %v20_v5  }
  0x85   :  { %v25_v7 = vld [vmem:[#allocation0] sm:$0x1]  ;;  %v30_v8 = vld [vmem:[#allocation0 + $0x8] sm:$0x1]  ;;  %v36_v9 = vld [vmem:[#allocation0 + $0x10] sm:$0x1] }
  0x86   :  { %28 = vst [vmem:[%s94_s1] sm:$0x1] %v25_v7  ;;  %v42_v10 = vld [vmem:[#allocation0 + $0x18] sm:$0x1] }
  0x87   :  { %50 = vst [vmem:[%s94_s1 + $0x1] sm:$0x1] %v30_v8 }
  0x88   :  { %51 = vst [vmem:[%s94_s1 + $0x2] sm:$0x1] %v36_v9 }
  0x89   :  { %52 = vst [vmem:[%s94_s1 + $0x3] sm:$0x1] %v42_v10 }

// kernel: convnet_forward.1
= control target key start
LH: loop header
LB: loop body
LE: loop exit
PB: predicated region body
PF: predicated region fallthrough
CT: control target
= control target key end

     0   :  { %14 = vsyncpa [#allocation4], 0  ;;  %s15191_s0 = inlined_call_operand.vmem [shape: f32[2,32,28], index: 0, kind: input, shape index: {}]   ;;  %s15192_s1 = inlined_call_operand.vmem [shape: bf16[5,28,448], index: 1, kind: input, shape index: {}]   ;;  %s15193_s2 = inlined_call_operand.vmem [shape: f32[1,448], index: 2, kind: input, shape index: {}]   ;;  %s15194_s3 = inlined_call_operand.vmem [shape: bf16[2,448,224], index: 3, kind: input, shape index: {}]   ;;  %s15195_s4 = inlined_call_operand.vmem [shape: bf16[5,224,448], index: 4, kind: input, shape index: {}]   ;;  %s15196_s5 = inlined_call_operand.vmem [shape: f32[1,448], index: 5, kind: input, shape index: {}]   ;;  %s15197_s6 = inlined_call_operand.vmem [shape: bf16[2,448,224], index: 6, kind: input, shape index: {}]   ;;  %s15198_s7 = inlined_call_operand.vmem [shape: bf16[7,224,128], index: 7, kind: input, shape index: {}]   ;;  %s15199_s8 = inlined_call_operand.vmem [shape: f32[1,128], index: 8, kind: input, shape index: {}]   ;;  %s15200_s9 = inlined_call_operand.hbm [shape: f32[2,1,128], index: 9, kind: output, shape index: {}]  }
   0x1   :  { %16 = vsyncpa [#allocation4 + $0x1], 0  ;;  %s10723_s30 = smov 0   ;;  %s10725_s10 = smov 0  }
   0x2   :  { %s10727_s11 = smov 0   ;;  %s10729_s12 = smov 0  }
   0x3 LB: > { %s10744_s13 = sadd.s32 4294967295, %s10670_s12   ;;  %s6730_s14 = sadd.s32 4294967294, %s10670_s12   ;;  %s10670_s12 = sphi %s10729_s12, %s15208_s12   ;;  %s10666_s11 = sphi %s10727_s11, %s15207_s11   ;;  %s10662_s10 = sphi %s10725_s10, %s15206_s10   ;;  %s10658_s30 = sphi %s10723_s30, %s15205_s30  }
   0x4   : > { %s10748_s15 = sadd.s32 1, %s10670_s12   ;;  %s223_s16 = sadd.s32 1, %s10666_s11 }
   0x5   : > { %s220_s17 = ssub.s32 %s10670_s12, %s10748_s15  ;;  %p233_p0 = scmp.ne.s32.totalorder %s10666_s11, %s10662_s10 }
   0x6   : > { %p221_p1 = scmp.eq.s32.totalorder %s220_s17, 0  ;;  %p234_p2 = scmp.eq.s32.totalorder %s10744_s13, 1 }
   0x7   : > { %p239_p3 = scmp.ne.s32.totalorder %s10662_s10, %s10658_s30  ;;  %p240_p4 = scmp.eq.s32.totalorder %s6730_s14, 1 }
   0x8   : > { %s10759_s18 = scalar_select %p221_p1, %s10666_s11, %s223_s16  }
   0x9   : > { %p10761_p5 = por %p234_p2, %p233_p0  ;;  %p10765_p6 = por %p240_p4, %p239_p3 }
   0xa   : > { %p6733_p7 = scmp.ge.s32.totalorder %s10670_s12, 1  ;;  %p290_p8 = scmp.lt.s32.totalorder %s10670_s12, 3 }
   0xc   : > { %p291_p9 = pnand %p6733_p7, %p290_p8 }
   0xd   : > { %p325_p10 = scmp.lt.s32.totalorder (!%p291_p9), %s10744_s13, 1  ;;  %s6671_s17 = scalar_lea.hbm (!%p291_p9), %s15200_s9, %s10744_s13 }
   0xe   : > { %294 = sbr.rel (%p291_p9) target bundleno = 1441 (0x5a1), region = 56  ;;  %s10628_s28 = scalar_lea.hbm (!%p291_p9), %s15200_s9, 2 }
  0x13   : > { %v9934_v0 = vld [vmem:[%s15192_s1 + $0x64] sm:$0xf]  ;;  %v6764_v1 = vld [vmem:[%s15192_s1 + $0x70] sm:$0x30]  ;;  %vm413_vm0 = vcmask 1045504   ;;  %s326_s29 = scalar_select %p325_p10, %s10744_s13, 1 }
  0x14   : > { %v6767_v2 = vor.u32 %v9934_v0, %v6764_v1  ;;  %v6762_v3 = vld [vmem:[%s15192_s1 + $0x60] sm:$0xf]  ;;  %v9936_v4 = vld [vmem:[%s15192_s1 + $0x6c] sm:$0x30]  ;;  %v9935_v5 = vld [vmem:[%s15192_s1 + $0x6c] sm:$0xf] }
  0x15   : > { %v6763_v6 = vor.u32 %v9936_v4, %v6762_v3  ;;  %v6772_v7 = vld [vmem:[%s15192_s1 + $0x78] sm:$0x30]  ;;  %v9930_v8 = vld [vmem:[%s15192_s1 + $0x44] sm:$0xf]  ;;  %v6748_v9 = vld [vmem:[%s15192_s1 + $0x50] sm:$0xf0] }
  0x16   : > { %v418_v10 = vsel %vm413_vm0, %v6767_v2, 0  ;;  %v6775_v11 = vor.u32 %v9935_v5, %v6772_v7  ;;  %v6746_v12 = vld [vmem:[%s15192_s1 + $0x40] sm:$0xf]  ;;  %v9932_v13 = vld [vmem:[%s15192_s1 + $0x4c] sm:$0xf0]  ;;  %v6751_v15 = vor.u32 %v9930_v8, %v6748_v9  ;;  %s9921_s22 = sshll.u32 %s326_s29, 5 }
  0x17   : > { %10564 = vmatpush.bf16.msra.mxu2 %v418_v10  ;;  %v415_v14 = vsel %vm413_vm0, %v6763_v6, 0  ;;  %451 = vmatpush.bf16.msra.mxu1 %v418_v10  ;;  %v9931_v16 = vld [vmem:[%s15192_s1 + $0x4c] sm:$0xf]  ;;  %v6756_v17 = vld [vmem:[%s15192_s1 + $0x58] sm:$0xf0]  ;;  %v6747_v19 = vor.u32 %v9932_v13, %v6746_v12  ;;  %s329_s27 = scalar_lea.vmem %s15191_s0, %s9921_s22  ;;  %vm406_vm1 = vcmask 228352  }
  0x18   : > { %432 = vmatpush.bf16.msra.mxu0 %v415_v14  ;;  %v424_v18 = vsel %vm413_vm0, %v6775_v11, 0  ;;  %v6770_v20 = vld [vmem:[%s15192_s1 + $0x68] sm:$0xf]  ;;  %v6759_v21 = vor.u32 %v9931_v16, %v6756_v17  ;;  %v9937_v22 = vld [vmem:[%s15192_s1 + $0x74] sm:$0x30]  ;;  %v333_v25 = vld [vmem:[%s329_s27 + $0x10] sm:$0xff] }
  0x19   : > { %489 = vmatpush.bf16.msra.mxu3 %v424_v18  ;;  %v9926_v23 = vld [vmem:[%s15192_s1 + $0x24] sm:$0xf]  ;;  %v6804_v24 = vld [vmem:[%s15192_s1 + $0x30] sm:$0x30]  ;;  %v334_v26 = vld [vmem:[%s329_s27 + $0x18] sm:$0xff]  ;;  %v6771_v28 = vor.u32 %v9937_v22, %v6770_v20  ;;  %vm641_vm3 = vcmask 1046528  }
  0x1a   : > { %v331_v27 = vld [vmem:[%s329_s27] sm:$0xff]  ;;  %v6807_v29 = vor.u32 %v9926_v23, %v6804_v24  ;;  %v10827_v30 = vpack.c.bf16 %v334_v26, %v333_v25  ;;  %v332_v31 = vld [vmem:[%s329_s27 + $0x8] sm:$0xff]  ;;  %v9933_v33 = vld [vmem:[%s15192_s1 + $0x54] sm:$0xf0]  ;;  %vm354_vm2 = vsmask.f32 7424 }
  0x1b   : > { %10565 = vmatpush.bf16.msra.mxu2 %v6751_v15  ;;  %452 = vmatpush.bf16.msra.mxu1 %v6751_v15  ;;  %v6754_v32 = vld [vmem:[%s15192_s1 + $0x48] sm:$0xf]  ;;  %v10835_v34 = vpack.c.bf16 %v332_v31, %v331_v27  ;;  %v421_v35 = vsel %vm413_vm0, %v6771_v28, 0  ;;  %v9922_v37 = vld [vmem:[%s15192_s1 + $0x4] sm:$0xf]  ;;  %vm1499_vm5 = vcmask 523264  }
  0x1c   : > { %433 = vmatpush.bf16.msra.mxu0 %v6747_v19  ;;  %v546_v36 = vsel %vm413_vm0, %v6807_v29, 0  ;;  %v6788_v38 = vld [vmem:[%s15192_s1 + $0x10] sm:$0xf0]  ;;  %v363_v39 = vshll.u32 %v10827_v30, 16  ;;  %v367_v40 = vshrl.u32 %v10827_v30, 16  ;;  %v6755_v41 = vor.u32 %v9933_v33, %v6754_v32  ;;  %s323_s27 = sand.u32 1, %s10662_s10  }
  0x1d   : > { %490 = vmatpush.bf16.msra.mxu3 %v6759_v21  ;;  %v6802_v42 = vld [vmem:[%s15192_s1 + $0x20] sm:$0xf]  ;;  %v9928_v43 = vld [vmem:[%s15192_s1 + $0x2c] sm:$0x30]  ;;  %v356_v44 = vshrl.u32 %v10835_v34, 16  ;;  %v358_v45 = vshll.u32 %v10835_v34, 16  ;;  %v6791_v46 = vor.u32 %v9922_v37, %v6788_v38 }
  0x1e   : > { %v6803_v47 = vor.u32 %v9928_v43, %v6802_v42  ;;  %v9927_v48 = vld [vmem:[%s15192_s1 + $0x2c] sm:$0xf]  ;;  %v6812_v49 = vld [vmem:[%s15192_s1 + $0x38] sm:$0x30]  ;;  %v365_v50 = vrot.slane %v363_v39, 1  ;;  %v804_v51 = vrot.slane %v367_v40, 1 }
  0x1f   : > { %470 = vmatpush.bf16.msrb.mxu2 %v421_v35  ;;  %579 = vmatpush.bf16.msrb.mxu1 %v546_v36  ;;  %v805_v52 = vrot.slane %v363_v39, 2  ;;  %v6815_v53 = vor.u32 %v9927_v48, %v6812_v49  ;;  %v6786_v54 = vld [vmem:[%s15192_s1] sm:$0xf]  ;;  %v360_v55 = vrot.slane %v358_v45, 1  ;;  %v9924_v57 = vld [vmem:[%s15192_s1 + $0xc] sm:$0xf0] }
  0x20   : > { %v543_v56 = vsel %vm413_vm0, %v6803_v47, 0  ;;  %v369_v58 = vor.u32 %v367_v40, %v365_v50  ;;  %v9923_v61 = vld [vmem:[%s15192_s1 + $0xc] sm:$0xf]  ;;  %v6796_v62 = vld [vmem:[%s15192_s1 + $0x18] sm:$0xf0]  ;;  %v6787_v0 = vor.u32 %v9924_v57, %v6786_v54  ;;  %v642_v49 = vrot.slane %v10835_v34, 1 }
  0x21   : > { %v10870_v59 = vor.u32 %v805_v52, %v804_v51  ;;  %560 = vmatpush.bf16.msrb.mxu0 %v543_v56  ;;  %v552_v60 = vsel %vm413_vm0, %v6815_v53, 0  ;;  %v361_v63 = vor.u32 %v360_v55, %v356_v44  ;;  %v6799_v1 = vor.u32 %v9923_v61, %v6796_v62  ;;  %v6810_v3 = vld [vmem:[%s15192_s1 + $0x28] sm:$0xf]  ;;  %v9929_v4 = vld [vmem:[%s15192_s1 + $0x34] sm:$0x30]  ;;  %s324_s21 = scalar_lea.vmem [#allocation3], %s323_s27 }
  0x22   : > { %617 = vmatpush.bf16.msrb.mxu3 %v552_v60  ;;  %6779 = vmatmul.msk.bf16.vlgmr.msra.gmra.mxu2 %vm406_vm1, %v369_v58  ;;  %v9942_v5 = vld [vmem:[%s15192_s1 + $0xa4] sm:$0xf]  ;;  %v6811_v6 = vor.u32 %v9929_v4, %v6810_v3  ;;  %v6852_v7 = vld [vmem:[%s15192_s1 + $0xb0] sm:$0x30]  ;;  %v6794_v8 = vld [vmem:[%s15192_s1 + $0x8] sm:$0xf] }
  0x23   : > { %471 = vmatpush.bf16.msrb.mxu2 %v6755_v41  ;;  %580 = vmatpush.bf16.msrb.mxu1 %v6791_v46  ;;  %v366_v2 = vsel %vm354_vm2, %v361_v63, %v365_v50  ;;  %v9925_v9 = vld [vmem:[%s15192_s1 + $0x14] sm:$0xf0]  ;;  %v6855_v10 = vor.u32 %v9942_v5, %v6852_v7  ;;  %v9938_v11 = vld [vmem:[%s15192_s1 + $0x84] sm:$0xf]  ;;  %v6836_v12 = vld [vmem:[%s15192_s1 + $0x90] sm:$0xf0] }
  0x24   : > { %6776 = vmatmul.msk.bf16.vlgmr.msra.gmra.mxu0 %vm406_vm1, %v366_v2  ;;  %6778 = vmatmul.msk.bf16.vlgmr.msra.gmra.mxu1 %vm406_vm1, %v366_v2  ;;  %v549_v13 = vsel %vm413_vm0, %v6811_v6, 0  ;;  %v6795_v15 = vor.u32 %v9925_v9, %v6794_v8  ;;  %v6839_v16 = vor.u32 %v9938_v11, %v6836_v12  ;;  %v6850_v17 = vld [vmem:[%s15192_s1 + $0xa0] sm:$0xf]  ;;  %v9944_v18 = vld [vmem:[%s15192_s1 + $0xac] sm:$0x30]  ;;  %v10978_v50 = vrot.slane %v10827_v30, 1 }
  0x25   : > { %6782 = vmatmul.msk.bf16.vlgmr.msra.gmra.mxu3 %vm406_vm1, %v366_v2  ;;  %561 = vmatpush.bf16.msrb.mxu0 %v6787_v0  ;;  %v691_v14 = vsel %vm413_vm0, %v6855_v10, 0  ;;  %v9943_v19 = vld [vmem:[%s15192_s1 + $0xac] sm:$0xf]  ;;  %v6851_v20 = vor.u32 %v9944_v18, %v6850_v17  ;;  %v6860_v21 = vld [vmem:[%s15192_s1 + $0xb8] sm:$0x30]  ;;  %v801_v51 = vrot.slane %v356_v44, 1 }
  0x26   : > { %618 = vmatpush.bf16.msrb.mxu3 %v6799_v1  ;;  %v6834_v22 = vld [vmem:[%s15192_s1 + $0x80] sm:$0xf]  ;;  %v9940_v23 = vld [vmem:[%s15192_s1 + $0x8c] sm:$0xf0]  ;;  %v6863_v24 = vor.u32 %v9943_v19, %v6860_v21  ;;  %v9939_v25 = vld [vmem:[%s15192_s1 + $0x8c] sm:$0xf]  ;;  %v644_v53 = vsel %vm641_vm3, %v642_v49, %v10978_v50 }
  0x27   : > { %598 = vmatpush.bf16.msra.mxu2 %v549_v13  ;;  %724 = vmatpush.bf16.msra.mxu1 %v691_v14  ;;  %v6844_v26 = vld [vmem:[%s15192_s1 + $0x98] sm:$0xf0]  ;;  %v688_v27 = vsel %vm413_vm0, %v6851_v20, 0  ;;  %v6835_v29 = vor.u32 %v9940_v23, %v6834_v22  ;;  %v6858_v32 = vld [vmem:[%s15192_s1 + $0xa8] sm:$0xf]  ;;  %v802_v52 = vrot.slane %v358_v45, 2 }
  0x28   : > { %v697_v28 = vsel %vm413_vm0, %v6863_v24, 0  ;;  %v6847_v31 = vor.u32 %v9939_v25, %v6844_v26  ;;  %v9945_v33 = vld [vmem:[%s15192_s1 + $0xb4] sm:$0x30]  ;;  %v9950_v35 = vld [vmem:[%s15192_s1 + $0xe4] sm:$0xf]  ;;  %vm2171_vm6 = vcmask 1040384  }
  0x29   : > { %705 = vmatpush.bf16.msra.mxu0 %v688_v27  ;;  %v6859_v36 = vor.u32 %v9945_v33, %v6858_v32  ;;  %v6900_v37 = vld [vmem:[%s15192_s1 + $0xf0] sm:$0x30]  ;;  %v6842_v38 = vld [vmem:[%s15192_s1 + $0x88] sm:$0xf]  ;;  %v9941_v39 = vld [vmem:[%s15192_s1 + $0x94] sm:$0xf0]  ;;  %v803_v54 = vor.u32 %v802_v52, %v801_v51 }
  0x2a   : > { %762 = vmatpush.bf16.msra.mxu3 %v697_v28  ;;  %v6903_v40 = vor.u32 %v9950_v35, %v6900_v37  ;;  %v9946_v41 = vld [vmem:[%s15192_s1 + $0xc4] sm:$0xf]  ;;  %v6884_v42 = vld [vmem:[%s15192_s1 + $0xd0] sm:$0xf0]  ;;  %v6843_v47 = vor.u32 %v9941_v39, %v6842_v38  ;;  %vm800_vm4 = vsmask.f32 6400 }
  0x2b   : > { %599 = vmatpush.bf16.msra.mxu2 %v6795_v15  ;;  %725 = vmatpush.bf16.msra.mxu1 %v6839_v16  ;;  %v694_v43 = vsel %vm413_vm0, %v6859_v36, 0  ;;  %v6887_v48 = vor.u32 %v9946_v41, %v6884_v42  ;;  %v10992_v44 = vsel %vm800_vm4, %v803_v54, %v10870_v59  ;;  %v6898_v45 = vld [vmem:[%s15192_s1 + $0xe0] sm:$0xf]  ;;  %v9952_v55 = vld [vmem:[%s15192_s1 + $0xec] sm:$0x30]  ;;  %v964_v39 = vrot.slane %v10835_v34, 2 }
  0x2c   : > { %v854_v46 = vsel %vm413_vm0, %v6903_v40, 0  ;;  %v9951_v56 = vld [vmem:[%s15192_s1 + $0xec] sm:$0xf]  ;;  %v6899_v57 = vor.u32 %v9952_v55, %v6898_v45  ;;  %v6882_v60 = vld [vmem:[%s15192_s1 + $0xc0] sm:$0xf]  ;;  %v965_v40 = vrot.slane %v10827_v30, 2 }
  0x2d   : > { %706 = vmatpush.bf16.msra.mxu0 %v6835_v29  ;;  %v9948_v61 = vld [vmem:[%s15192_s1 + $0xcc] sm:$0xf0]  ;;  %v9947_v63 = vld [vmem:[%s15192_s1 + $0xcc] sm:$0xf]  ;;  %v6892_v0 = vld [vmem:[%s15192_s1 + $0xd8] sm:$0xf0] }
  0x2e   : > { %763 = vmatpush.bf16.msra.mxu3 %v6847_v31  ;;  %v851_v1 = vsel %vm413_vm0, %v6899_v57, 0  ;;  %v6883_v3 = vor.u32 %v9948_v61, %v6882_v60  ;;  %v6895_v4 = vor.u32 %v9947_v63, %v6892_v0  ;;  %v6906_v5 = vld [vmem:[%s15192_s1 + $0xe8] sm:$0xf]  ;;  %v9953_v6 = vld [vmem:[%s15192_s1 + $0xf4] sm:$0x30]  ;;  %vm2156_vm8 = vcmask 779264  }
  0x2f   : > { %v9958_v7 = vld [vmem:[%s15192_s1 + $0x124] sm:$0xf]  ;;  %v6907_v8 = vor.u32 %v9953_v6, %v6906_v5  ;;  %v6948_v9 = vld [vmem:[%s15192_s1 + $0x130] sm:$0x30]  ;;  %v6890_v10 = vld [vmem:[%s15192_s1 + $0xc8] sm:$0xf] }
  0x30   : > { %v9949_v11 = vld [vmem:[%s15192_s1 + $0xd4] sm:$0xf0]  ;;  %v6951_v12 = vor.u32 %v9958_v7, %v6948_v9  ;;  %v9954_v13 = vld [vmem:[%s15192_s1 + $0x104] sm:$0xf]  ;;  %v6932_v14 = vld [vmem:[%s15192_s1 + $0x110] sm:$0xf0] }
  0x31   : > { %v857_v15 = vsel %vm413_vm0, %v6907_v8, 0  ;;  %v6891_v17 = vor.u32 %v9949_v11, %v6890_v10  ;;  %v6935_v18 = vor.u32 %v9954_v13, %v6932_v14  ;;  %v6946_v19 = vld [vmem:[%s15192_s1 + $0x120] sm:$0xf]  ;;  %v9960_v20 = vld [vmem:[%s15192_s1 + $0x12c] sm:$0x30]  ;;  %vm2729_vm9 = vcmask 785408  }
  0x32   : > { %6780 = vmatmul.msk.bf16.vlgmr.msrb.gmra.mxu2 %vm406_vm1, %v366_v2  ;;  %v1013_v16 = vsel %vm413_vm0, %v6951_v12, 0  ;;  %v9959_v21 = vld [vmem:[%s15192_s1 + $0x12c] sm:$0xf]  ;;  %v6947_v22 = vor.u32 %v9960_v20, %v6946_v19  ;;  %v6956_v23 = vld [vmem:[%s15192_s1 + $0x138] sm:$0x30]  ;;  %s6673_s29 = sshll.u32 %s324_s21, 4  ;;  %s6674_s29 = int_to_ptr.vmem [resolvable:$true] %s6673_s29 }
  0x33   : > { %743 = vmatpush.bf16.msrb.mxu2 %v694_v43  ;;  %v6959_v24 = vor.u32 %v9959_v21, %v6956_v23  ;;  %v6930_v27 = vld [vmem:[%s15192_s1 + $0x100] sm:$0xf]  ;;  %v9956_v28 = vld [vmem:[%s15192_s1 + $0x10c] sm:$0xf0]  ;;  %v9955_v29 = vld [vmem:[%s15192_s1 + $0x10c] sm:$0xf] }
  0x34   : > { %6777 = vmatmul.msk.bf16.gmra.mxu0 %vm406_vm1, %v369_v58  ;;  %6818 = vmatmul.msk.bf16.vlgmr.msrb.gmra.mxu1 %vm406_vm1, %v10835_v34  ;;  %v1010_v25 = vsel %vm413_vm0, %v6947_v22, 0  ;;  %v6931_v31 = vor.u32 %v9956_v28, %v6930_v27  ;;  %v6940_v32 = vld [vmem:[%s15192_s1 + $0x118] sm:$0xf0]  ;;  %v6954_v35 = vld [vmem:[%s15192_s1 + $0x128] sm:$0xf]  ;;  %s6675_s22 = sshll.u32 %s6671_s17, 4  ;;  %s6676_s22 = int_to_ptr.hbm [resolvable:$true] %s6675_s22 }
  0x35   : > { %6783 = vmatmul.msk.bf16.gmra.mxu3 %vm406_vm1, %v369_v58  ;;  %887 = vmatpush.bf16.msrb.mxu1 %v854_v46  ;;  %v1019_v26 = vsel %vm413_vm0, %v6959_v24, 0  ;;  %v6943_v33 = vor.u32 %v9955_v29, %v6940_v32  ;;  %v9961_v36 = vld [vmem:[%s15192_s1 + $0x134] sm:$0x30]  ;;  %v6938_v41 = vld [vmem:[%s15192_s1 + $0x108] sm:$0xf]  ;;  %v966_v46 = vsel %vm413_vm0, %v964_v39, %v965_v40  ;;  %s6663_s23 = scalar_lea.sflag [#allocation4], %s323_s27 }
  0x36   : > { %v6955_v37 = vor.u32 %v9961_v36, %v6954_v35  ;;  %v9957_v42 = vld [vmem:[%s15192_s1 + $0x114] sm:$0xf0]  ;;  %v7090_v21 = vld [vmem:[%s15194_s3 + $0xf0] sm:$0xf]  ;;  %v7082_v27 = vld [vmem:[%s15194_s3 + $0xe0] sm:$0xf] }
  0x37   : > { %744 = vmatpush.bf16.msrb.mxu2 %v6843_v47  ;;  %v6939_v43 = vor.u32 %v9957_v42, %v6938_v41  ;;  %v9993_v22 = vld [vmem:[%s15194_s3 + $0xf4] sm:$0xf0]  ;;  %v9991_v28 = vld [vmem:[%s15194_s3 + $0xe4] sm:$0xf0]  ;;  %v7066_v41 = vld [vmem:[%s15194_s3 + $0xc0] sm:$0xf] }
  0x38   : > { %v1016_v38 = vsel %vm413_vm0, %v6955_v37, 0  ;;  %v7074_v37 = vld [vmem:[%s15194_s3 + $0xd0] sm:$0xf]  ;;  %v9987_v42 = vld [vmem:[%s15194_s3 + $0xc4] sm:$0xf0]  ;;  %s10622_s24 = sshra.s32 %s6676_s22, 4  ;;  %s10623_s24 = int_to_ptr.hbm [resolvable:$true] %s10622_s24 }
  0x39   : > { %888 = vmatpush.bf16.msrb.mxu1 %v6887_v48  ;;  %s10624_s25 = scalar_lea.hbm %s10623_s24, 1  ;;  %p10629_p0 = scmp.lt.s32.totalorder %s10623_s24, %s15200_s9 }
  0x3a   : > { %p10625_p11 = scmp.ne.s32.totalorder %s10623_s24, %s10624_s25  ;;  %p10630_p1 = scmp.lt.s32.totalorder %s10628_s28, %s10624_s25 }
  0x3c   : > { %p10626_p12 = pnand %p10625_p11, %p10761_p5  ;;  %p10631_p2 = por %p10630_p1, %p10629_p0 }
  0x3e   : > { %p10627_p13 = pneg %p10626_p12 }
  0x40   : > { %p10632_p3 = pnand %p10631_p2, %p10627_p13 }
  0x42   : > { %6781 = vmatmul.msk.bf16.gmra.mxu2 %vm406_vm1, %v369_v58  ;;  %v6908_v58 = vld [vmem:[%s15192_s1 + $0xf8] sm:$0x30] }
  0x43   : > { %v6911_v62 = vor.u32 %v9951_v56, %v6908_v58 }
  0x44   : > { %6816 = vmatmul.msk.bf16.vlgmr.msrb.gmra.mxu0 %vm406_vm1, %v10835_v34  ;;  %6819 = vmatmul.msk.bf16.gmra.mxu1 %vm406_vm1, %v10827_v30 }
  0x45   : > { %6822 = vmatmul.msk.bf16.vlgmr.msrb.gmra.mxu3 %vm406_vm1, %v10835_v34  ;;  %868 = vmatpush.bf16.msrb.mxu0 %v851_v1  ;;  %v860_v2 = vsel %vm413_vm0, %v6911_v62, 0 }
  0x46   : > { %925 = vmatpush.bf16.msrb.mxu3 %v860_v2 }
  0x49   : > { %869 = vmatpush.bf16.msrb.mxu0 %v6883_v3 }
  0x4a   : > { %926 = vmatpush.bf16.msrb.mxu3 %v6895_v4 }
  0x52   : > { %6820 = vmatmul.msk.bf16.vlgmr.msra.gmra.mxu2 %vm406_vm1, %v10835_v34 }
  0x53   : > { %906 = vmatpush.bf16.msra.mxu2 %v857_v15 }
  0x54   : > { %6817 = vmatmul.msk.bf16.gmra.mxu0 %vm406_vm1, %v10827_v30  ;;  %6866 = vmatmul.msk.bf16.vlgmr.msra.gmra.mxu1 %vm406_vm1, %v644_v53 }
  0x55   : > { %6823 = vmatmul.msk.bf16.gmra.mxu3 %vm406_vm1, %v10827_v30  ;;  %1046 = vmatpush.bf16.msra.mxu1 %v1013_v16 }
  0x57   : > { %907 = vmatpush.bf16.msra.mxu2 %v6891_v17 }
  0x59   : > { %1047 = vmatpush.bf16.msra.mxu1 %v6935_v18 }
  0x62   : > { %6821 = vmatmul.msk.bf16.gmra.mxu2 %vm406_vm1, %v10827_v30 }
  0x64   : > { %6864 = vmatmul.msk.bf16.vlgmr.msra.gmra.mxu0 %vm406_vm1, %v644_v53  ;;  %6867 = vmatmul.msk.bf16.gmra.mxu1 %vm406_vm1, %v10978_v50 }
  0x65   : > { %6870 = vmatmul.msk.bf16.vlgmr.msra.gmra.mxu3 %vm406_vm1, %v644_v53  ;;  %1027 = vmatpush.bf16.msra.mxu0 %v1010_v25  ;;  %v7091_v25 = vor.u32 %v9993_v22, %v7090_v21 }
  0x66   : > { %1084 = vmatpush.bf16.msra.mxu3 %v1019_v26 }
  0x69   : > { %1028 = vmatpush.bf16.msra.mxu0 %v6931_v31  ;;  %v7083_v31 = vor.u32 %v9991_v28, %v7082_v27  ;;  %v9971_v27 = vld [vmem:[%s15194_s3 + $0x44] sm:$0xf0]  ;;  %v7034_v28 = vld [vmem:[%s15194_s3 + $0x80] sm:$0xf] }
  0x6a   : > { %1085 = vmatpush.bf16.msra.mxu3 %v6943_v33 }
  0x72   : > { %6868 = vmatmul.msk.bf16.vlgmr.msrb.gmra.mxu2 %vm406_vm1, %v644_v53 }
  0x73   : > { %1065 = vmatpush.bf16.msrb.mxu2 %v1016_v38  ;;  %v9989_v38 = vld [vmem:[%s15194_s3 + $0xd4] sm:$0xf0] }
  0x74   : > { %6865 = vmatmul.msk.bf16.gmra.mxu0 %vm406_vm1, %v10978_v50  ;;  %6914 = vmatmul.msk.bf16.vlgmr.msrb.gmra.mxu1 %vm406_vm1, %v10992_v44  ;;  %v7075_v39 = vor.u32 %v9989_v38, %v7074_v37 }
  0x75   : > { %6871 = vmatmul.msk.bf16.gmra.mxu3 %vm406_vm1, %v10978_v50  ;;  %1525 = vmatpush.bf16.msrb.mxu1 %v7091_v25 }
  0x77   : > { %1066 = vmatpush.bf16.msrb.mxu2 %v6939_v43  ;;  %v7067_v43 = vor.u32 %v9987_v42, %v7066_v41  ;;  %v6994_v42 = vld [vmem:[%s15194_s3 + $0x30] sm:$0xf] }
  0x79   : > { %1526 = vmatpush.bf16.msrb.mxu1 %v7083_v31 }
  0x7d   : > { %1527 = vmatpush.bf16.msrb.mxu1 %v7075_v39 }
  0x81   : > { %1528 = vmatpush.bf16.msrb.mxu1 %v7067_v43  ;;  %v9969_v43 = vld [vmem:[%s15194_s3 + $0x34] sm:$0xf0] }
  0x82   : > { %6869 = vmatmul.msk.bf16.gmra.mxu2 %vm406_vm1, %v10978_v50 }
  0x84   : > { %6912 = vmatmul.msk.bf16.vlgmr.msrb.gmra.mxu0 %vm406_vm1, %v10992_v44  ;;  %6915 = vmatmul.msk.bf16.gmra.mxu1 %vm406_vm1, %v10870_v59 }
  0x85   : > { %6918 = vmatmul.msk.bf16.vlgmr.msrb.gmra.mxu3 %vm406_vm1, %v10992_v44 }
  0x92   : > { %6916 = vmatmul.msk.bf16.vlgmr.msra.gmra.mxu2 %vm406_vm1, %v10992_v44 }
  0x94   : > { %6913 = vmatmul.msk.bf16.gmra.mxu0 %vm406_vm1, %v10870_v59  ;;  %6962 = vmatmul.msk.bf16.vlgmr.msra.gmra.mxu1 %vm406_vm1, %v966_v46 }
  0x95   : > { %6919 = vmatmul.msk.bf16.gmra.mxu3 %vm406_vm1, %v10870_v59 }
  0xa1   : > { %v435_v30 = vpop.f32.mrf.mxu0  ;;  %v454_v34 = vpop.f32.mrf.mxu1 }
  0xa2   : > { %6917 = vmatmul.msk.bf16.gmra.mxu2 %vm406_vm1, %v10870_v59 }
  0xa4   : > { %6960 = vmatmul.msk.bf16.vlgmr.msra.gmra.mxu0 %vm406_vm1, %v966_v46  ;;  %6963 = vmatmul.msk.bf16.gmra.mxu1 %vm406_vm1, %v965_v40 }
  0xa5   : > { %6966 = vmatmul.msk.bf16.vlgmr.msra.gmra.mxu3 %vm406_vm1, %v966_v46  ;;  %v459_v47 = vpop.f32.mrf.mxu2 }
  0xa8   : > { %v492_v48 = vpop.f32.mrf.mxu3 }
  0xa9   : > { %v11123_v49 = vpop.f32.mrf.mxu0  ;;  %v11125_v50 = vpop.f32.mrf.mxu1 }
  0xad   : > { %v11127_v51 = vpop.f32.mrf.mxu2 }
  0xb0   : > { %v11129_v52 = vpop.f32.mrf.mxu3 }
  0xb1   : > { %v440_v53 = vpop.f32.mrf.mxu0  ;;  %v582_v54 = vpop.f32.mrf.mxu1 }
  0xb2   : > { %v583_v44 = vadd.f32 %v582_v54, %v454_v34  ;;  %6964 = vmatmul.msk.bf16.vlgmr.msrb.gmra.mxu2 %vm406_vm1, %v966_v46 }
  0xb4   : > { %6961 = vmatmul.msk.bf16.gmra.mxu0 %vm406_vm1, %v965_v40 }
  0xb5   : > { %6967 = vmatmul.msk.bf16.gmra.mxu3 %vm406_vm1, %v965_v40  ;;  %v473_v59 = vpop.f32.mrf.mxu2 }
  0xb8   : > { %v497_v45 = vpop.f32.mrf.mxu3 }
  0xb9   : > { %v11134_v55 = vpop.f32.mrf.mxu0  ;;  %v11136_v56 = vpop.f32.mrf.mxu1 }
  0xbd   : > { %v11138_v57 = vpop.f32.mrf.mxu2 }
  0xc0   : > { %v11140_v58 = vpop.f32.mrf.mxu3 }
  0xc1   : > { %v563_v60 = vpop.f32.mrf.mxu0  ;;  %v587_v61 = vpop.f32.mrf.mxu1 }
  0xc2   : > { %v564_v62 = vadd.f32 %v563_v60, %v435_v30  ;;  %v588_v63 = vadd.f32 %v587_v61, %v459_v47  ;;  %6965 = vmatmul.msk.bf16.gmra.mxu2 %vm406_vm1, %v965_v40  ;;  %v7026_v47 = vld [vmem:[%s15194_s3 + $0x70] sm:$0xf]  ;;  %v7018_v61 = vld [vmem:[%s15194_s3 + $0x60] sm:$0xf] }
  0xc5   : > { %v478_v0 = vpop.f32.mrf.mxu2 }
  0xc8   : > { %v620_v1 = vpop.f32.mrf.mxu3 }
  0xc9   : > { %v621_v2 = vadd.f32 %v620_v1, %v492_v48  ;;  %v11143_v3 = vpop.f32.mrf.mxu0  ;;  %v11145_v4 = vpop.f32.mrf.mxu1  ;;  %v9977_v48 = vld [vmem:[%s15194_s3 + $0x74] sm:$0xf0] }
  0xcd   : > { %v11147_v5 = vpop.f32.mrf.mxu2 }
  0xd0   : > { %v11149_v6 = vpop.f32.mrf.mxu3 }
  0xd1   : > { %v568_v7 = vpop.f32.mrf.mxu0  ;;  %v727_v8 = vpop.f32.mrf.mxu1 }
  0xd2   : > { %v569_v9 = vadd.f32 %v568_v7, %v440_v53  ;;  %v11151_v10 = vadd.f32 %v727_v8, %v583_v44  ;;  %v7058_v53 = vld [vmem:[%s15194_s3 + $0xb0] sm:$0xf]  ;;  %v7027_v44 = vor.u32 %v9977_v48, %v7026_v47  ;;  %v6995_v47 = vor.u32 %v9969_v43, %v6994_v42  ;;  %v7092_v48 = vld [vmem:[%s15194_s3 + $0xf8] sm:$0xf0]  ;;  %v10007_v42 = vld [vmem:[%s15194_s3 + $0x164] sm:$0xf0] }
  0xd3   : > { %v7178_v43 = vld [vmem:[%s15194_s3 + $0x1a0] sm:$0xf] }
  0xd4   : > { %1506 = vmatpush.bf16.msrb.mxu0 %v7027_v44 }
  0xd5   : > { %v601_v11 = vpop.f32.mrf.mxu2 }
  0xd6   : > { %v602_v12 = vadd.f32 %v601_v11, %v473_v59  ;;  %v9985_v59 = vld [vmem:[%s15194_s3 + $0xb4] sm:$0xf0] }
  0xd8   : > { %v625_v13 = vpop.f32.mrf.mxu3 }
  0xd9   : > { %v626_v14 = vadd.f32 %v625_v13, %v497_v45  ;;  %v11153_v15 = vpop.f32.mrf.mxu0  ;;  %v11155_v16 = vpop.f32.mrf.mxu1  ;;  %v7059_v45 = vor.u32 %v9985_v59, %v7058_v53  ;;  %v6986_v59 = vld [vmem:[%s15194_s3 + $0x20] sm:$0xf] }
  0xdb   : > { %1529 = vmatpush.bf16.msrb.mxu1 %v7059_v45  ;;  %v9967_v45 = vld [vmem:[%s15194_s3 + $0x24] sm:$0xf0] }
  0xdd   : > { %v11157_v17 = vpop.f32.mrf.mxu2 }
  0xe0   : > { %v11159_v18 = vpop.f32.mrf.mxu3 }
  0xe1   : > { %v708_v19 = vpop.f32.mrf.mxu0  ;;  %v732_v20 = vpop.f32.mrf.mxu1 }
  0xe2   : > { %v11167_v23 = vadd.f32 %v708_v19, %v564_v62  ;;  %v11169_v24 = vadd.f32 %v732_v20, %v588_v63  ;;  %v9975_v62 = vld [vmem:[%s15194_s3 + $0x64] sm:$0xf0]  ;;  %v7050_v63 = vld [vmem:[%s15194_s3 + $0xa0] sm:$0xf]  ;;  %v9973_v19 = vld [vmem:[%s15194_s3 + $0x54] sm:$0xf0] }
  0xe3   : > { %v7019_v1 = vor.u32 %v9975_v62, %v7018_v61  ;;  %v7042_v20 = vld [vmem:[%s15194_s3 + $0x90] sm:$0xf]  ;;  %v6987_v62 = vor.u32 %v9967_v45, %v6986_v59  ;;  %v9963_v59 = vld [vmem:[%s15194_s3 + $0x4] sm:$0xf0]  ;;  %v9986_v45 = vld [vmem:[%s15194_s3 + $0xc4] sm:$0xf] }
  0xe5   : > { %v606_v26 = vpop.f32.mrf.mxu2  ;;  %1507 = vmatpush.bf16.msrb.mxu0 %v7019_v1  ;;  %v7154_v1 = vld [vmem:[%s15194_s3 + $0x170] sm:$0xf] }
  0xe6   : > { %v11177_v29 = vadd.f32 %v606_v26, %v478_v0  ;;  %v7002_v26 = vld [vmem:[%s15194_s3 + $0x40] sm:$0xf] }
  0xe7   : > { %v7003_v31 = vor.u32 %v9971_v27, %v7002_v26  ;;  %v9965_v26 = vld [vmem:[%s15194_s3 + $0x14] sm:$0xf0] }
  0xe8   : > { %v765_v32 = vpop.f32.mrf.mxu3 }
  0xe9   : > { %v11179_v33 = vadd.f32 %v765_v32, %v621_v2  ;;  %v11181_v35 = vpop.f32.mrf.mxu0  ;;  %v11183_v36 = vpop.f32.mrf.mxu1  ;;  %v9983_v2 = vld [vmem:[%s15194_s3 + $0xa4] sm:$0xf0] }
  0xea   : > { %v7051_v7 = vor.u32 %v9983_v2, %v7050_v63  ;;  %v9979_v32 = vld [vmem:[%s15194_s3 + $0x84] sm:$0xf0]  ;;  %v7084_v63 = vld [vmem:[%s15194_s3 + $0xe8] sm:$0xf0]  ;;  %v10009_v2 = vld [vmem:[%s15194_s3 + $0x174] sm:$0xf0] }
  0xeb   : > { %v7035_v37 = vor.u32 %v9979_v32, %v7034_v28  ;;  %v9988_v28 = vld [vmem:[%s15194_s3 + $0xd4] sm:$0xf]  ;;  %v7146_v32 = vld [vmem:[%s15194_s3 + $0x160] sm:$0xf] }
  0xec   : > { %1530 = vmatpush.bf16.msrb.mxu1 %v7051_v7 }
  0xed   : > { %v11191_v40 = vpop.f32.mrf.mxu2 }
  0xf0   : > { %v11199_v46 = vpop.f32.mrf.mxu3 }
  0xf1   : > { %v713_v30 = vpop.f32.mrf.mxu0  ;;  %v11201_v34 = vpop.f32.mrf.mxu1 }
  0xf2   : > { %v11212_v54 = vadd.f32 %v713_v30, %v569_v9  ;;  %v9992_v30 = vld [vmem:[%s15194_s3 + $0xf4] sm:$0xf] }
  0xf3   : > { %v7095_v53 = vor.u32 %v9992_v30, %v7092_v48  ;;  %v10015_v30 = vld [vmem:[%s15194_s3 + $0x1a4] sm:$0xf0] }
  0xf4   : > { %v7179_v48 = vor.u32 %v10015_v30, %v7178_v43  ;;  %v10003_v43 = vld [vmem:[%s15194_s3 + $0x144] sm:$0xf0]  ;;  %v11389_v30 = vld [vmem:[%s15193_s2] sm:$0xf] }
  0xf5   : > { %v746_v60 = vpop.f32.mrf.mxu2 }
  0xf6   : > { %v11226_v0 = vadd.f32 %v746_v60, %v602_v12  ;;  %v7010_v12 = vld [vmem:[%s15194_s3 + $0x50] sm:$0xf]  ;;  %v9990_v60 = vld [vmem:[%s15194_s3 + $0xe4] sm:$0xf] }
  0xf7   : > { %v7011_v21 = vor.u32 %v9973_v19, %v7010_v12  ;;  %v7087_v7 = vor.u32 %v9990_v60, %v7084_v63  ;;  %v10017_v12 = vld [vmem:[%s15194_s3 + $0x1b4] sm:$0xf0]  ;;  %v7138_v63 = vld [vmem:[%s15194_s3 + $0x150] sm:$0xf] }
  0xf8   : > { %v770_v8 = vpop.f32.mrf.mxu3 }
  0xf9   : > { %v11231_v9 = vadd.f32 %v770_v8, %v626_v14  ;;  %v11233_v11 = vpop.f32.mrf.mxu0  ;;  %v11235_v13 = vpop.f32.mrf.mxu1  ;;  %v9981_v14 = vld [vmem:[%s15194_s3 + $0x94] sm:$0xf0]  ;;  %1508 = vmatpush.bf16.msrb.mxu0 %v7011_v21  ;;  %v7155_v8 = vor.u32 %v10009_v2, %v7154_v1 }
  0xfa   : > { %v7043_v22 = vor.u32 %v9981_v14, %v7042_v20  ;;  %v10005_v1 = vld [vmem:[%s15194_s3 + $0x154] sm:$0xf0] }
  0xfb   : > { %1544 = vmatpush.bf16.msra.mxu2 %v7155_v8  ;;  %v7170_v8 = vld [vmem:[%s15194_s3 + $0x190] sm:$0xf] }
  0xfc   : > { %1531 = vmatpush.bf16.msrb.mxu1 %v7043_v22  ;;  %v6978_v22 = vld [vmem:[%s15194_s3 + $0x10] sm:$0xf] }
  0xfd   : > { %v11249_v25 = vpop.f32.mrf.mxu2  ;;  %1509 = vmatpush.bf16.msrb.mxu0 %v7003_v31  ;;  %v6979_v27 = vor.u32 %v9965_v26, %v6978_v22  ;;  %v7076_v31 = vld [vmem:[%s15194_s3 + $0xd8] sm:$0xf0] }
 0x100   : > { %v11263_v38 = vpop.f32.mrf.mxu3  ;;  %1532 = vmatpush.bf16.msrb.mxu1 %v7035_v37  ;;  %v7079_v37 = vor.u32 %v9988_v28, %v7076_v31  ;;  %v7028_v28 = vld [vmem:[%s15194_s3 + $0x78] sm:$0xf0]  ;;  %v9984_v31 = vld [vmem:[%s15194_s3 + $0xb4] sm:$0xf] }
 0x101   : > { %v11265_v39 = vpop.f32.mrf.mxu0  ;;  %v11267_v41 = vpop.f32.mrf.mxu1  ;;  %1510 = vmatpush.bf16.msrb.mxu0 %v6995_v47  ;;  %v7147_v47 = vor.u32 %v10007_v42, %v7146_v32  ;;  %v7130_v42 = vld [vmem:[%s15194_s3 + $0x140] sm:$0xf] }
 0x103   : > { %1545 = vmatpush.bf16.msra.mxu2 %v7147_v47 }
 0x104   : > { %1601 = vmatpush.bf16.msra.mxu1 %v7095_v53 }
 0x105   : > { %v751_v44 = vpop.f32.mrf.mxu2  ;;  %1511 = vmatpush.bf16.msrb.mxu0 %v6987_v62  ;;  %v7068_v62 = vld [vmem:[%s15194_s3 + $0xc8] sm:$0xf0] }
 0x106   : > { %v11291_v61 = vadd.f32 %v751_v44, %v11177_v29  ;;  %v7186_v29 = vld [vmem:[%s15194_s3 + $0x1b0] sm:$0xf]  ;;  %v6970_v44 = vld [vmem:[%s15194_s3] sm:$0xf]  ;;  %v7071_v2 = vor.u32 %v9986_v45, %v7068_v62  ;;  %v585_v45 = vadd.f32 %v11136_v56, %v11125_v50  ;;  %v9982_v50 = vld [vmem:[%s15194_s3 + $0xa4] sm:$0xf] }
 0x107   : > { %v7187_v20 = vor.u32 %v10017_v12, %v7186_v29  ;;  %v6971_v60 = vor.u32 %v9963_v59, %v6970_v44  ;;  %v10013_v29 = vld [vmem:[%s15194_s3 + $0x194] sm:$0xf0]  ;;  %v7162_v44 = vld [vmem:[%s15194_s3 + $0x180] sm:$0xf]  ;;  %v10011_v59 = vld [vmem:[%s15194_s3 + $0x184] sm:$0xf0] }
 0x108   : > { %v11308_v19 = vpop.f32.mrf.mxu3  ;;  %1602 = vmatpush.bf16.msra.mxu1 %v7087_v7  ;;  %v7139_v7 = vor.u32 %v10005_v1, %v7138_v63  ;;  %v7163_v62 = vor.u32 %v10011_v59, %v7162_v44  ;;  %v9974_v1 = vld [vmem:[%s15194_s3 + $0x64] sm:$0xf]  ;;  %v780_v56 = vadd.f32 %v11155_v16, %v585_v45  ;;  %v10001_v16 = vld [vmem:[%s15194_s3 + $0x134] sm:$0xf0]  ;;  %v7044_v44 = vld [vmem:[%s15194_s3 + $0x98] sm:$0xf0] }
 0x109   : > { %v11310_v21 = vpop.f32.mrf.mxu0  ;;  %v11312_v14 = vpop.f32.mrf.mxu1  ;;  %1567 = vmatpush.bf16.msrb.mxu3 %v7187_v20  ;;  %1512 = vmatpush.bf16.msrb.mxu0 %v6979_v27  ;;  %v7171_v20 = vor.u32 %v10013_v29, %v7170_v8  ;;  %v9976_v27 = vld [vmem:[%s15194_s3 + $0x74] sm:$0xf]  ;;  %v7052_v8 = vld [vmem:[%s15194_s3 + $0xa8] sm:$0xf0]  ;;  %v7122_v29 = vld [vmem:[%s15194_s3 + $0x130] sm:$0xf] }
 0x10a   : > { %1546 = vmatpush.bf16.msra.mxu2 %v7139_v7  ;;  %v7031_v32 = vor.u32 %v9976_v27, %v7028_v28  ;;  %v7123_v28 = vor.u32 %v10001_v16, %v7122_v29  ;;  %v7114_v59 = vld [vmem:[%s15194_s3 + $0x120] sm:$0xf]  ;;  %v9999_v45 = vld [vmem:[%s15194_s3 + $0x124] sm:$0xf0]  ;;  %v7106_v16 = vld [vmem:[%s15194_s3 + $0x110] sm:$0xf] }
 0x10c   : > { %1603 = vmatpush.bf16.msra.mxu1 %v7079_v37  ;;  %v7060_v37 = vld [vmem:[%s15194_s3 + $0xb8] sm:$0xf0] }
 0x10d   : > { %v11338_v53 = vpop.f32.mrf.mxu2  ;;  %1568 = vmatpush.bf16.msrb.mxu3 %v7179_v48  ;;  %1513 = vmatpush.bf16.msrb.mxu0 %v6971_v60  ;;  %v7063_v47 = vor.u32 %v9984_v31, %v7060_v37  ;;  %v7131_v48 = vor.u32 %v10003_v43, %v7130_v42  ;;  %v939_v60 = vadd.f32 %v11201_v34, %v11151_v10  ;;  %v11414_v34 = vperm.slane %v11389_v30, 1  ;;  %v9972_v37 = vld [vmem:[%s15194_s3 + $0x54] sm:$0xf]  ;;  %v7012_v42 = vld [vmem:[%s15194_s3 + $0x58] sm:$0xf0] }
 0x10f   : > { %1547 = vmatpush.bf16.msra.mxu2 %v7131_v48  ;;  %v7015_v48 = vor.u32 %v9972_v37, %v7012_v42 }
 0x110   : > { %v11364_v12 = vpop.f32.mrf.mxu3  ;;  %1604 = vmatpush.bf16.msra.mxu1 %v7071_v2  ;;  %v7020_v2 = vld [vmem:[%s15194_s3 + $0x68] sm:$0xf0] }
 0x111   : > { %v11366_v22 = vpop.f32.mrf.mxu0  ;;  %v1049_v26 = vpop.f32.mrf.mxu1  ;;  %1569 = vmatpush.bf16.msrb.mxu3 %v7171_v20  ;;  %1582 = vmatpush.bf16.msra.mxu0 %v7031_v32  ;;  %v7023_v7 = vor.u32 %v9974_v1, %v7020_v2  ;;  %v7055_v20 = vor.u32 %v9982_v50, %v7052_v8  ;;  %v9970_v50 = vld [vmem:[%s15194_s3 + $0x44] sm:$0xf] }
 0x112   : > { %v1098_v10 = vadd.f32 %v1049_v26, %v939_v60  ;;  %v943_v26 = vadd.f32 %v11235_v13, %v780_v56  ;;  %v9980_v13 = vld [vmem:[%s15194_s3 + $0x94] sm:$0xf]  ;;  %v7004_v56 = vld [vmem:[%s15194_s3 + $0x48] sm:$0xf0] }
 0x113   : > { %1548 = vmatpush.bf16.msra.mxu2 %v7123_v28  ;;  %v7047_v60 = vor.u32 %v9980_v13, %v7044_v44  ;;  %v7007_v29 = vor.u32 %v9970_v50, %v7004_v56  ;;  %v9997_v28 = vld [vmem:[%s15194_s3 + $0x114] sm:$0xf0]  ;;  %v7374_v44 = vld [vmem:[%s15194_s3 + $0x2b0] sm:$0xf]  ;;  %v947_v50 = vadd.f32 %v11267_v41, %v11169_v24  ;;  %v10008_v41 = vld [vmem:[%s15194_s3 + $0x174] sm:$0xf] }
 0x114   : > { %1605 = vmatpush.bf16.msra.mxu1 %v7063_v47  ;;  %v1124_v43 = vadd.f32 %v11414_v34, %v1098_v10  ;;  %v9978_v10 = vld [vmem:[%s15194_s3 + $0x84] sm:$0xf]  ;;  %v7107_v42 = vor.u32 %v9997_v28, %v7106_v16 }
 0x115   : > { %v11401_v63 = vpop.f32.mrf.mxu2  ;;  %1570 = vmatpush.bf16.msrb.mxu3 %v7163_v62  ;;  %1583 = vmatpush.bf16.msra.mxu0 %v7023_v7  ;;  %v7115_v62 = vor.u32 %v9999_v45, %v7114_v59  ;;  %v10049_v45 = vld [vmem:[%s15194_s3 + $0x2b4] sm:$0xf0] }
 0x116   : > { %v1140_v7 = vmax.f32 %v1124_v43, 0.0  ;;  %v7375_v56 = vor.u32 %v10049_v45, %v7374_v44 }
 0x117   : > { %1549 = vmatpush.bf16.msra.mxu2 %v7115_v62  ;;  %v9995_v62 = vld [vmem:[%s15194_s3 + $0x104] sm:$0xf0] }
 0x118   : > { %v11426_v27 = vpop.f32.mrf.mxu3  ;;  %1606 = vmatpush.bf16.msra.mxu1 %v7055_v20  ;;  %v7036_v20 = vld [vmem:[%s15194_s3 + $0x88] sm:$0xf0] }
 0x119   : > { %v11428_v31 = vpop.f32.mrf.mxu0  ;;  %v1051_v32 = vpop.f32.mrf.mxu1  ;;  %1584 = vmatpush.bf16.msra.mxu0 %v7015_v48  ;;  %v6996_v48 = vld [vmem:[%s15194_s3 + $0x38] sm:$0xf0] }
 0x11a   : > { %v1102_v47 = vadd.f32 %v1051_v32, %v943_v26  ;;  %v7039_v26 = vor.u32 %v9978_v10, %v7036_v20 }
 0x11b   : > { %1550 = vmatpush.bf16.msra.mxu2 %v7107_v42  ;;  %v7156_v42 = vld [vmem:[%s15194_s3 + $0x178] sm:$0xf0] }
 0x11c   : > { %v1128_v1 = vadd.f32 %v11414_v34, %v1102_v47  ;;  %1607 = vmatpush.bf16.msra.mxu1 %v7047_v60  ;;  %v9968_v47 = vld [vmem:[%s15194_s3 + $0x34] sm:$0xf]  ;;  %v7098_v60 = vld [vmem:[%s15194_s3 + $0x100] sm:$0xf] }
 0x11d   : > { %v11450_v2 = vpop.f32.mrf.mxu2  ;;  %1585 = vmatpush.bf16.msra.mxu0 %v7007_v29  ;;  %v6999_v59 = vor.u32 %v9968_v47, %v6996_v48  ;;  %v7099_v10 = vor.u32 %v9995_v62, %v7098_v60  ;;  %v11502_v29 = vperm.slane %v11389_v30, 0  ;;  %v7159_v48 = vor.u32 %v10008_v41, %v7156_v42 }
 0x11e   : > { %v1144_v8 = vmax.f32 %v1128_v1, 0.0  ;;  %v938_v1 = vadd.f32 %v11265_v39, %v11167_v23  ;;  %v9966_v23 = vld [vmem:[%s15194_s3 + $0x24] sm:$0xf]  ;;  %v10047_v39 = vld [vmem:[%s15194_s3 + $0x2a4] sm:$0xf0] }
 0x11f   : > { %1551 = vmatpush.bf16.msra.mxu2 %v7099_v10 }
 0x120   : > { %v11470_v32 = vpack.c.bf16 %v1144_v8, %v1140_v7  ;;  %v11472_v37 = vpop.f32.mrf.mxu3  ;;  %1608 = vmatpush.bf16.msra.mxu1 %v7039_v26  ;;  %v566_v7 = vadd.f32 %v11143_v3, %v11123_v49  ;;  %v590_v8 = vadd.f32 %v11145_v4, %v11127_v51  ;;  %v6988_v49 = vld [vmem:[%s15194_s3 + $0x28] sm:$0xf0]  ;;  %v7366_v51 = vld [vmem:[%s15194_s3 + $0x2a0] sm:$0xf] }
 0x121   : > { %v1030_v13 = vpop.f32.mrf.mxu0  ;;  %v1054_v43 = vpop.f32.mrf.mxu1  ;;  %1586 = vmatpush.bf16.msra.mxu0 %v6999_v59  ;;  %v6991_v24 = vor.u32 %v9966_v23, %v6988_v49  ;;  %v7367_v28 = vor.u32 %v10047_v39, %v7366_v51  ;;  %v941_v23 = vadd.f32 %v11308_v19, %v11179_v33 }
 0x122   : > { %1533 = vmatmul.bf16.vlgmr.msrb.gmra.mxu1 %v11470_v32  ;;  %v1097_v20 = vadd.f32 %v1030_v13, %v938_v1  ;;  %v1106_v16 = vadd.f32 %v1054_v43, %v947_v50  ;;  %v779_v3 = vadd.f32 %v11181_v35, %v566_v7  ;;  %v788_v4 = vadd.f32 %v11183_v36, %v590_v8  ;;  %v10016_v35 = vld [vmem:[%s15194_s3 + $0x1b4] sm:$0xf]  ;;  %v7188_v36 = vld [vmem:[%s15194_s3 + $0x1b8] sm:$0xf0]  ;;  %v10045_v7 = vld [vmem:[%s15194_s3 + $0x294] sm:$0xf0] }
 0x123   : > { %v7191_v44 = vor.u32 %v10016_v35, %v7188_v36  ;;  %v9964_v1 = vld [vmem:[%s15194_s3 + $0x14] sm:$0xf]  ;;  %1620 = vmatpush.bf16.msrb.mxu2 %v7159_v48  ;;  %v10006_v8 = vld [vmem:[%s15194_s3 + $0x164] sm:$0xf]  ;;  %v6972_v36 = vld [vmem:[%s15194_s3 + $0x8] sm:$0xf0] }
 0x124   : > { %2014 = vmatpush.bf16.msrb.mxu1 %v7375_v56  ;;  %v942_v13 = vadd.f32 %v11310_v21, %v779_v3  ;;  %v951_v43 = vadd.f32 %v11312_v14, %v788_v4  ;;  %v1123_v59 = vadd.f32 %v11502_v29, %v1097_v20  ;;  %v1132_v45 = vadd.f32 %v11414_v34, %v1106_v16  ;;  %v6980_v21 = vld [vmem:[%s15194_s3 + $0x18] sm:$0xf0]  ;;  %v7358_v14 = vld [vmem:[%s15194_s3 + $0x290] sm:$0xf]  ;;  %v7148_v20 = vld [vmem:[%s15194_s3 + $0x168] sm:$0xf0] }
 0x125   : > { %v11504_v26 = vpop.f32.mrf.mxu2  ;;  %1587 = vmatpush.bf16.msra.mxu0 %v6991_v24  ;;  %1643 = vmatpush.bf16.msra.mxu3 %v7191_v44  ;;  %v6983_v10 = vor.u32 %v9964_v1, %v6980_v21  ;;  %v623_v16 = vadd.f32 %v11149_v6, %v11129_v52  ;;  %v7359_v49 = vor.u32 %v10045_v7, %v7358_v14  ;;  %v10014_v3 = vld [vmem:[%s15194_s3 + $0x1a4] sm:$0xf]  ;;  %v7180_v4 = vld [vmem:[%s15194_s3 + $0x1a8] sm:$0xf0]  ;;  %v11565_v24 = vperm.slane %v11389_v30, 3 }
 0x126   : > { %v7151_v51 = vor.u32 %v10006_v8, %v7148_v20  ;;  %v7183_v6 = vor.u32 %v10014_v3, %v7180_v4  ;;  %v1139_v19 = vmax.f32 %v1123_v59, 0.0  ;;  %v1148_v41 = vmax.f32 %v1132_v45, 0.0  ;;  %v9962_v35 = vld [vmem:[%s15194_s3 + $0x4] sm:$0xf]  ;;  %v10004_v59 = vld [vmem:[%s15194_s3 + $0x154] sm:$0xf] }
 0x127   : > { %v782_v33 = vadd.f32 %v11199_v46, %v623_v16  ;;  %v7350_v46 = vld [vmem:[%s15194_s3 + $0x280] sm:$0xf]  ;;  %v7140_v45 = vld [vmem:[%s15194_s3 + $0x158] sm:$0xf0]  ;;  %v7310_v8 = vld [vmem:[%s15194_s3 + $0x230] sm:$0xf] }
 0x128   : > { %v1087_v47 = vpop.f32.mrf.mxu3  ;;  %2015 = vmatpush.bf16.msrb.mxu1 %v7367_v28  ;;  %1621 = vmatpush.bf16.msrb.mxu2 %v7151_v51  ;;  %v7172_v14 = vld [vmem:[%s15194_s3 + $0x198] sm:$0xf0]  ;;  %v10033_v20 = vld [vmem:[%s15194_s3 + $0x234] sm:$0xf0]  ;;  %v7342_v16 = vld [vmem:[%s15194_s3 + $0x270] sm:$0xf] }
 0x129   : > { %v1032_v60 = vpop.f32.mrf.mxu0  ;;  %v1056_v62 = vpop.f32.mrf.mxu1  ;;  %1588 = vmatpush.bf16.msra.mxu0 %v6983_v10  ;;  %v1100_v28 = vadd.f32 %v1087_v47, %v941_v23  ;;  %1644 = vmatpush.bf16.msra.mxu3 %v7183_v6  ;;  %v10043_v47 = vld [vmem:[%s15194_s3 + $0x284] sm:$0xf0]  ;;  %v945_v48 = vadd.f32 %v11364_v12, %v782_v33  ;;  %v7143_v12 = vor.u32 %v10004_v59, %v7140_v45  ;;  %v10002_v51 = vld [vmem:[%s15194_s3 + $0x144] sm:$0xf]  ;;  %v7132_v3 = vld [vmem:[%s15194_s3 + $0x148] sm:$0xf0] }
 0x12a   : > { %v1101_v50 = vadd.f32 %v1032_v60, %v942_v13  ;;  %v1110_v56 = vadd.f32 %v1056_v62, %v951_v43  ;;  %v6975_v43 = vor.u32 %v9962_v35, %v6972_v36  ;;  %v7351_v44 = vor.u32 %v10043_v47, %v7350_v46  ;;  %v10012_v60 = vld [vmem:[%s15194_s3 + $0x194] sm:$0xf]  ;;  %v10010_v6 = vld [vmem:[%s15194_s3 + $0x184] sm:$0xf]  ;;  %v7164_v33 = vld [vmem:[%s15194_s3 + $0x188] sm:$0xf0] }
 0x12b   : > { %v7175_v7 = vor.u32 %v10012_v60, %v7172_v14  ;;  %v7311_v23 = vor.u32 %v10033_v20, %v7310_v8  ;;  %v604_v47 = vadd.f32 %v11157_v17, %v11138_v57  ;;  %v7124_v59 = vld [vmem:[%s15194_s3 + $0x138] sm:$0xf0]  ;;  %v940_v45 = vadd.f32 %v11401_v63, %v11226_v0  ;;  %v10029_v0 = vld [vmem:[%s15194_s3 + $0x214] sm:$0xf0] }
 0x12c   : > { %v1127_v39 = vadd.f32 %v11502_v29, %v1101_v50  ;;  %v1136_v52 = vadd.f32 %v11414_v34, %v1110_v56  ;;  %2016 = vmatpush.bf16.msrb.mxu1 %v7359_v49  ;;  %v1126_v50 = vadd.f32 %v11565_v24, %v1100_v28  ;;  %v10041_v49 = vld [vmem:[%s15194_s3 + $0x274] sm:$0xf0]  ;;  %1622 = vmatpush.bf16.msrb.mxu2 %v7143_v12  ;;  %v11660_v57 = vperm.slane %v11389_v30, 2  ;;  %v7326_v30 = vld [vmem:[%s15194_s3 + $0x250] sm:$0xf] }
 0x12d   : > { %v11570_v42 = vpop.f32.mrf.mxu2  ;;  %1589 = vmatpush.bf16.msra.mxu0 %v6975_v43  ;;  %1645 = vmatpush.bf16.msra.mxu3 %v7175_v7  ;;  %v7167_v28 = vor.u32 %v10010_v6, %v7164_v33  ;;  %v10031_v43 = vld [vmem:[%s15194_s3 + $0x224] sm:$0xf0]  ;;  %v781_v12 = vadd.f32 %v11249_v25, %v604_v47  ;;  %v9998_v7 = vld [vmem:[%s15194_s3 + $0x124] sm:$0xf]  ;;  %v628_v8 = vadd.f32 %v11159_v18, %v11140_v58  ;;  %v7108_v33 = vld [vmem:[%s15194_s3 + $0x118] sm:$0xf0] }
 0x12e   : > { %v1143_v13 = vmax.f32 %v1127_v39, 0.0  ;;  %v1152_v34 = vmax.f32 %v1136_v52, 0.0  ;;  %v7343_v39 = vor.u32 %v10041_v49, %v7342_v16  ;;  %v7135_v52 = vor.u32 %v10002_v51, %v7132_v3  ;;  %v7286_v49 = vld [vmem:[%s15194_s3 + $0x200] sm:$0xf]  ;;  %v10027_v51 = vld [vmem:[%s15194_s3 + $0x204] sm:$0xf0] }
 0x12f   : > { %v1142_v35 = vmax.f32 %v1126_v50, 0.0  ;;  %v7294_v50 = vld [vmem:[%s15194_s3 + $0x210] sm:$0xf]  ;;  %v949_v20 = vadd.f32 %v11426_v27, %v11231_v9  ;;  %v944_v3 = vadd.f32 %v11450_v2, %v781_v12  ;;  %v7287_v9 = vor.u32 %v10027_v51, %v7286_v49  ;;  %v7318_v27 = vld [vmem:[%s15194_s3 + $0x240] sm:$0xf] }
 0x130   : > { %v11594_v62 = vpack.c.bf16 %v1143_v13, %v1139_v19  ;;  %v11596_v1 = vpack.c.bf16 %v1152_v34, %v1148_v41  ;;  %v1089_v21 = vpop.f32.mrf.mxu3  ;;  %2017 = vmatpush.bf16.msrb.mxu1 %v7351_v44  ;;  %v571_v19 = vadd.f32 %v11153_v15, %v11134_v55  ;;  %v946_v41 = vadd.f32 %v11366_v22, %v11212_v54  ;;  %v7302_v34 = vld [vmem:[%s15194_s3 + $0x220] sm:$0xf]  ;;  %v10039_v22 = vld [vmem:[%s15194_s3 + $0x264] sm:$0xf0] }
 0x131   : > { %v1104_v56 = vadd.f32 %v1089_v21, %v945_v48  ;;  %v1035_v10 = vpop.f32.mrf.mxu0  ;;  %v7303_v15 = vor.u32 %v10031_v43, %v7302_v34  ;;  %v7334_v54 = vld [vmem:[%s15194_s3 + $0x260] sm:$0xf]  ;;  %1623 = vmatpush.bf16.msrb.mxu2 %v7135_v52  ;;  %1646 = vmatpush.bf16.msra.mxu3 %v7167_v28  ;;  %v790_v52 = vadd.f32 %v11263_v38, %v628_v8  ;;  %v10065_v8 = vld [vmem:[%s15194_s3 + $0x334] sm:$0xf0] }
 0x132   : > { %1514 = vmatmul.bf16.vlgmr.msrb.gmra.mxu0 %v11594_v62  ;;  %1538 = vmatmul.bf16.gmra.mxu1 %v11596_v1  ;;  %v787_v46 = vadd.f32 %v11233_v11, %v571_v19  ;;  %v1105_v55 = vadd.f32 %v1035_v10, %v946_v41  ;;  %v7335_v44 = vor.u32 %v10039_v22, %v7334_v54  ;;  %v10000_v11 = vld [vmem:[%s15194_s3 + $0x134] sm:$0xf]  ;;  %v10037_v10 = vld [vmem:[%s15194_s3 + $0x254] sm:$0xf0] }
 0x133   : > { %v1130_v4 = vadd.f32 %v11565_v24, %v1104_v56  ;;  %1995 = vmatpush.bf16.msrb.mxu0 %v7311_v23  ;;  %v7127_v21 = vor.u32 %v10000_v11, %v7124_v59  ;;  %v7295_v56 = vor.u32 %v10029_v0, %v7294_v50  ;;  %v7327_v16 = vor.u32 %v10037_v10, %v7326_v30  ;;  %v7116_v23 = vld [vmem:[%s15194_s3 + $0x128] sm:$0xf0]  ;;  %v10048_v54 = vld [vmem:[%s15194_s3 + $0x2b4] sm:$0xf]  ;;  %v7376_v11 = vld [vmem:[%s15194_s3 + $0x2b8] sm:$0xf0] }
 0x134   : > { %2018 = vmatpush.bf16.msrb.mxu1 %v7343_v39  ;;  %v950_v60 = vadd.f32 %v11428_v31, %v787_v46  ;;  %v1131_v63 = vadd.f32 %v11502_v29, %v1105_v55  ;;  %v7119_v18 = vor.u32 %v9998_v7, %v7116_v23  ;;  %v9996_v39 = vld [vmem:[%s15194_s3 + $0x114] sm:$0xf]  ;;  %v9994_v59 = vld [vmem:[%s15194_s3 + $0x104] sm:$0xf]  ;;  %v7270_v30 = vld [vmem:[%s15194_s3 + $0x1e0] sm:$0xf]  ;;  %v609_v23 = vadd.f32 %v11191_v40, %v11147_v5 }
 0x135   : > { %v1146_v36 = vmax.f32 %v1130_v4, 0.0  ;;  %v1068_v13 = vpop.f32.mrf.mxu2  ;;  %1624 = vmatpush.bf16.msrb.mxu2 %v7127_v21  ;;  %v10035_v4 = vld [vmem:[%s15194_s3 + $0x244] sm:$0xf0]  ;;  %v948_v49 = vadd.f32 %v11504_v26, %v11291_v61  ;;  %v10044_v5 = vld [vmem:[%s15194_s3 + $0x294] sm:$0xf] }
 0x136   : > { %v1099_v25 = vadd.f32 %v1068_v13, %v940_v45  ;;  %v1147_v19 = vmax.f32 %v1131_v63, 0.0  ;;  %v7111_v13 = vor.u32 %v9996_v39, %v7108_v33  ;;  %v789_v40 = vadd.f32 %v11338_v53, %v609_v23  ;;  %v10063_v39 = vld [vmem:[%s15194_s3 + $0x324] sm:$0xf0]  ;;  %v7462_v53 = vld [vmem:[%s15194_s3 + $0x360] sm:$0xf] }
 0x137   : > { %v11648_v48 = vpack.c.bf16 %v1146_v36, %v1142_v35  ;;  %1996 = vmatpush.bf16.msrb.mxu0 %v7303_v15  ;;  %v953_v36 = vadd.f32 %v11472_v37, %v790_v52  ;;  %v7278_v15 = vld [vmem:[%s15194_s3 + $0x1f0] sm:$0xf]  ;;  %v10025_v37 = vld [vmem:[%s15194_s3 + $0x1f4] sm:$0xf0]  ;;  %v10071_v52 = vld [vmem:[%s15194_s3 + $0x364] sm:$0xf0] }
 0x138   : > { %v1092_v17 = vpop.f32.mrf.mxu3  ;;  %2019 = vmatpush.bf16.msrb.mxu1 %v7335_v44  ;;  %v1125_v41 = vadd.f32 %v11660_v57, %v1099_v25  ;;  %v7279_v44 = vor.u32 %v10025_v37, %v7278_v15  ;;  %v10046_v25 = vld [vmem:[%s15194_s3 + $0x2a4] sm:$0xf]  ;;  %v7254_v33 = vld [vmem:[%s15194_s3 + $0x1c0] sm:$0xf]  ;;  %v10069_v15 = vld [vmem:[%s15194_s3 + $0x354] sm:$0xf0] }
 0x139   : > { %7192 = vmatmul.msk.bf16.vlgmr.msrb.gmra.mxu3 %vm1499_vm5, %v11648_v48  ;;  %v1037_v14 = vpop.f32.mrf.mxu0  ;;  %v1108_v2 = vadd.f32 %v1092_v17, %v949_v20  ;;  %1625 = vmatpush.bf16.msrb.mxu2 %v7119_v18  ;;  %v7100_v17 = vld [vmem:[%s15194_s3 + $0x108] sm:$0xf0]  ;;  %v7470_v20 = vld [vmem:[%s15194_s3 + $0x370] sm:$0xf]  ;;  %v10021_v18 = vld [vmem:[%s15194_s3 + $0x1d4] sm:$0xf0] }
 0x13a   : > { %v1109_v31 = vadd.f32 %v1037_v14, %v950_v60  ;;  %v1141_v22 = vmax.f32 %v1125_v41, 0.0  ;;  %v7379_v60 = vor.u32 %v10048_v54, %v7376_v11  ;;  %v7103_v12 = vor.u32 %v9994_v59, %v7100_v17  ;;  %v10042_v41 = vld [vmem:[%s15194_s3 + $0x284] sm:$0xf]  ;;  %v10040_v11 = vld [vmem:[%s15194_s3 + $0x274] sm:$0xf] }
 0x13b   : > { %1997 = vmatpush.bf16.msrb.mxu0 %v7295_v56  ;;  %v1134_v46 = vadd.f32 %v11565_v24, %v1108_v2  ;;  %v7438_v56 = vld [vmem:[%s15194_s3 + $0x330] sm:$0xf]  ;;  %v952_v2 = vadd.f32 %v11570_v42, %v789_v40  ;;  %v7352_v42 = vld [vmem:[%s15194_s3 + $0x288] sm:$0xf0]  ;;  %v7414_v17 = vld [vmem:[%s15194_s3 + $0x300] sm:$0xf] }
 0x13c   : > { %v1135_v58 = vadd.f32 %v11502_v29, %v1109_v31  ;;  %2020 = vmatpush.bf16.msrb.mxu1 %v7327_v16  ;;  %v7319_v29 = vor.u32 %v10035_v4, %v7318_v27  ;;  %v7368_v31 = vld [vmem:[%s15194_s3 + $0x2a8] sm:$0xf0]  ;;  %v10073_v16 = vld [vmem:[%s15194_s3 + $0x374] sm:$0xf0]  ;;  %v7439_v51 = vor.u32 %v10065_v8, %v7438_v56  ;;  %v7430_v27 = vld [vmem:[%s15194_s3 + $0x320] sm:$0xf] }
 0x13d   : > { %v1070_v6 = vpop.f32.mrf.mxu2  ;;  %1626 = vmatpush.bf16.msrb.mxu2 %v7111_v13  ;;  %v1150_v14 = vmax.f32 %v1134_v46, 0.0  ;;  %v7371_v7 = vor.u32 %v10046_v25, %v7368_v31  ;;  %v10061_v13 = vld [vmem:[%s15194_s3 + $0x314] sm:$0xf0]  ;;  %v7355_v46 = vor.u32 %v10042_v41, %v7352_v42  ;;  %v10030_v25 = vld [vmem:[%s15194_s3 + $0x224] sm:$0xf] }
 0x13e   : > { %v1151_v28 = vmax.f32 %v1135_v58, 0.0  ;;  %v1103_v35 = vadd.f32 %v1070_v6, %v944_v3  ;;  %v7471_v3 = vor.u32 %v10073_v16, %v7470_v20  ;;  %v7262_v58 = vld [vmem:[%s15194_s3 + $0x1d0] sm:$0xf]  ;;  %v7431_v6 = vor.u32 %v10063_v39, %v7430_v27  ;;  %v7304_v31 = vld [vmem:[%s15194_s3 + $0x228] sm:$0xf0] }
 0x13f   : > { %1998 = vmatpush.bf16.msrb.mxu0 %v7287_v9  ;;  %v7263_v26 = vor.u32 %v10021_v18, %v7262_v58  ;;  %v7360_v9 = vld [vmem:[%s15194_s3 + $0x298] sm:$0xf0]  ;;  %v10038_v56 = vld [vmem:[%s15194_s3 + $0x264] sm:$0xf]  ;;  %v7336_v8 = vld [vmem:[%s15194_s3 + $0x268] sm:$0xf0] }
 0x140   : > { %v11711_v34 = vpack.c.bf16 %v1151_v28, %v1147_v19  ;;  %v1129_v38 = vadd.f32 %v11660_v57, %v1103_v35  ;;  %v1094_v43 = vpop.f32.mrf.mxu3  ;;  %2021 = vmatpush.bf16.msrb.mxu1 %v7319_v29  ;;  %2056 = vmatpush.bf16.msrb.mxu3 %v7471_v3  ;;  %v7363_v4 = vor.u32 %v10044_v5, %v7360_v9  ;;  %v10019_v19 = vld [vmem:[%s15194_s3 + $0x1c4] sm:$0xf0]  ;;  %v7406_v20 = vld [vmem:[%s15194_s3 + $0x2f0] sm:$0xf]  ;;  %v10057_v16 = vld [vmem:[%s15194_s3 + $0x2f4] sm:$0xf0] }
 0x141   : > { %v1112_v55 = vadd.f32 %v1094_v43, %v953_v36  ;;  %1627 = vmatpush.bf16.msrb.mxu2 %v7103_v12  ;;  %v7463_v29 = vor.u32 %v10071_v52, %v7462_v53  ;;  %v7255_v35 = vor.u32 %v10019_v19, %v7254_v33  ;;  %v7422_v36 = vld [vmem:[%s15194_s3 + $0x310] sm:$0xf]  ;;  %v7339_v23 = vor.u32 %v10038_v56, %v7336_v8  ;;  %v7296_v3 = vld [vmem:[%s15194_s3 + $0x218] sm:$0xf0]  ;;  %v10036_v58 = vld [vmem:[%s15194_s3 + $0x254] sm:$0xf] }
 0x142   : > { %v1145_v47 = vmax.f32 %v1129_v38, 0.0  ;;  %1519 = vmatmul.bf16.gmra.mxu0 %v11711_v34  ;;  %1609 = vmatmul.bf16.vlgmr.msra.gmra.mxu1 %v11470_v32  ;;  %v7423_v37 = vor.u32 %v10061_v13, %v7422_v36  ;;  %v7328_v5 = vld [vmem:[%s15194_s3 + $0x258] sm:$0xf0]  ;;  %v7398_v40 = vld [vmem:[%s15194_s3 + $0x2e0] sm:$0xf] }
 0x143   : > { %v1138_v45 = vadd.f32 %v11565_v24, %v1112_v55  ;;  %1999 = vmatpush.bf16.msrb.mxu0 %v7279_v44  ;;  %v10023_v24 = vld [vmem:[%s15194_s3 + $0x1e4] sm:$0xf0]  ;;  %v7454_v55 = vld [vmem:[%s15194_s3 + $0x350] sm:$0xf]  ;;  %v7312_v44 = vld [vmem:[%s15194_s3 + $0x238] sm:$0xf0] }
 0x144   : > { %v11736_v21 = vpack.c.bf16 %v1145_v47, %v1141_v22  ;;  %2090 = vmatpush.bf16.msra.mxu1 %v7379_v60  ;;  %v7271_v63 = vor.u32 %v10023_v24, %v7270_v30  ;;  %2057 = vmatpush.bf16.msrb.mxu3 %v7463_v29  ;;  %v7455_v54 = vor.u32 %v10069_v15, %v7454_v55  ;;  %v10032_v47 = vld [vmem:[%s15194_s3 + $0x234] sm:$0xf]  ;;  %v7344_v60 = vld [vmem:[%s15194_s3 + $0x278] sm:$0xf0]  ;;  %v10026_v27 = vld [vmem:[%s15194_s3 + $0x204] sm:$0xf] }
 0x145   : > { %v1154_v50 = vmax.f32 %v1138_v45, 0.0  ;;  %v1073_v0 = vpop.f32.mrf.mxu2  ;;  %v7347_v12 = vor.u32 %v10040_v11, %v7344_v60  ;;  %v10034_v39 = vld [vmem:[%s15194_s3 + $0x244] sm:$0xf]  ;;  %v7320_v52 = vld [vmem:[%s15194_s3 + $0x248] sm:$0xf0] }
 0x146   : > { %1552 = vmatmul.bf16.vlgmr.msra.gmra.mxu2 %v11736_v21  ;;  %v1107_v61 = vadd.f32 %v1073_v0, %v948_v49  ;;  %v10067_v0 = vld [vmem:[%s15194_s3 + $0x344] sm:$0xf0]  ;;  %v7407_v49 = vor.u32 %v10057_v16, %v7406_v20  ;;  %v7323_v29 = vor.u32 %v10034_v39, %v7320_v52  ;;  %v10024_v19 = vld [vmem:[%s15194_s3 + $0x1f4] sm:$0xf]  ;;  %v7280_v41 = vld [vmem:[%s15194_s3 + $0x1f8] sm:$0xf0] }
 0x147   : > { %v11754_v10 = vpack.c.bf16 %v1154_v50, %v1150_v14  ;;  %2000 = vmatpush.bf16.msrb.mxu0 %v7271_v63  ;;  %2033 = vmatpush.bf16.msra.mxu2 %v7439_v51  ;;  %v10059_v14 = vld [vmem:[%s15194_s3 + $0x304] sm:$0xf0]  ;;  %v7446_v50 = vld [vmem:[%s15194_s3 + $0x340] sm:$0xf]  ;;  %v10028_v51 = vld [vmem:[%s15194_s3 + $0x214] sm:$0xf] }
 0x148   : > { %2091 = vmatpush.bf16.msra.mxu1 %v7371_v7  ;;  %v1133_v38 = vadd.f32 %v11660_v57, %v1107_v61  ;;  %2058 = vmatpush.bf16.msrb.mxu3 %v7455_v54  ;;  %v7415_v24 = vor.u32 %v10059_v14, %v7414_v17  ;;  %v7447_v63 = vor.u32 %v10067_v0, %v7446_v50  ;;  %v10055_v61 = vld [vmem:[%s15194_s3 + $0x2e4] sm:$0xf0]  ;;  %v10022_v13 = vld [vmem:[%s15194_s3 + $0x1e4] sm:$0xf]  ;;  %v7440_v55 = vld [vmem:[%s15194_s3 + $0x338] sm:$0xf0] }
 0x149   : > { %7193 = vmatmul.msk.bf16.gmra.mxu3 %vm1499_vm5, %v11754_v10  ;;  %v7307_v7 = vor.u32 %v10030_v25, %v7304_v31  ;;  %v7299_v18 = vor.u32 %v10028_v51, %v7296_v3  ;;  %v7399_v9 = vor.u32 %v10055_v61, %v7398_v40  ;;  %v10051_v42 = vld [vmem:[%s15194_s3 + $0x2c4] sm:$0xf0]  ;;  %v7472_v54 = vld [vmem:[%s15194_s3 + $0x378] sm:$0xf0]  ;;  %v10062_v11 = vld [vmem:[%s15194_s3 + $0x324] sm:$0xf] }
 0x14a   : > { %v1149_v59 = vmax.f32 %v1133_v38, 0.0  ;;  %v7272_v38 = vld [vmem:[%s15194_s3 + $0x1e8] sm:$0xf0]  ;;  %v10018_v14 = vld [vmem:[%s15194_s3 + $0x1c4] sm:$0xf] }
 0x14b   : > { %2001 = vmatpush.bf16.msrb.mxu0 %v7263_v26  ;;  %2034 = vmatpush.bf16.msra.mxu2 %v7431_v6  ;;  %v7331_v26 = vor.u32 %v10036_v58, %v7328_v5  ;;  %v10053_v6 = vld [vmem:[%s15194_s3 + $0x2d4] sm:$0xf0]  ;;  %v7464_v60 = vld [vmem:[%s15194_s3 + $0x368] sm:$0xf0]  ;;  %v10060_v0 = vld [vmem:[%s15194_s3 + $0x314] sm:$0xf] }
 0x14c   : > { %2092 = vmatpush.bf16.msra.mxu1 %v7363_v4  ;;  %2059 = vmatpush.bf16.msrb.mxu3 %v7447_v63  ;;  %v7288_v4 = vld [vmem:[%s15194_s3 + $0x208] sm:$0xf0]  ;;  %v7424_v63 = vld [vmem:[%s15194_s3 + $0x318] sm:$0xf0]  ;;  %v10068_v25 = vld [vmem:[%s15194_s3 + $0x354] sm:$0xf] }
 0x14d   : > { %v1075_v28 = vpop.f32.mrf.mxu2  ;;  %v7291_v53 = vor.u32 %v10026_v27, %v7288_v4  ;;  %v7256_v50 = vld [vmem:[%s15194_s3 + $0x1c8] sm:$0xf0]  ;;  %v7456_v31 = vld [vmem:[%s15194_s3 + $0x358] sm:$0xf0]  ;;  %v7427_v56 = vor.u32 %v10060_v0, %v7424_v63  ;;  %v10058_v8 = vld [vmem:[%s15194_s3 + $0x304] sm:$0xf] }
 0x14e   : > { %v1111_v43 = vadd.f32 %v1075_v28, %v952_v2  ;;  %v7390_v2 = vld [vmem:[%s15194_s3 + $0x2d0] sm:$0xf]  ;;  %v7283_v28 = vor.u32 %v10024_v19, %v7280_v41  ;;  %v7416_v20 = vld [vmem:[%s15194_s3 + $0x308] sm:$0xf0]  ;;  %v10066_v16 = vld [vmem:[%s15194_s3 + $0x344] sm:$0xf] }
 0x14f   : > { %2002 = vmatpush.bf16.msrb.mxu0 %v7255_v35  ;;  %2035 = vmatpush.bf16.msra.mxu2 %v7423_v37  ;;  %v7391_v33 = vor.u32 %v10053_v6, %v7390_v2  ;;  %v7382_v35 = vld [vmem:[%s15194_s3 + $0x2c0] sm:$0xf]  ;;  %v10072_v37 = vld [vmem:[%s15194_s3 + $0x374] sm:$0xf]  ;;  %v7408_v58 = vld [vmem:[%s15194_s3 + $0x2f8] sm:$0xf0] }
 0x150   : > { %v1137_v22 = vadd.f32 %v11660_v57, %v1111_v43  ;;  %2093 = vmatpush.bf16.msra.mxu1 %v7355_v46  ;;  %v7315_v57 = vor.u32 %v10032_v47, %v7312_v44  ;;  %v7383_v36 = vor.u32 %v10051_v42, %v7382_v35  ;;  %v7275_v43 = vor.u32 %v10022_v13, %v7272_v38  ;;  %v10064_v46 = vld [vmem:[%s15194_s3 + $0x334] sm:$0xf]  ;;  %v7264_v44 = vld [vmem:[%s15194_s3 + $0x1d8] sm:$0xf0]  ;;  %v10054_v5 = vld [vmem:[%s15194_s3 + $0x2e4] sm:$0xf] }
 0x151   : > { %v7443_v15 = vor.u32 %v10064_v46, %v7440_v55  ;;  %v10020_v47 = vld [vmem:[%s15194_s3 + $0x1d4] sm:$0xf]  ;;  %v7400_v40 = vld [vmem:[%s15194_s3 + $0x2e8] sm:$0xf0]  ;;  %v10050_v4 = vld [vmem:[%s15194_s3 + $0x2c4] sm:$0xf] }
 0x152   : > { %v1153_v45 = vmax.f32 %v1137_v22, 0.0  ;;  %1590 = vmatmul.bf16.vlgmr.msra.gmra.mxu0 %v11594_v62  ;;  %1614 = vmatmul.bf16.gmra.mxu1 %v11596_v1  ;;  %v7475_v22 = vor.u32 %v10072_v37, %v7472_v54  ;;  %v10056_v3 = vld [vmem:[%s15194_s3 + $0x2f4] sm:$0xf]  ;;  %v7403_v61 = vor.u32 %v10054_v5, %v7400_v40  ;;  %v7384_v39 = vld [vmem:[%s15194_s3 + $0x2c8] sm:$0xf0] }
 0x153   : > { %2071 = vmatpush.bf16.msra.mxu0 %v7315_v57  ;;  %2036 = vmatpush.bf16.msra.mxu2 %v7415_v24  ;;  %v10070_v57 = vld [vmem:[%s15194_s3 + $0x364] sm:$0xf]  ;;  %v7259_v24 = vor.u32 %v10018_v14, %v7256_v50 }
 0x154   : > { %v11849_v30 = vpack.c.bf16 %v1153_v45, %v1149_v59  ;;  %2094 = vmatpush.bf16.msra.mxu1 %v7347_v12  ;;  %v7267_v59 = vor.u32 %v10020_v47, %v7264_v44  ;;  %v7432_v45 = vld [vmem:[%s15194_s3 + $0x328] sm:$0xf0]  ;;  %v7467_v12 = vor.u32 %v10070_v57, %v7464_v60 }
 0x155   : > { %v7435_v17 = vor.u32 %v10062_v11, %v7432_v45 }
 0x156   : > { %1557 = vmatmul.bf16.gmra.mxu2 %v11849_v30 }
 0x157   : > { %2072 = vmatpush.bf16.msra.mxu0 %v7307_v7  ;;  %2037 = vmatpush.bf16.msra.mxu2 %v7407_v49  ;;  %v7459_v7 = vor.u32 %v10068_v25, %v7456_v31  ;;  %v7448_v49 = vld [vmem:[%s15194_s3 + $0x348] sm:$0xf0] }
 0x158   : > { %2095 = vmatpush.bf16.msra.mxu1 %v7339_v23  ;;  %v7419_v23 = vor.u32 %v10058_v8, %v7416_v20  ;;  %v7451_v51 = vor.u32 %v10066_v16, %v7448_v49 }
 0x159   : > { %7194 = vmatmul.msk.bf16.vlgmr.msra.gmra.mxu3 %vm1499_vm5, %v11648_v48 }
 0x15a   : > { %2132 = vmatpush.bf16.msra.mxu3 %v7475_v22 }
 0x15b   : > { %2073 = vmatpush.bf16.msra.mxu0 %v7299_v18  ;;  %2038 = vmatpush.bf16.msra.mxu2 %v7399_v9  ;;  %v7411_v18 = vor.u32 %v10056_v3, %v7408_v58  ;;  %v7392_v9 = vld [vmem:[%s15194_s3 + $0x2d8] sm:$0xf0] }
 0x15c   : > { %2096 = vmatpush.bf16.msra.mxu1 %v7331_v26  ;;  %v10052_v26 = vld [vmem:[%s15194_s3 + $0x2d4] sm:$0xf] }
 0x15d   : > { %v7395_v27 = vor.u32 %v10052_v26, %v7392_v9 }
 0x15e   : > { %2133 = vmatpush.bf16.msra.mxu3 %v7467_v12 }
 0x15f   : > { %2074 = vmatpush.bf16.msra.mxu0 %v7291_v53  ;;  %2039 = vmatpush.bf16.msra.mxu2 %v7391_v33  ;;  %v7387_v53 = vor.u32 %v10050_v4, %v7384_v39 }
 0x160   : > { %2097 = vmatpush.bf16.msra.mxu1 %v7323_v29 }
 0x162   : > { %1595 = vmatmul.bf16.gmra.mxu0 %v11711_v34  ;;  %2022 = vmatmul.bf16.vlgmr.msrb.gmra.mxu1 %v11470_v32 }
 0x163   : > { %2075 = vmatpush.bf16.msra.mxu0 %v7283_v28  ;;  %2040 = vmatpush.bf16.msra.mxu2 %v7383_v36 }
 0x164   : > { %2134 = vmatpush.bf16.msra.mxu3 %v7459_v7 }
 0x166   : > { %1628 = vmatmul.bf16.vlgmr.msrb.gmra.mxu2 %v11736_v21 }
 0x167   : > { %2076 = vmatpush.bf16.msra.mxu0 %v7275_v43  ;;  %2109 = vmatpush.bf16.msrb.mxu2 %v7443_v15 }
 0x168   : > { %2135 = vmatpush.bf16.msra.mxu3 %v7451_v51 }
 0x169   : > { %7195 = vmatmul.msk.bf16.gmra.mxu3 %vm1499_vm5, %v11754_v10 }
 0x16b   : > { %2077 = vmatpush.bf16.msra.mxu0 %v7267_v59  ;;  %2110 = vmatpush.bf16.msrb.mxu2 %v7435_v17 }
 0x16f   : > { %2078 = vmatpush.bf16.msra.mxu0 %v7259_v24  ;;  %2111 = vmatpush.bf16.msrb.mxu2 %v7427_v56 }
 0x172   : > { %2003 = vmatmul.bf16.vlgmr.msrb.gmra.mxu0 %v11594_v62  ;;  %2027 = vmatmul.bf16.gmra.mxu1 %v11596_v1 }
 0x173   : > { %2112 = vmatpush.bf16.msrb.mxu2 %v7419_v23 }
 0x176   : > { %1633 = vmatmul.bf16.gmra.mxu2 %v11849_v30 }
 0x177   : > { %2113 = vmatpush.bf16.msrb.mxu2 %v7411_v18 }
 0x179   : > { %7476 = vmatmul.msk.bf16.vlgmr.msrb.gmra.mxu3 %vm1499_vm5, %v11648_v48 }
 0x17b   : > { %2114 = vmatpush.bf16.msrb.mxu2 %v7403_v61 }
 0x17f   : > { %2115 = vmatpush.bf16.msrb.mxu2 %v7395_v27 }
 0x182   : > { %2008 = vmatmul.bf16.gmra.mxu0 %v11711_v34  ;;  %2098 = vmatmul.bf16.vlgmr.msra.gmra.mxu1 %v11470_v32 }
 0x183   : > { %2116 = vmatpush.bf16.msrb.mxu2 %v7387_v53 }
 0x186   : > { %2041 = vmatmul.bf16.vlgmr.msra.gmra.mxu2 %v11736_v21 }
 0x189   : > { %7477 = vmatmul.msk.bf16.gmra.mxu3 %vm1499_vm5, %v11754_v10 }
 0x192   : > { %2079 = vmatmul.bf16.vlgmr.msra.gmra.mxu0 %v11594_v62  ;;  %2103 = vmatmul.bf16.gmra.mxu1 %v11596_v1 }
 0x196   : > { %2046 = vmatmul.bf16.gmra.mxu2 %v11849_v30 }
 0x199   : > { %7478 = vmatmul.msk.bf16.vlgmr.msra.gmra.mxu3 %vm1499_vm5, %v11648_v48 }
 0x19f   : > { %v1534_v32 = vpop.f32.mrf.mxu1 }
 0x1a2   : > { %2084 = vmatmul.bf16.gmra.mxu0 %v11711_v34 }
 0x1a6   : > { %2117 = vmatmul.bf16.vlgmr.msrb.gmra.mxu2 %v11736_v21 }
 0x1a7   : > { %v12034_v52 = vpop.f32.mrf.mxu1 }
 0x1a9   : > { %7479 = vmatmul.msk.bf16.gmra.mxu3 %vm1499_vm5, %v11754_v10 }
 0x1af   : > { %v1515_v2 = vpop.f32.mrf.mxu0  ;;  %v1539_v62 = vpop.f32.mrf.mxu1 }
 0x1b0   : > { %v1535_v6 = vadd.f32 %v1534_v32, %v1515_v2 }
 0x1b6   : > { %2122 = vmatmul.bf16.gmra.mxu2 %v11849_v30 }
 0x1b7   : > { %v12037_v1 = vpop.f32.mrf.mxu0  ;;  %v12039_v19 = vpop.f32.mrf.mxu1 }
 0x1bc   : > { %v1572_v29 = vpop.f32.mrf.mxu3 }
 0x1bf   : > { %v1520_v33 = vpop.f32.mrf.mxu0  ;;  %v1610_v28 = vpop.f32.mrf.mxu1 }
 0x1c0   : > { %v1540_v48 = vadd.f32 %v1539_v62, %v1520_v33 }
 0x1c4   : > { %v12041_v34 = vpop.f32.mrf.mxu3 }
 0x1c7   : > { %v12043_v21 = vpop.f32.mrf.mxu0  ;;  %v1612_v43 = vpop.f32.mrf.mxu1 }
 0x1c9   : > { %v1553_v41 = vpop.f32.mrf.mxu2 }
 0x1ca   : > { %v1554_v10 = vadd.f32 %v1553_v41, %v1535_v6 }
 0x1cc   : > { %v1573_v35 = vadd.f32 %v1572_v29, %v1554_v10  ;;  %v1577_v42 = vpop.f32.mrf.mxu3 }
 0x1cf   : > { %v1591_v36 = vpop.f32.mrf.mxu0  ;;  %v1615_v22 = vpop.f32.mrf.mxu1 }
 0x1d0   : > { %v1611_v13 = vadd.f32 %v1610_v28, %v1591_v36 }
 0x1d1   : > { %v1555_v30 = vpop.f32.mrf.mxu2 }
 0x1d4   : > { %v12045_v38 = vpop.f32.mrf.mxu3 }
 0x1d7   : > { %v1593_v46 = vpop.f32.mrf.mxu0  ;;  %v12053_v14 = vpop.f32.mrf.mxu1 }
 0x1d9   : > { %v1558_v55 = vpop.f32.mrf.mxu2 }
 0x1da   : > { %v1559_v15 = vadd.f32 %v1558_v55, %v1540_v48 }
 0x1dc   : > { %v12047_v37 = vadd.f32 %v1577_v42, %v1559_v15  ;;  %v1648_v54 = vpop.f32.mrf.mxu3  ;;  %v1613_v15 = vadd.f32 %v1612_v43, %v1593_v46 }
 0x1df   : > { %v1596_v47 = vpop.f32.mrf.mxu0  ;;  %v2023_v63 = vpop.f32.mrf.mxu1 }
 0x1e0   : > { %v1616_v44 = vadd.f32 %v1615_v22, %v1596_v47 }
 0x1e1   : > { %v12049_v11 = vpop.f32.mrf.mxu2 }
 0x1e4   : > { %v1650_v59 = vpop.f32.mrf.mxu3 }
 0x1e7   : > { %v12051_v12 = vpop.f32.mrf.mxu0  ;;  %v2025_v16 = vpop.f32.mrf.mxu1 }
 0x1e9   : > { %v1629_v45 = vpop.f32.mrf.mxu2 }
 0x1ea   : > { %v1630_v57 = vadd.f32 %v1629_v45, %v1611_v13 }
 0x1ec   : > { %v1649_v60 = vadd.f32 %v1648_v54, %v1630_v57  ;;  %v1653_v17 = vpop.f32.mrf.mxu3 }
 0x1ef   : > { %v2004_v24 = vpop.f32.mrf.mxu0  ;;  %v2028_v5 = vpop.f32.mrf.mxu1 }
 0x1f0   : > { %v2024_v49 = vadd.f32 %v2023_v63, %v2004_v24 }
 0x1f1   : > { %v1631_v50 = vpop.f32.mrf.mxu2 }
 0x1f2   : > { %v1632_v22 = vadd.f32 %v1631_v50, %v1613_v15 }
 0x1f4   : > { %v12055_v0 = vpop.f32.mrf.mxu3 }
 0x1f7   : > { %v2006_v8 = vpop.f32.mrf.mxu0  ;;  %v2030_v39 = vpop.f32.mrf.mxu1 }
 0x1f8   : > { %v2026_v48 = vadd.f32 %v2025_v16, %v2006_v8 }
 0x1f9   : > { %v1634_v25 = vpop.f32.mrf.mxu2 }
 0x1fa   : > { %v1635_v31 = vadd.f32 %v1634_v25, %v1616_v44 }
 0x1fc   : > { %v12057_v56 = vadd.f32 %v1653_v17, %v1635_v31  ;;  %v2061_v7 = vpop.f32.mrf.mxu3  ;;  %v2174_v17 = vlaneseq }
 0x1fe   : > { %vm12073_vm7 = vcmp.lt.s32.totalorder %v2174_v17, 224  ;;  %v7620_v17 = vld [vmem:[%s15195_s4 + $0x270] sm:$0xf0] }
 0x1ff   : > { %v2009_v58 = vpop.f32.mrf.mxu0  ;;  %v2099_v6 = vpop.f32.mrf.mxu1 }
 0x200   : > { %v2029_v25 = vadd.f32 %v2028_v5, %v2009_v58  ;;  %v10160_v58 = vld [vmem:[%s15195_s4 + $0x2ac] sm:$0xf0] }
 0x201   : > { %v12059_v20 = vpop.f32.mrf.mxu2 }
 0x204   : > { %v2063_v23 = vpop.f32.mrf.mxu3 }
 0x207   : > { %v2011_v4 = vpop.f32.mrf.mxu0  ;;  %v2101_v42 = vpop.f32.mrf.mxu1 }
 0x208   : > { %v2031_v5 = vadd.f32 %v2030_v39, %v2011_v4  ;;  %v7634_v4 = vld [vmem:[%s15195_s4 + $0x280] sm:$0xf]  ;;  %v10156_v39 = vld [vmem:[%s15195_s4 + $0x28c] sm:$0xf0] }
 0x209   : > { %v2042_v51 = vpop.f32.mrf.mxu2 }
 0x20a   : > { %v2043_v3 = vadd.f32 %v2042_v51, %v2024_v49 }
 0x20c   : > { %v2062_v18 = vadd.f32 %v2061_v7, %v2043_v3  ;;  %v2066_v26 = vpop.f32.mrf.mxu3 }
 0x20e   : > { %v2147_v40 = vmax.f32 %v1573_v35, %v2062_v18  ;;  %v1537_v35 = vadd.f32 %v12034_v52, %v12037_v1  ;;  %v1651_v52 = vadd.f32 %v1650_v59, %v1632_v22  ;;  %v7650_v59 = vld [vmem:[%s15195_s4 + $0x2a0] sm:$0xf]  ;;  %v10158_v18 = vld [vmem:[%s15195_s4 + $0x2a4] sm:$0xf] }
 0x20f   : > { %v2080_v2 = vpop.f32.mrf.mxu0 }
 0x210   : > { %v2162_v61 = vrot.slane %v2147_v40, 1  ;;  %v2100_v33 = vadd.f32 %v2099_v6, %v2080_v2  ;;  %v1556_v55 = vadd.f32 %v1555_v30, %v1537_v35  ;;  %v7636_v35 = vld [vmem:[%s15195_s4 + $0x290] sm:$0xf0] }
 0x211   : > { %v2044_v9 = vpop.f32.mrf.mxu2 }
 0x212   : > { %v12061_v27 = vmax.f32 %v2147_v40, %v2162_v61  ;;  %v2045_v36 = vadd.f32 %v2044_v9, %v2026_v48  ;;  %v1575_v24 = vadd.f32 %v12041_v34, %v1556_v55  ;;  %v2104_v34 = vpop.f32.mrf.mxu1  ;;  %v7651_v9 = vor.u32 %v10160_v58, %v7650_v59  ;;  %v7586_v58 = vld [vmem:[%s15195_s4 + $0x220] sm:$0xf] }
 0x214   : > { %2181 = vst [vmem:[#allocation1] sm:$0xff] %v12061_v27  ;;  %v12064_v32 = vpop.f32.mrf.mxu3  ;;  %v2064_v47 = vadd.f32 %v2063_v23, %v2045_v36  ;;  %2733 = vmatpush.bf16.msrb.mxu0 %v7651_v9 }
 0x216   : > { %v2149_v1 = vmax.f32 %v1575_v24, %v2064_v47  ;;  %v10672_v24 = vmov 0.0  }
 0x217   : > { %v2082_v41 = vpop.f32.mrf.mxu0  ;;  %2155 = vst [vmem:[#allocation2] sm:$0x3] %v10672_v24 }
 0x218   : > { %v2102_v45 = vadd.f32 %v2101_v42, %v2082_v41  ;;  %v2207_v23 = vrot.slane %v2149_v1, 1  ;;  %2158 = vst [vmem:[#allocation2 + $0x20] sm:$0x3] %v10672_v24 }
 0x219   : > { %v2047_v53 = vpop.f32.mrf.mxu2  ;;  %2157 = vst.msk [vmem:[#allocation2 + $0x8] sm:$0x3] %vm2156_vm8, %v10672_v24 }
 0x21a   : > { %v2048_v30 = vadd.f32 %v2047_v53, %v2029_v25  ;;  %v7652_v53 = vld [vmem:[%s15195_s4 + $0x2b0] sm:$0xf0]  ;;  %v2106_v22 = vpop.f32.mrf.mxu1  ;;  %2159 = vst.msk [vmem:[#allocation2 + $0x28] sm:$0x3] %vm2156_vm8, %v10672_v24 }
 0x21b   : > { %v7655_v6 = vor.u32 %v10158_v18, %v7652_v53 }
 0x21c   : > { %v2137_v29 = vpop.f32.mrf.mxu3  ;;  %v2067_v49 = vadd.f32 %v2066_v26, %v2048_v30  ;;  %v10148_v30 = vld [vmem:[%s15195_s4 + $0x24c] sm:$0xf0] }
 0x21d   : > { %2761 = vmatpush.bf16.msra.mxu2 %v7655_v6  ;;  %v10182_v6 = vld [vmem:[%s15195_s4 + $0x364] sm:$0xf] }
 0x21f   : > { %v2085_v8 = vpop.f32.mrf.mxu0 }
 0x220   : > { %v2105_v51 = vadd.f32 %v2104_v34, %v2085_v8 }
 0x221   : > { %v2049_v62 = vpop.f32.mrf.mxu2 }
 0x222   : > { %v2050_v48 = vadd.f32 %v2049_v62, %v2031_v5  ;;  %v10154_v62 = vld [vmem:[%s15195_s4 + $0x284] sm:$0xf]  ;;  %v7746_v5 = vld [vmem:[%s15195_s4 + $0x360] sm:$0xf] }
 0x224   : > { %v2139_v44 = vpop.f32.mrf.mxu3 }
 0x227   : > { %v2087_v36 = vpop.f32.mrf.mxu0 }
 0x229   : > { %v2118_v10 = vpop.f32.mrf.mxu2 }
 0x22a   : > { %v2119_v28 = vadd.f32 %v2118_v10, %v2100_v33  ;;  %v12097_v33 = vmax.f32 %v2149_v1, %v2207_v23  ;;  %v2151_v10 = vmax.f32 %v12047_v37, %v2067_v49  ;;  %v1618_v37 = vadd.f32 %v12053_v14, %v12051_v12  ;;  %v7618_v12 = vld [vmem:[%s15195_s4 + $0x260] sm:$0xf]  ;;  %v7604_v23 = vld [vmem:[%s15195_s4 + $0x250] sm:$0xf0] }
 0x22c   : > { %v2138_v13 = vadd.f32 %v2137_v29, %v2119_v28  ;;  %v2142_v40 = vpop.f32.mrf.mxu3  ;;  %v1542_v29 = vadd.f32 %v12039_v19, %v12043_v21  ;;  %v7635_v21 = vor.u32 %v10156_v39, %v7634_v4  ;;  %v2247_v14 = vrot.slane %v2151_v10, 1  ;;  %v7570_v4 = vld [vmem:[%s15195_s4 + $0x200] sm:$0xf]  ;;  %v10140_v39 = vld [vmem:[%s15195_s4 + $0x20c] sm:$0xf0] }
 0x22e   : > { %v2148_v54 = vmax.f32 %v1649_v60, %v2138_v13  ;;  %v1561_v42 = vadd.f32 %v12049_v11, %v1542_v29  ;;  %v7639_v13 = vor.u32 %v10154_v62, %v7636_v35  ;;  %v2069_v11 = vadd.f32 %v12064_v32, %v2050_v48  ;;  %2734 = vmatpush.bf16.msrb.mxu0 %v7635_v21  ;;  %v7748_v29 = vld [vmem:[%s15195_s4 + $0x370] sm:$0xf0]  ;;  %v10180_v62 = vld [vmem:[%s15195_s4 + $0x34c] sm:$0xf0]  ;;  %v10138_v35 = vld [vmem:[%s15195_s4 + $0x204] sm:$0xf] }
 0x22f   : > { %v7571_v21 = vor.u32 %v10140_v39, %v7570_v4  ;;  %v7644_v4 = vld [vmem:[%s15195_s4 + $0x298] sm:$0xf0]  ;;  %v7666_v39 = vld [vmem:[%s15195_s4 + $0x2c0] sm:$0xf] }
 0x230   : > { %v2163_v57 = vrot.slane %v2148_v54, 1  ;;  %2762 = vmatpush.bf16.msra.mxu2 %v7639_v13  ;;  %v1580_v32 = vadd.f32 %v12045_v38, %v1561_v42  ;;  %v7602_v38 = vld [vmem:[%s15195_s4 + $0x240] sm:$0xf]  ;;  %v10178_v13 = vld [vmem:[%s15195_s4 + $0x344] sm:$0xf] }
 0x231   : > { %v2120_v63 = vpop.f32.mrf.mxu2  ;;  %v7814_v60 = vld [vmem:[%s15195_s4 + $0x60] sm:$0xf] }
 0x232   : > { %v12069_v31 = vmax.f32 %v2148_v54, %v2163_v57  ;;  %v2121_v7 = vadd.f32 %v2120_v63, %v2102_v45  ;;  %v1637_v54 = vadd.f32 %v12059_v20, %v1618_v37  ;;  %v10150_v20 = vld [vmem:[%s15195_s4 + $0x264] sm:$0xf]  ;;  %v2153_v1 = vmax.f32 %v1580_v32, %v2069_v11  ;;  %v7554_v11 = vld [vmem:[%s15195_s4 + $0x1e0] sm:$0xf]  ;;  %v7556_v32 = vld [vmem:[%s15195_s4 + $0x1f0] sm:$0xf0] }
 0x234   : > { %v2170_v43 = vrot.slane %v12069_v31, 7  ;;  %2182 = vst [vmem:[#allocation1 + $0x9] sm:$0xff] %v12069_v31  ;;  %v2140_v46 = vadd.f32 %v2139_v44, %v2121_v7  ;;  %v10152_v44 = vld [vmem:[%s15195_s4 + $0x26c] sm:$0xf0]  ;;  %v7623_v7 = vor.u32 %v10150_v20, %v7620_v17  ;;  %v2144_v8 = vpop.f32.mrf.mxu3  ;;  %v10134_v20 = vld [vmem:[%s15195_s4 + $0x1e4] sm:$0xf] }
 0x235   : > { %v7619_v57 = vor.u32 %v10152_v44, %v7618_v12  ;;  %v10136_v12 = vld [vmem:[%s15195_s4 + $0x1ec] sm:$0xf0]  ;;  %v7716_v17 = vld [vmem:[%s15195_s4 + $0x330] sm:$0xf0] }
 0x236   : > { %v2150_v50 = vmax.f32 %v1651_v52, %v2140_v46  ;;  %v2172_v16 = vsel %vm2171_vm6, %v12061_v27, %v2170_v43  ;;  %v1656_v52 = vadd.f32 %v12055_v0, %v1637_v54  ;;  %v10146_v43 = vld [vmem:[%s15195_s4 + $0x244] sm:$0xf]  ;;  %v12154_v46 = vmax.f32 %v2151_v10, %v2247_v14  ;;  %2763 = vmatpush.bf16.msra.mxu2 %v7623_v7  ;;  %v7730_v10 = vld [vmem:[%s15195_s4 + $0x340] sm:$0xf]  ;;  %v7732_v54 = vld [vmem:[%s15195_s4 + $0x350] sm:$0xf0] }
 0x237   : > { %2179 = vst.msk [vmem:[#allocation2 + $0x2] ss:$8 sm:$0x3] %vm12073_vm7, %v2172_v16  ;;  %2735 = vmatpush.bf16.msrb.mxu0 %v7619_v57  ;;  %v7603_v16 = vor.u32 %v10148_v30, %v7602_v38  ;;  %v7607_v59 = vor.u32 %v10146_v43, %v7604_v23  ;;  %v7731_v37 = vor.u32 %v10180_v62, %v7730_v10  ;;  %v10132_v7 = vld [vmem:[%s15195_s4 + $0x1cc] sm:$0xf0] }
 0x238   : > { %v2208_v3 = vrot.slane %v2150_v50, 1  ;;  %v7555_v14 = vor.u32 %v10136_v12, %v7554_v11  ;;  %v7559_v57 = vor.u32 %v10134_v20, %v7556_v32  ;;  %v10172_v38 = vld [vmem:[%s15195_s4 + $0x30c] sm:$0xf0]  ;;  %v10130_v30 = vld [vmem:[%s15195_s4 + $0x1c4] sm:$0xf] }
 0x239   : > { %v2123_v61 = vpop.f32.mrf.mxu2  ;;  %v7668_v62 = vld [vmem:[%s15195_s4 + $0x2d0] sm:$0xf0]  ;;  %v7610_v20 = vld [vmem:[%s15195_s4 + $0x248] sm:$0xf]  ;;  %v10149_v32 = vld [vmem:[%s15195_s4 + $0x254] sm:$0xf0] }
 0x23a   : > { %v12093_v2 = vmax.f32 %v2150_v50, %v2208_v3  ;;  %v2124_v26 = vadd.f32 %v2123_v61, %v2105_v51  ;;  %v2287_v3 = vrot.slane %v2153_v1, 1  ;;  %2764 = vmatpush.bf16.msra.mxu2 %v7607_v59  ;;  %v10142_v61 = vld [vmem:[%s15195_s4 + $0x224] sm:$0xf] }
 0x23b   : > { %v2184_v41 = vld [vmem:[#allocation1 + $0x2] ss:$9 sm:$0xff]  ;;  %2736 = vmatpush.bf16.msrb.mxu0 %v7603_v16 }
 0x23c   : > { %2189 = vst [vmem:[#allocation1] sm:$0xff] %v12061_v27  ;;  %v2215_v28 = vrot.slane %v12093_v2, 7  ;;  %v2143_v19 = vadd.f32 %v2142_v40, %v2124_v26  ;;  %v10184_v40 = vld [vmem:[%s15195_s4 + $0x36c] sm:$0xf0]  ;;  %v7588_v26 = vld [vmem:[%s15195_s4 + $0x230] sm:$0xf0] }
 0x23d   : > { %2190 = vst [vmem:[#allocation1 + $0x9] sm:$0xff] %v12069_v31  ;;  %v7747_v53 = vor.u32 %v10184_v40, %v7746_v5  ;;  %v7591_v48 = vor.u32 %v10142_v61, %v7588_v26  ;;  %v10168_v5 = vld [vmem:[%s15195_s4 + $0x2ec] sm:$0xf0]  ;;  %v10166_v61 = vld [vmem:[%s15195_s4 + $0x2e4] sm:$0xf] }
 0x23e   : > { %v2152_v55 = vmax.f32 %v12057_v56, %v2143_v19  ;;  %v2216_v15 = vsel %vm2171_vm6, %v12097_v33, %v2215_v28  ;;  %2187 = vst.msk [vmem:[#allocation2 + $0x3] ss:$8 sm:$0x3] %vm12073_vm7, %v2184_v41  ;;  %v2107_v56 = vadd.f32 %v2106_v22, %v2087_v36  ;;  %v7751_v41 = vor.u32 %v10182_v6, %v7748_v29  ;;  %v7572_v36 = vld [vmem:[%s15195_s4 + $0x210] sm:$0xf0] }
 0x23f   : > { %2219 = vst.msk [vmem:[#allocation2 + $0x6] ss:$8 sm:$0x3] %vm12073_vm7, %v2216_v15  ;;  %v12203_v28 = vmax.f32 %v2153_v1, %v2287_v3  ;;  %2749 = vmatpush.bf16.msrb.mxu1 %v7747_v53  ;;  %2765 = vmatpush.bf16.msra.mxu2 %v7591_v48  ;;  %v7575_v15 = vor.u32 %v10138_v35, %v7572_v36  ;;  %v7684_v53 = vld [vmem:[%s15195_s4 + $0x2f0] sm:$0xf0] }
 0x240   : > { %v2248_v47 = vrot.slane %v2152_v55, 1  ;;  %2777 = vmatpush.bf16.msrb.mxu3 %v7751_v41  ;;  %v7735_v22 = vor.u32 %v10178_v13, %v7732_v54  ;;  %v7642_v26 = vld [vmem:[%s15195_s4 + $0x288] sm:$0xf]  ;;  %v10157_v6 = vld [vmem:[%s15195_s4 + $0x294] sm:$0xf0]  ;;  %v7687_v29 = vor.u32 %v10166_v61, %v7684_v53 }
 0x241   : > { %v2125_v45 = vpop.f32.mrf.mxu2  ;;  %v7643_v48 = vor.u32 %v10157_v6, %v7642_v26  ;;  %v10155_v41 = vld [vmem:[%s15195_s4 + $0x28c] sm:$0xf]  ;;  %v7754_v36 = vld [vmem:[%s15195_s4 + $0x368] sm:$0xf]  ;;  %v7580_v61 = vld [vmem:[%s15195_s4 + $0x218] sm:$0xf0] }
 0x242   : > { %v12141_v63 = vmax.f32 %v2152_v55, %v2248_v47  ;;  %v2126_v25 = vadd.f32 %v2125_v45, %v2107_v56  ;;  %v7714_v56 = vld [vmem:[%s15195_s4 + $0x320] sm:$0xf]  ;;  %v10176_v47 = vld [vmem:[%s15195_s4 + $0x32c] sm:$0xf0]  ;;  %v10174_v45 = vld [vmem:[%s15195_s4 + $0x324] sm:$0xf]  ;;  %v7647_v10 = vor.u32 %v10155_v41, %v7644_v4 }
 0x243   : > { %2750 = vmatpush.bf16.msrb.mxu1 %v7731_v37  ;;  %2766 = vmatpush.bf16.msra.mxu2 %v7575_v15  ;;  %v7715_v44 = vor.u32 %v10176_v47, %v7714_v56  ;;  %v10153_v37 = vld [vmem:[%s15195_s4 + $0x274] sm:$0xf0]  ;;  %v10151_v54 = vld [vmem:[%s15195_s4 + $0x26c] sm:$0xf]  ;;  %v7756_v47 = vld [vmem:[%s15195_s4 + $0x378] sm:$0xf0] }
 0x244   : > { %v2192_v34 = vld [vmem:[#allocation1 + $0x4] ss:$9 sm:$0xff]  ;;  %v2255_v0 = vrot.slane %v12141_v63, 7  ;;  %v2145_v50 = vadd.f32 %v2144_v8, %v2126_v25  ;;  %2778 = vmatpush.bf16.msrb.mxu3 %v7735_v22 }
 0x245   : > { %2197 = vst [vmem:[#allocation1] sm:$0xff] %v12061_v27  ;;  %v10144_v27 = vld [vmem:[%s15195_s4 + $0x22c] sm:$0xf0]  ;;  %v7538_v25 = vld [vmem:[%s15195_s4 + $0x1c0] sm:$0xf] }
 0x246   : > { %2198 = vst [vmem:[#allocation1 + $0x9] sm:$0xff] %v12069_v31  ;;  %v2154_v49 = vmax.f32 %v1656_v52, %v2145_v50  ;;  %v2256_v51 = vsel %vm2171_vm6, %v12154_v46, %v2255_v0  ;;  %v7587_v31 = vor.u32 %v10144_v27, %v7586_v58  ;;  %v7719_v52 = vor.u32 %v10174_v45, %v7716_v17  ;;  %v7698_v8 = vld [vmem:[%s15195_s4 + $0x300] sm:$0xf]  ;;  %v10170_v0 = vld [vmem:[%s15195_s4 + $0x304] sm:$0xf] }
 0x247   : > { %2259 = vst.msk [vmem:[#allocation2 + $0x12] ss:$8 sm:$0x3] %vm12073_vm7, %v2256_v51  ;;  %2751 = vmatpush.bf16.msrb.mxu1 %v7715_v44  ;;  %v7539_v1 = vor.u32 %v10132_v7, %v7538_v25  ;;  %2767 = vmatpush.bf16.msra.mxu2 %v7559_v57  ;;  %v7699_v43 = vor.u32 %v10172_v38, %v7698_v8  ;;  %v7700_v50 = vld [vmem:[%s15195_s4 + $0x310] sm:$0xf0] }
 0x248   : > { %v2288_v18 = vrot.slane %v2154_v49, 1  ;;  %2195 = vst.msk [vmem:[#allocation2 + $0x4] ss:$8 sm:$0x3] %vm12073_vm7, %v2192_v34  ;;  %2737 = vmatpush.bf16.msrb.mxu0 %v7587_v31  ;;  %v7540_v34 = vld [vmem:[%s15195_s4 + $0x1d0] sm:$0xf0]  ;;  %2779 = vmatpush.bf16.msrb.mxu3 %v7719_v52  ;;  %v7703_v59 = vor.u32 %v10170_v0, %v7700_v50  ;;  %v7611_v45 = vor.u32 %v10149_v32, %v7610_v20 }
 0x249   : > { %v7543_v23 = vor.u32 %v10130_v30, %v7540_v34  ;;  %v10161_v51 = vld [vmem:[%s15195_s4 + $0x2b4] sm:$0xf0]  ;;  %v10159_v58 = vld [vmem:[%s15195_s4 + $0x2ac] sm:$0xf]  ;;  %v7682_v31 = vld [vmem:[%s15195_s4 + $0x2e0] sm:$0xf] }
 0x24a   : > { %v12183_v9 = vmax.f32 %v2154_v49, %v2288_v18  ;;  %v7658_v49 = vld [vmem:[%s15195_s4 + $0x2a8] sm:$0xf]  ;;  %v7660_v18 = vld [vmem:[%s15195_s4 + $0x2b8] sm:$0xf0]  ;;  %v7683_v40 = vor.u32 %v10168_v5, %v7682_v31  ;;  %v10185_v15 = vld [vmem:[%s15195_s4 + $0x374] sm:$0xf0] }
 0x24b   : > { %v7659_v3 = vor.u32 %v10161_v51, %v7658_v49  ;;  %2752 = vmatpush.bf16.msrb.mxu1 %v7699_v43  ;;  %v7663_v27 = vor.u32 %v10159_v58, %v7660_v18  ;;  %2768 = vmatpush.bf16.msra.mxu2 %v7543_v23  ;;  %v7628_v22 = vld [vmem:[%s15195_s4 + $0x278] sm:$0xf0]  ;;  %v7755_v12 = vor.u32 %v10185_v15, %v7754_v36  ;;  %v10183_v56 = vld [vmem:[%s15195_s4 + $0x36c] sm:$0xf]  ;;  %v7738_v57 = vld [vmem:[%s15195_s4 + $0x348] sm:$0xf] }
 0x24c   : > { %v2295_v19 = vrot.slane %v12183_v9, 7  ;;  %2738 = vmatpush.bf16.msrb.mxu0 %v7571_v21  ;;  %2780 = vmatpush.bf16.msrb.mxu3 %v7703_v59  ;;  %v10162_v21 = vld [vmem:[%s15195_s4 + $0x2c4] sm:$0xf]  ;;  %v7759_v44 = vor.u32 %v10183_v56, %v7756_v47  ;;  %v7612_v25 = vld [vmem:[%s15195_s4 + $0x258] sm:$0xf0] }
 0x24d   : > { %v2200_v42 = vld [vmem:[#allocation1 + $0x6] ss:$9 sm:$0xff]  ;;  %v7671_v13 = vor.u32 %v10162_v21, %v7668_v62 }
 0x24e   : > { %2221 = vst [vmem:[#allocation1] sm:$0xff] %v12097_v33  ;;  %v2296_v55 = vsel %vm2171_vm6, %v12203_v28, %v2295_v19  ;;  %v10164_v19 = vld [vmem:[%s15195_s4 + $0x2cc] sm:$0xf0]  ;;  %v10179_v7 = vld [vmem:[%s15195_s4 + $0x34c] sm:$0xf] }
 0x24f   : > { %2222 = vst [vmem:[#allocation1 + $0x9] sm:$0xff] %v12093_v2  ;;  %2817 = vmatpush.bf16.msrb.mxu2 %v7663_v27  ;;  %2753 = vmatpush.bf16.msrb.mxu1 %v7683_v40  ;;  %v7667_v35 = vor.u32 %v10164_v19, %v7666_v39  ;;  %v7740_v52 = vld [vmem:[%s15195_s4 + $0x358] sm:$0xf0]  ;;  %v7594_v38 = vld [vmem:[%s15195_s4 + $0x228] sm:$0xf] }
 0x250   : > { %2299 = vst.msk [vmem:[#allocation2 + $0x16] ss:$8 sm:$0x3] %vm12073_vm7, %v2296_v55  ;;  %2739 = vmatpush.bf16.msrb.mxu0 %v7555_v14  ;;  %2781 = vmatpush.bf16.msrb.mxu3 %v7687_v29  ;;  %v7631_v14 = vor.u32 %v10151_v54, %v7628_v22  ;;  %v7743_v8 = vor.u32 %v10179_v7, %v7740_v52  ;;  %v10145_v30 = vld [vmem:[%s15195_s4 + $0x234] sm:$0xf0] }
 0x251   : > { %2203 = vst.msk [vmem:[#allocation2 + $0x5] ss:$8 sm:$0x3] %vm12073_vm7, %v2200_v42  ;;  %v7626_v42 = vld [vmem:[%s15195_s4 + $0x268] sm:$0xf]  ;;  %v7595_v34 = vor.u32 %v10145_v30, %v7594_v38 }
 0x252   : > { %v7627_v55 = vor.u32 %v10153_v37, %v7626_v42  ;;  %v7722_v43 = vld [vmem:[%s15195_s4 + $0x328] sm:$0xf]  ;;  %v10177_v0 = vld [vmem:[%s15195_s4 + $0x334] sm:$0xf0]  ;;  %v10143_v50 = vld [vmem:[%s15195_s4 + $0x22c] sm:$0xf] }
 0x253   : > { %2818 = vmatpush.bf16.msrb.mxu2 %v7647_v10  ;;  %2754 = vmatpush.bf16.msrb.mxu1 %v7667_v35  ;;  %v7723_v23 = vor.u32 %v10177_v0, %v7722_v43  ;;  %v10175_v49 = vld [vmem:[%s15195_s4 + $0x32c] sm:$0xf]  ;;  %v7724_v51 = vld [vmem:[%s15195_s4 + $0x338] sm:$0xf0]  ;;  %v10141_v18 = vld [vmem:[%s15195_s4 + $0x214] sm:$0xf0] }
 0x254   : > { %2740 = vmatpush.bf16.msrb.mxu0 %v7539_v1  ;;  %2782 = vmatpush.bf16.msrb.mxu3 %v7671_v13  ;;  %v7727_v58 = vor.u32 %v10175_v49, %v7724_v51  ;;  %v7706_v27 = vld [vmem:[%s15195_s4 + $0x308] sm:$0xf]  ;;  %v10173_v31 = vld [vmem:[%s15195_s4 + $0x314] sm:$0xf0]  ;;  %v10139_v40 = vld [vmem:[%s15195_s4 + $0x20c] sm:$0xf] }
 0x255   : > { %v7707_v26 = vor.u32 %v10173_v31, %v7706_v27  ;;  %v10171_v6 = vld [vmem:[%s15195_s4 + $0x30c] sm:$0xf]  ;;  %v7708_v29 = vld [vmem:[%s15195_s4 + $0x318] sm:$0xf0]  ;;  %v7562_v41 = vld [vmem:[%s15195_s4 + $0x1e8] sm:$0xf] }
 0x256   : > { %v2224_v16 = vld [vmem:[#allocation1 + $0x2] ss:$9 sm:$0xff]  ;;  %v7711_v39 = vor.u32 %v10171_v6, %v7708_v29  ;;  %v10100_v27 = vld [vmem:[%s15195_s4 + $0xcc] sm:$0xf0] }
 0x257   : > { %2229 = vst [vmem:[#allocation1] sm:$0xff] %v12097_v33  ;;  %2805 = vmatpush.bf16.msra.mxu1 %v7755_v12  ;;  %2819 = vmatpush.bf16.msrb.mxu2 %v7631_v14  ;;  %v10137_v4 = vld [vmem:[%s15195_s4 + $0x1f4] sm:$0xf0]  ;;  %v7690_v10 = vld [vmem:[%s15195_s4 + $0x2e8] sm:$0xf] }
 0x258   : > { %2230 = vst [vmem:[#allocation1 + $0x9] sm:$0xff] %v12093_v2  ;;  %2789 = vmatpush.bf16.msra.mxu0 %v7659_v3  ;;  %2833 = vmatpush.bf16.msra.mxu3 %v7759_v44  ;;  %v7578_v3 = vld [vmem:[%s15195_s4 + $0x208] sm:$0xf]  ;;  %v10169_v19 = vld [vmem:[%s15195_s4 + $0x2f4] sm:$0xf0]  ;;  %v7563_v35 = vor.u32 %v10137_v4, %v7562_v41 }
 0x259   : > { %2227 = vst.msk [vmem:[#allocation2 + $0x7] ss:$8 sm:$0x3] %vm12073_vm7, %v2224_v16  ;;  %v7596_v16 = vld [vmem:[%s15195_s4 + $0x238] sm:$0xf0]  ;;  %v7579_v53 = vor.u32 %v10141_v18, %v7578_v3  ;;  %v7691_v42 = vor.u32 %v10169_v19, %v7690_v10 }
 0x25a   : > { %v7599_v59 = vor.u32 %v10143_v50, %v7596_v16  ;;  %v10135_v21 = vld [vmem:[%s15195_s4 + $0x1ec] sm:$0xf]  ;;  %v7564_v62 = vld [vmem:[%s15195_s4 + $0x1f8] sm:$0xf0]  ;;  %v7546_v13 = vld [vmem:[%s15195_s4 + $0x1c8] sm:$0xf] }
 0x25b   : > { %v10167_v37 = vld [vmem:[%s15195_s4 + $0x2ec] sm:$0xf]  ;;  %v7692_v36 = vld [vmem:[%s15195_s4 + $0x2f8] sm:$0xf0]  ;;  %v10133_v15 = vld [vmem:[%s15195_s4 + $0x1d4] sm:$0xf0] }
 0x25c   : > { %2790 = vmatpush.bf16.msra.mxu0 %v7643_v48  ;;  %2834 = vmatpush.bf16.msra.mxu3 %v7743_v8  ;;  %v7583_v48 = vor.u32 %v10139_v40, %v7580_v61  ;;  %v7674_v54 = vld [vmem:[%s15195_s4 + $0x2c8] sm:$0xf]  ;;  %v10165_v22 = vld [vmem:[%s15195_s4 + $0x2d4] sm:$0xf0]  ;;  %v10131_v12 = vld [vmem:[%s15195_s4 + $0x1cc] sm:$0xf]  ;;  %v7547_v20 = vor.u32 %v10133_v15, %v7546_v13 }
 0x25d   : > { %v7548_v14 = vld [vmem:[%s15195_s4 + $0x1d8] sm:$0xf0]  ;;  %v10163_v56 = vld [vmem:[%s15195_s4 + $0x2cc] sm:$0xf]  ;;  %v7675_v32 = vor.u32 %v10165_v22, %v7674_v54  ;;  %v10102_v30 = vld [vmem:[%s15195_s4 + $0xe4] sm:$0xf] }
 0x25e   : > { %v7676_v47 = vld [vmem:[%s15195_s4 + $0x2d8] sm:$0xf0]  ;;  %v7880_v43 = vld [vmem:[%s15195_s4 + $0xf0] sm:$0xf0]  ;;  %v7862_v18 = vld [vmem:[%s15195_s4 + $0xc0] sm:$0xf] }
 0x25f   : > { %v2232_v11 = vld [vmem:[#allocation1 + $0x4] ss:$9 sm:$0xff]  ;;  %v7883_v31 = vor.u32 %v10102_v30, %v7880_v43 }
 0x260   : > { %2237 = vst [vmem:[#allocation1] sm:$0xff] %v12097_v33  ;;  %2791 = vmatpush.bf16.msra.mxu0 %v7627_v55  ;;  %v10181_v33 = vld [vmem:[%s15195_s4 + $0x354] sm:$0xf0]  ;;  %2835 = vmatpush.bf16.msra.mxu3 %v7727_v58  ;;  %v7567_v55 = vor.u32 %v10135_v21, %v7564_v62  ;;  %v7958_v40 = vld [vmem:[%s15195_s4 + $0x180] sm:$0xf] }
 0x261   : > { %2238 = vst [vmem:[#allocation1 + $0x9] sm:$0xff] %v12093_v2  ;;  %v7739_v17 = vor.u32 %v10181_v33, %v7738_v57  ;;  %v10147_v2 = vld [vmem:[%s15195_s4 + $0x24c] sm:$0xf]  ;;  %v7679_v57 = vor.u32 %v10163_v56, %v7676_v47  ;;  %v10124_v61 = vld [vmem:[%s15195_s4 + $0x18c] sm:$0xf0] }
 0x262   : > { %2235 = vst.msk [vmem:[#allocation2 + $0x10] ss:$8 sm:$0x3] %vm12073_vm7, %v2232_v11  ;;  %v7615_v1 = vor.u32 %v10147_v2, %v7612_v25  ;;  %v7695_v11 = vor.u32 %v10167_v37, %v7692_v36  ;;  %v2372_v25 = vld [vmem:[#allocation2 + $0x8] sm:$0xfe]  ;;  %v7959_v41 = vor.u32 %v10124_v61, %v7958_v40 }
 0x263   : > { %2806 = vmatpush.bf16.msra.mxu1 %v7739_v17  ;;  %v2371_v17 = vld [vmem:[#allocation2] sm:$0xfe]  ;;  %v10122_v6 = vld [vmem:[%s15195_s4 + $0x184] sm:$0xf]  ;;  %v7960_v29 = vld [vmem:[%s15195_s4 + $0x190] sm:$0xf0] }
 0x264   : > { %2792 = vmatpush.bf16.msra.mxu0 %v7611_v45  ;;  %2820 = vmatpush.bf16.msrb.mxu2 %v7615_v1  ;;  %v7551_v45 = vor.u32 %v10131_v12, %v7548_v14  ;;  %v7846_v4 = vld [vmem:[%s15195_s4 + $0xa0] sm:$0xf]  ;;  %v7963_v21 = vor.u32 %v10122_v6, %v7960_v29  ;;  %v10120_v62 = vld [vmem:[%s15195_s4 + $0x16c] sm:$0xf0]  ;;  %v10118_v37 = vld [vmem:[%s15195_s4 + $0x164] sm:$0xf] }
 0x265   : > { %2836 = vmatpush.bf16.msra.mxu3 %v7711_v39  ;;  %v10096_v39 = vld [vmem:[%s15195_s4 + $0xac] sm:$0xf0]  ;;  %v7942_v10 = vld [vmem:[%s15195_s4 + $0x160] sm:$0xf]  ;;  %v7944_v36 = vld [vmem:[%s15195_s4 + $0x170] sm:$0xf0] }
 0x266   : > { %v7847_v15 = vor.u32 %v10096_v39, %v7846_v4  ;;  %v7943_v54 = vor.u32 %v10120_v62, %v7942_v10  ;;  %v10092_v22 = vld [vmem:[%s15195_s4 + $0x8c] sm:$0xf0]  ;;  %v7947_v56 = vor.u32 %v10118_v37, %v7944_v36  ;;  %v10090_v47 = vld [vmem:[%s15195_s4 + $0x84] sm:$0xf]  ;;  %v7784_v6 = vld [vmem:[%s15195_s4 + $0x30] sm:$0xf0] }
 0x267   : > { %2807 = vmatpush.bf16.msra.mxu1 %v7723_v23  ;;  %v10116_v12 = vld [vmem:[%s15195_s4 + $0x14c] sm:$0xf0]  ;;  %v7870_v29 = vld [vmem:[%s15195_s4 + $0xc8] sm:$0xf]  ;;  %v7872_v4 = vld [vmem:[%s15195_s4 + $0xd8] sm:$0xf0] }
 0x268   : > { %v2240_v5 = vld [vmem:[#allocation1 + $0x6] ss:$9 sm:$0xff]  ;;  %2793 = vmatpush.bf16.msra.mxu0 %v7595_v34  ;;  %2821 = vmatpush.bf16.msrb.mxu2 %v7599_v59  ;;  %v7976_v59 = vld [vmem:[%s15195_s4 + $0x1b0] sm:$0xf0] }
 0x269   : > { %2261 = vst [vmem:[#allocation1] sm:$0xff] %v12154_v46  ;;  %2837 = vmatpush.bf16.msra.mxu3 %v7695_v11  ;;  %v10126_v34 = vld [vmem:[%s15195_s4 + $0x1a4] sm:$0xf]  ;;  %v7926_v11 = vld [vmem:[%s15195_s4 + $0x140] sm:$0xf] }
 0x26a   : > { %2262 = vst [vmem:[#allocation1 + $0x9] sm:$0xff] %v12141_v63  ;;  %v10080_v40 = vld [vmem:[%s15195_s4 + $0x2c] sm:$0xf0]  ;;  %v7766_v10 = vld [vmem:[%s15195_s4] sm:$0xf] }
 0x26b   : > { %2243 = vst.msk [vmem:[#allocation2 + $0x11] ss:$8 sm:$0x3] %vm12073_vm7, %v2240_v5  ;;  %2808 = vmatpush.bf16.msra.mxu1 %v7707_v26  ;;  %v7979_v5 = vor.u32 %v10126_v34, %v7976_v59  ;;  %v7864_v26 = vld [vmem:[%s15195_s4 + $0xd0] sm:$0xf0] }
 0x26c   : > { %2794 = vmatpush.bf16.msra.mxu0 %v7579_v53  ;;  %2822 = vmatpush.bf16.msrb.mxu2 %v7583_v48  ;;  %v10098_v53 = vld [vmem:[%s15195_s4 + $0xc4] sm:$0xf]  ;;  %v7863_v48 = vor.u32 %v10100_v27, %v7862_v18  ;;  %v10108_v34 = vld [vmem:[%s15195_s4 + $0x10c] sm:$0xf0]  ;;  %v7886_v59 = vld [vmem:[%s15195_s4 + $0xe8] sm:$0xf] }
 0x26d   : > { %2838 = vmatpush.bf16.msra.mxu3 %v7679_v57  ;;  %v7867_v19 = vor.u32 %v10098_v53, %v7864_v26  ;;  %v7927_v57 = vor.u32 %v10116_v12, %v7926_v11  ;;  %v7888_v18 = vld [vmem:[%s15195_s4 + $0xf8] sm:$0xf0]  ;;  %v10078_v26 = vld [vmem:[%s15195_s4 + $0x24] sm:$0xf]  ;;  %v7854_v36 = vld [vmem:[%s15195_s4 + $0xa8] sm:$0xf] }
 0x26e   : > { %v10074_v62 = vld [vmem:[%s15195_s4 + $0x4] sm:$0xf]  ;;  %v10127_v12 = vld [vmem:[%s15195_s4 + $0x1ac] sm:$0xf] }
 0x26f   : > { %2809 = vmatpush.bf16.msra.mxu1 %v7691_v42  ;;  %v7848_v42 = vld [vmem:[%s15195_s4 + $0xb0] sm:$0xf0] }
 0x270   : > { %2795 = vmatpush.bf16.msra.mxu0 %v7563_v35  ;;  %2823 = vmatpush.bf16.msrb.mxu2 %v7567_v55  ;;  %v10094_v35 = vld [vmem:[%s15195_s4 + $0xa4] sm:$0xf]  ;;  %v7830_v55 = vld [vmem:[%s15195_s4 + $0x80] sm:$0xf] }
 0x271   : > { %v2264_v44 = vld [vmem:[#allocation1 + $0x2] ss:$9 sm:$0xff]  ;;  %v7851_v14 = vor.u32 %v10094_v35, %v7848_v42 }
 0x272   : > { %2269 = vst [vmem:[#allocation1] sm:$0xff] %v12154_v46  ;;  %v7768_v35 = vld [vmem:[%s15195_s4 + $0x10] sm:$0xf0] }
 0x273   : > { %2270 = vst [vmem:[#allocation1 + $0x9] sm:$0xff] %v12141_v63  ;;  %2810 = vmatpush.bf16.msra.mxu1 %v7675_v32  ;;  %v7928_v32 = vld [vmem:[%s15195_s4 + $0x150] sm:$0xf0] }
 0x274   : > { %2267 = vst.msk [vmem:[#allocation2 + $0x13] ss:$8 sm:$0x3] %vm12073_vm7, %v2264_v44  ;;  %2796 = vmatpush.bf16.msra.mxu0 %v7547_v20  ;;  %2824 = vmatpush.bf16.msrb.mxu2 %v7551_v45  ;;  %v7832_v44 = vld [vmem:[%s15195_s4 + $0x90] sm:$0xf0]  ;;  %v7831_v45 = vor.u32 %v10092_v22, %v7830_v55 }
 0x275   : > { %v10114_v20 = vld [vmem:[%s15195_s4 + $0x144] sm:$0xf]  ;;  %v10129_v55 = vld [vmem:[%s15195_s4 + $0x1b4] sm:$0xf0]  ;;  %v7856_v22 = vld [vmem:[%s15195_s4 + $0xb8] sm:$0xf0] }
 0x27a   : > { %v2272_v33 = vld [vmem:[#allocation1 + $0x4] ss:$9 sm:$0xff] }
 0x27b   : > { %2275 = vst.msk [vmem:[#allocation2 + $0x14] ss:$8 sm:$0x3] %vm12073_vm7, %v2272_v33  ;;  %v10088_v33 = vld [vmem:[%s15195_s4 + $0x6c] sm:$0xf0] }
 0x27c   : > { %2277 = vst [vmem:[#allocation1] sm:$0xff] %v12154_v46  ;;  %v7878_v46 = vld [vmem:[%s15195_s4 + $0xe0] sm:$0xf] }
 0x27d   : > { %2278 = vst [vmem:[#allocation1 + $0x9] sm:$0xff] %v12141_v63  ;;  %v10104_v63 = vld [vmem:[%s15195_s4 + $0xec] sm:$0xf0] }
 0x27e   : > { %v7879_v3 = vor.u32 %v10104_v63, %v7878_v46  ;;  %v7912_v46 = vld [vmem:[%s15195_s4 + $0x130] sm:$0xf0]  ;;  %v7815_v63 = vor.u32 %v10088_v33, %v7814_v60  ;;  %v7966_v60 = vld [vmem:[%s15195_s4 + $0x188] sm:$0xf]  ;;  %v10125_v33 = vld [vmem:[%s15195_s4 + $0x194] sm:$0xf0] }
 0x284   : > { %v2280_v24 = vld [vmem:[#allocation1 + $0x6] ss:$9 sm:$0xff] }
 0x285   : > { %2283 = vst.msk [vmem:[#allocation2 + $0x15] ss:$8 sm:$0x3] %vm12073_vm7, %v2280_v24  ;;  %v7835_v24 = vor.u32 %v10090_v47, %v7832_v44 }
 0x286   : > { %2301 = vst [vmem:[#allocation1] sm:$0xff] %v12203_v28  ;;  %v10128_v28 = vld [vmem:[%s15195_s4 + $0x1ac] sm:$0xf0] }
 0x287   : > { %2302 = vst [vmem:[#allocation1 + $0x9] sm:$0xff] %v12183_v9  ;;  %v7974_v9 = vld [vmem:[%s15195_s4 + $0x1a0] sm:$0xf] }
 0x288   : > { %v7975_v58 = vor.u32 %v10128_v28, %v7974_v9  ;;  %v10084_v9 = vld [vmem:[%s15195_s4 + $0x4c] sm:$0xf0]  ;;  %v7894_v28 = vld [vmem:[%s15195_s4 + $0x100] sm:$0xf] }
 0x28c   : > { %v2373_v2 = vld [vmem:[#allocation2 + $0x10] sm:$0x7f]  ;;  %v2374_v7 = vld [vmem:[#allocation2 + $0x18] sm:$0x7f] }
 0x28d   : > { %v2375_v52 = vpack.c.bf16 %v2373_v2, %v2371_v17  ;;  %v2376_v1 = vpack.c.bf16 %v2374_v7, %v2372_v25  ;;  %v7931_v17 = vor.u32 %v10114_v20, %v7928_v32  ;;  %v7910_v2 = vld [vmem:[%s15195_s4 + $0x120] sm:$0xf]  ;;  %v10112_v25 = vld [vmem:[%s15195_s4 + $0x12c] sm:$0xf0]  ;;  %v10086_v7 = vld [vmem:[%s15195_s4 + $0x64] sm:$0xf] }
 0x28e   : > { %v2304_v13 = vld [vmem:[#allocation1 + $0x2] ss:$9 sm:$0xff] }
 0x28f   : > { %v2437_v8 = vshll.u32 %v2375_v52, 16  ;;  %v2444_v38 = vshll.u32 %v2376_v1, 16  ;;  %v2435_v0 = vshrl.u32 %v2375_v52, 16  ;;  %v2442_v16 = vshrl.u32 %v2376_v1, 16  ;;  %v7816_v52 = vld [vmem:[%s15195_s4 + $0x70] sm:$0xf0] }
 0x290   : > { %2307 = vst.msk [vmem:[#allocation2 + $0x17] ss:$8 sm:$0x3] %vm12073_vm7, %v2304_v13  ;;  %v10110_v1 = vld [vmem:[%s15195_s4 + $0x124] sm:$0xf]  ;;  %v7819_v30 = vor.u32 %v10086_v7, %v7816_v52  ;;  %v2309_v7 = vld [vmem:[#allocation2] sm:$0xff] }
 0x291   : > { %v2439_v50 = vrot.slane %v2437_v8, 1  ;;  %v2446_v23 = vrot.slane %v2444_v38, 1  ;;  %v7911_v8 = vor.u32 %v10112_v25, %v7910_v2  ;;  %v7798_v38 = vld [vmem:[%s15195_s4 + $0x40] sm:$0xf]  ;;  %v7915_v43 = vor.u32 %v10110_v1, %v7912_v46  ;;  %v7982_v13 = vld [vmem:[%s15195_s4 + $0x1a8] sm:$0xf] }
 0x292   : > { %v7799_v27 = vor.u32 %v10084_v9, %v7798_v38  ;;  %v7983_v47 = vor.u32 %v10129_v55, %v7982_v13  ;;  %v2311_v44 = vld [vmem:[#allocation2 + $0x10] sm:$0x3f]  ;;  %v2312_v20 = vld [vmem:[#allocation2 + $0x18] sm:$0x3f]  ;;  %v10091_v2 = vld [vmem:[%s15195_s4 + $0x8c] sm:$0xf] }
 0x293   : > { %v12521_v49 = vor.u32 %v2439_v50, %v2435_v0  ;;  %v12523_v51 = vor.u32 %v2446_v23, %v2442_v16  ;;  %v10082_v0 = vld [vmem:[%s15195_s4 + $0x44] sm:$0xf]  ;;  %v7800_v50 = vld [vmem:[%s15195_s4 + $0x50] sm:$0xf0]  ;;  %v7840_v25 = vld [vmem:[%s15195_s4 + $0x98] sm:$0xf0]  ;;  %v12755_v46 = vpack.c.bf16 %v2311_v44, %v2309_v7 }
 0x294   : > { %v10106_v16 = vld [vmem:[%s15195_s4 + $0x104] sm:$0xf]  ;;  %v7896_v23 = vld [vmem:[%s15195_s4 + $0x110] sm:$0xf0]  ;;  %v10123_v52 = vld [vmem:[%s15195_s4 + $0x18c] sm:$0xf] }
 0x295   : > { %2741 = vmatmul.bf16.vlgmr.msrb.gmra.mxu0 %v12521_v49  ;;  %7760 = vmatmul.msk.bf16.vlgmr.msrb.gmra.mxu1 %vm2729_vm9, %v12523_v51  ;;  %v7968_v1 = vld [vmem:[%s15195_s4 + $0x198] sm:$0xf0]  ;;  %v7774_v13 = vld [vmem:[%s15195_s4 + $0x8] sm:$0xf]  ;;  %v10077_v55 = vld [vmem:[%s15195_s4 + $0x14] sm:$0xf0] }
 0x296   : > { %2769 = vmatmul.bf16.vlgmr.msra.gmra.mxu2 %v12521_v49  ;;  %7761 = vmatmul.msk.bf16.vlgmr.msrb.gmra.mxu3 %vm2729_vm9, %v12523_v51  ;;  %v7904_v44 = vld [vmem:[%s15195_s4 + $0x118] sm:$0xf0]  ;;  %v8260_v7 = vld [vmem:[%s15195_s4 + $0x530] sm:$0xf0] }
 0x297   : > { %3128 = vmatpush.bf16.msrb.mxu1 %v7879_v3  ;;  %3144 = vmatpush.bf16.msrb.mxu3 %v7975_v58  ;;  %v10105_v3 = vld [vmem:[%s15195_s4 + $0xf4] sm:$0xf0]  ;;  %v10103_v58 = vld [vmem:[%s15195_s4 + $0xec] sm:$0xf] }
 0x298   : > { %3156 = vmatpush.bf16.msrb.mxu0 %v7883_v31  ;;  %3172 = vmatpush.bf16.msra.mxu2 %v7979_v5  ;;  %v7895_v31 = vor.u32 %v10108_v34, %v7894_v28  ;;  %v7782_v5 = vld [vmem:[%s15195_s4 + $0x20] sm:$0xf]  ;;  %v7887_v61 = vor.u32 %v10105_v3, %v7886_v59  ;;  %v7891_v53 = vor.u32 %v10103_v58, %v7888_v18  ;;  %v10121_v34 = vld [vmem:[%s15195_s4 + $0x174] sm:$0xf0]  ;;  %v10119_v59 = vld [vmem:[%s15195_s4 + $0x16c] sm:$0xf] }
 0x299   : > { %v7783_v39 = vor.u32 %v10080_v40, %v7782_v5  ;;  %v7843_v28 = vor.u32 %v10091_v2, %v7840_v25  ;;  %v7952_v3 = vld [vmem:[%s15195_s4 + $0x178] sm:$0xf0]  ;;  %v10085_v40 = vld [vmem:[%s15195_s4 + $0x54] sm:$0xf0]  ;;  %v10238_v25 = vld [vmem:[%s15195_s4 + $0x524] sm:$0xf] }
 0x29a   : > { %v7955_v5 = vor.u32 %v10119_v59, %v7952_v3 }
 0x29b   : > { %3129 = vmatpush.bf16.msrb.mxu1 %v7863_v48  ;;  %3145 = vmatpush.bf16.msrb.mxu3 %v7959_v41  ;;  %v10101_v48 = vld [vmem:[%s15195_s4 + $0xd4] sm:$0xf0]  ;;  %v10099_v41 = vld [vmem:[%s15195_s4 + $0xcc] sm:$0xf] }
 0x29c   : > { %3157 = vmatpush.bf16.msrb.mxu0 %v7867_v19  ;;  %3173 = vmatpush.bf16.msra.mxu2 %v7963_v21  ;;  %v7787_v19 = vor.u32 %v10078_v26, %v7784_v6  ;;  %v10076_v21 = vld [vmem:[%s15195_s4 + $0xc] sm:$0xf0]  ;;  %v7871_v42 = vor.u32 %v10101_v48, %v7870_v29  ;;  %v7875_v37 = vor.u32 %v10099_v41, %v7872_v4  ;;  %v10115_v26 = vld [vmem:[%s15195_s4 + $0x14c] sm:$0xf]  ;;  %v7936_v6 = vld [vmem:[%s15195_s4 + $0x158] sm:$0xf0] }
 0x29d   : > { %v7767_v11 = vor.u32 %v10076_v21, %v7766_v10  ;;  %v7790_v4 = vld [vmem:[%s15195_s4 + $0x28] sm:$0xf]  ;;  %v10113_v10 = vld [vmem:[%s15195_s4 + $0x134] sm:$0xf0] }
 0x29e   : > { %v10081_v21 = vld [vmem:[%s15195_s4 + $0x34] sm:$0xf0] }
 0x29f   : > { %3130 = vmatpush.bf16.msrb.mxu1 %v7847_v15  ;;  %3146 = vmatpush.bf16.msrb.mxu3 %v7943_v54  ;;  %v10097_v15 = vld [vmem:[%s15195_s4 + $0xb4] sm:$0xf0]  ;;  %v10095_v54 = vld [vmem:[%s15195_s4 + $0xac] sm:$0xf] }
 0x2a0   : > { %3158 = vmatpush.bf16.msrb.mxu0 %v7851_v14  ;;  %3174 = vmatpush.bf16.msra.mxu2 %v7947_v56  ;;  %v7984_v14 = vld [vmem:[%s15195_s4 + $0x1b8] sm:$0xf0]  ;;  %v7771_v56 = vor.u32 %v10074_v62, %v7768_v35  ;;  %v7855_v32 = vor.u32 %v10097_v15, %v7854_v36  ;;  %v10079_v62 = vld [vmem:[%s15195_s4 + $0x2c] sm:$0xf]  ;;  %v7791_v15 = vor.u32 %v10081_v21, %v7790_v4  ;;  %v10228_v4 = vld [vmem:[%s15195_s4 + $0x4cc] sm:$0xf0] }
 0x2a1   : > { %v7792_v35 = vld [vmem:[%s15195_s4 + $0x38] sm:$0xf0]  ;;  %v8212_v21 = vld [vmem:[%s15195_s4 + $0x4d0] sm:$0xf0] }
 0x2a3   : > { %3131 = vmatpush.bf16.msrb.mxu1 %v7831_v45  ;;  %3147 = vmatpush.bf16.msrb.mxu3 %v7927_v57  ;;  %v7859_v45 = vor.u32 %v10095_v54, %v7856_v22  ;;  %v7838_v57 = vld [vmem:[%s15195_s4 + $0x88] sm:$0xf]  ;;  %v7795_v54 = vor.u32 %v10079_v62, %v7792_v35 }
 0x2a4   : > { %3159 = vmatpush.bf16.msrb.mxu0 %v7835_v24  ;;  %3175 = vmatpush.bf16.msra.mxu2 %v7931_v17  ;;  %v7987_v24 = vor.u32 %v10127_v12, %v7984_v14  ;;  %v10093_v17 = vld [vmem:[%s15195_s4 + $0x94] sm:$0xf0]  ;;  %v7902_v22 = vld [vmem:[%s15195_s4 + $0x108] sm:$0xf]  ;;  %v10075_v12 = vld [vmem:[%s15195_s4 + $0xc] sm:$0xf] }
 0x2a5   : > { %2797 = vmatmul.bf16.vlgmr.msra.gmra.mxu0 %v12521_v49  ;;  %7762 = vmatmul.msk.bf16.vlgmr.msra.gmra.mxu1 %vm2729_vm9, %v12523_v51  ;;  %v7839_v9 = vor.u32 %v10093_v17, %v7838_v57  ;;  %v7775_v17 = vor.u32 %v10077_v55, %v7774_v13  ;;  %v8194_v13 = vld [vmem:[%s15195_s4 + $0x4a0] sm:$0xf] }
 0x2a6   : > { %2825 = vmatmul.bf16.vlgmr.msrb.gmra.mxu2 %v12521_v49  ;;  %7763 = vmatmul.msk.bf16.vlgmr.msra.gmra.mxu3 %vm2729_vm9, %v12523_v51  ;;  %v7803_v49 = vor.u32 %v10082_v0, %v7800_v50  ;;  %v7899_v51 = vor.u32 %v10106_v16, %v7896_v23  ;;  %v7971_v0 = vor.u32 %v10123_v52, %v7968_v1  ;;  %v10089_v50 = vld [vmem:[%s15195_s4 + $0x74] sm:$0xf0]  ;;  %v10087_v16 = vld [vmem:[%s15195_s4 + $0x6c] sm:$0xf]  ;;  %v7824_v23 = vld [vmem:[%s15195_s4 + $0x78] sm:$0xf0] }
 0x2a7   : > { %3132 = vmatpush.bf16.msrb.mxu1 %v7815_v63  ;;  %3148 = vmatpush.bf16.msrb.mxu3 %v7911_v8  ;;  %v2310_v63 = vld [vmem:[#allocation2 + $0x8] sm:$0xff]  ;;  %v7967_v8 = vor.u32 %v10125_v33, %v7966_v60  ;;  %v10214_v33 = vld [vmem:[%s15195_s4 + $0x464] sm:$0xf] }
 0x2a8   : > { %3160 = vmatpush.bf16.msrb.mxu0 %v7819_v30  ;;  %3176 = vmatpush.bf16.msra.mxu2 %v7915_v43  ;;  %v12757_v38 = vpack.c.bf16 %v2312_v20, %v2310_v63  ;;  %v7822_v30 = vld [vmem:[%s15195_s4 + $0x68] sm:$0xf]  ;;  %v8162_v20 = vld [vmem:[%s15195_s4 + $0x460] sm:$0xf]  ;;  %v10240_v60 = vld [vmem:[%s15195_s4 + $0x52c] sm:$0xf0] }
 0x2a9   : > { %v7950_v43 = vld [vmem:[%s15195_s4 + $0x168] sm:$0xf]  ;;  %v7823_v18 = vor.u32 %v10089_v50, %v7822_v30  ;;  %v8242_v30 = vld [vmem:[%s15195_s4 + $0x500] sm:$0xf]  ;;  %v8148_v50 = vld [vmem:[%s15195_s4 + $0x450] sm:$0xf0] }
 0x2aa   : > { %v7951_v58 = vor.u32 %v10121_v34, %v7950_v43  ;;  %v8263_v43 = vor.u32 %v10238_v25, %v8260_v7  ;;  %v10236_v34 = vld [vmem:[%s15195_s4 + $0x50c] sm:$0xf0]  ;;  %v8180_v25 = vld [vmem:[%s15195_s4 + $0x490] sm:$0xf0]  ;;  %v8170_v7 = vld [vmem:[%s15195_s4 + $0x468] sm:$0xf] }
 0x2ab   : > { %3133 = vmatpush.bf16.msrb.mxu1 %v7799_v27  ;;  %3149 = vmatpush.bf16.msrb.mxu3 %v7895_v31  ;;  %v7827_v27 = vor.u32 %v10087_v16, %v7824_v23  ;;  %v7806_v31 = vld [vmem:[%s15195_s4 + $0x48] sm:$0xf]  ;;  %v10234_v16 = vld [vmem:[%s15195_s4 + $0x504] sm:$0xf]  ;;  %v8244_v23 = vld [vmem:[%s15195_s4 + $0x510] sm:$0xf0]  ;;  %v8243_v3 = vor.u32 %v10236_v34, %v8242_v30 }
 0x2ac   : > { %3161 = vmatpush.bf16.msrb.mxu0 %v7803_v49  ;;  %3177 = vmatpush.bf16.msra.mxu2 %v7899_v51  ;;  %v7934_v49 = vld [vmem:[%s15195_s4 + $0x148] sm:$0xf]  ;;  %v10117_v51 = vld [vmem:[%s15195_s4 + $0x154] sm:$0xf0]  ;;  %v7807_v48 = vor.u32 %v10085_v40, %v7806_v31  ;;  %v8226_v31 = vld [vmem:[%s15195_s4 + $0x4e0] sm:$0xf] }
 0x2ad   : > { %v7935_v29 = vor.u32 %v10117_v51, %v7934_v49  ;;  %v8247_v49 = vor.u32 %v10234_v16, %v8244_v23  ;;  %v10232_v51 = vld [vmem:[%s15195_s4 + $0x4ec] sm:$0xf0]  ;;  %v8132_v40 = vld [vmem:[%s15195_s4 + $0x430] sm:$0xf0]  ;;  %v10190_v16 = vld [vmem:[%s15195_s4 + $0x3a4] sm:$0xf] }
 0x2ae   : > { %v10192_v34 = vld [vmem:[%s15195_s4 + $0x3ac] sm:$0xf0]  ;;  %v8068_v23 = vld [vmem:[%s15195_s4 + $0x3b0] sm:$0xf0] }
 0x2af   : > { %3184 = vmatpush.bf16.msra.mxu3 %v7887_v61  ;;  %3134 = vmatpush.bf16.msrb.mxu1 %v7783_v39  ;;  %v10083_v61 = vld [vmem:[%s15195_s4 + $0x4c] sm:$0xf]  ;;  %v7918_v39 = vld [vmem:[%s15195_s4 + $0x128] sm:$0xf] }
 0x2b0   : > { %3212 = vmatpush.bf16.msrb.mxu2 %v7891_v53  ;;  %3162 = vmatpush.bf16.msrb.mxu0 %v7787_v19  ;;  %v7808_v53 = vld [vmem:[%s15195_s4 + $0x58] sm:$0xf0]  ;;  %v7939_v19 = vor.u32 %v10115_v26, %v7936_v6  ;;  %v7919_v36 = vor.u32 %v10113_v10, %v7918_v39  ;;  %v8227_v6 = vor.u32 %v10232_v51, %v8226_v31  ;;  %v10202_v39 = vld [vmem:[%s15195_s4 + $0x404] sm:$0xf]  ;;  %v8116_v10 = vld [vmem:[%s15195_s4 + $0x410] sm:$0xf0] }
 0x2b1   : > { %v7811_v41 = vor.u32 %v10083_v61, %v7808_v53  ;;  %v10230_v61 = vld [vmem:[%s15195_s4 + $0x4e4] sm:$0xf]  ;;  %v8228_v53 = vld [vmem:[%s15195_s4 + $0x4f0] sm:$0xf0]  ;;  %v10211_v31 = vld [vmem:[%s15195_s4 + $0x44c] sm:$0xf] }
 0x2b2   : > { %v8050_v51 = vld [vmem:[%s15195_s4 + $0x380] sm:$0xf] }
 0x2b3   : > { %3185 = vmatpush.bf16.msra.mxu3 %v7871_v42  ;;  %3135 = vmatpush.bf16.msrb.mxu1 %v7767_v11  ;;  %v10111_v42 = vld [vmem:[%s15195_s4 + $0x12c] sm:$0xf]  ;;  %v10109_v11 = vld [vmem:[%s15195_s4 + $0x114] sm:$0xf0] }
 0x2b4   : > { %3213 = vmatpush.bf16.msrb.mxu2 %v7875_v37  ;;  %3163 = vmatpush.bf16.msrb.mxu0 %v7771_v56  ;;  %v7920_v37 = vld [vmem:[%s15195_s4 + $0x138] sm:$0xf0]  ;;  %v7903_v57 = vor.u32 %v10109_v11, %v7902_v22  ;;  %v8100_v22 = vld [vmem:[%s15195_s4 + $0x3f0] sm:$0xf0]  ;;  %v10222_v11 = vld [vmem:[%s15195_s4 + $0x4a4] sm:$0xf] }
 0x2b5   : > { %v7923_v14 = vor.u32 %v10111_v42, %v7920_v37  ;;  %v7776_v56 = vld [vmem:[%s15195_s4 + $0x18] sm:$0xf0]  ;;  %v8119_v42 = vor.u32 %v10202_v39, %v8116_v10  ;;  %v8098_v37 = vld [vmem:[%s15195_s4 + $0x3e0] sm:$0xf] }
 0x2b6   : > { %3136 = vmatmul.bf16.vlgmr.msrb.gmra.mxu1 %v12755_v46  ;;  %7988 = vmatmul.msk.bf16.vlgmr.msrb.gmra.mxu3 %vm2729_vm9, %v12757_v38  ;;  %v7779_v2 = vor.u32 %v10075_v12, %v7776_v56  ;;  %v8196_v12 = vld [vmem:[%s15195_s4 + $0x4b0] sm:$0xf0]  ;;  %v8082_v56 = vld [vmem:[%s15195_s4 + $0x3c0] sm:$0xf]  ;;  %v8268_v39 = vld [vmem:[%s15195_s4 + $0x538] sm:$0xf0] }
 0x2b7   : > { %3200 = vmatpush.bf16.msra.mxu1 %v7983_v47  ;;  %3186 = vmatpush.bf16.msra.mxu3 %v7855_v32  ;;  %v10107_v47 = vld [vmem:[%s15195_s4 + $0x10c] sm:$0xf]  ;;  %v10216_v32 = vld [vmem:[%s15195_s4 + $0x46c] sm:$0xf0] }
 0x2b8   : > { %3214 = vmatpush.bf16.msrb.mxu2 %v7859_v45  ;;  %3228 = vmatpush.bf16.msra.mxu0 %v7987_v24  ;;  %v8258_v45 = vld [vmem:[%s15195_s4 + $0x520] sm:$0xf]  ;;  %v8164_v24 = vld [vmem:[%s15195_s4 + $0x470] sm:$0xf0]  ;;  %v7907_v52 = vor.u32 %v10107_v47, %v7904_v44  ;;  %v8163_v1 = vor.u32 %v10216_v32, %v8162_v20 }
 0x2b9   : > { %3164 = vmatmul.bf16.vlgmr.msrb.gmra.mxu0 %v12755_v46  ;;  %7989 = vmatmul.msk.bf16.vlgmr.msra.gmra.mxu2 %vm2729_vm9, %v12757_v38  ;;  %v8259_v63 = vor.u32 %v10240_v60, %v8258_v45  ;;  %v3241_v47 = vld [vmem:[#allocation2 + $0x8] sm:$0xfc]  ;;  %v12990_v44 = vld [vmem:[#allocation2 + $0x18] sm:$0xff] }
 0x2ba   : > { %v10196_v45 = vld [vmem:[%s15195_s4 + $0x3cc] sm:$0xf0] }
 0x2bb   : > { %3201 = vmatpush.bf16.msra.mxu1 %v7967_v8  ;;  %3187 = vmatpush.bf16.msra.mxu3 %v7839_v9  ;;  %v8167_v8 = vor.u32 %v10214_v33, %v8164_v24  ;;  %v8146_v9 = vld [vmem:[%s15195_s4 + $0x440] sm:$0xf]  ;;  %v10220_v60 = vld [vmem:[%s15195_s4 + $0x48c] sm:$0xf0]  ;;  %v8199_v33 = vor.u32 %v10222_v11, %v8196_v12  ;;  %v10194_v24 = vld [vmem:[%s15195_s4 + $0x3c4] sm:$0xf] }
 0x2bc   : > { %3215 = vmatpush.bf16.msrb.mxu2 %v7843_v28  ;;  %3229 = vmatpush.bf16.msra.mxu0 %v7971_v0  ;;  %v10212_v28 = vld [vmem:[%s15195_s4 + $0x44c] sm:$0xf0]  ;;  %v10210_v0 = vld [vmem:[%s15195_s4 + $0x444] sm:$0xf]  ;;  %v10205_v11 = vld [vmem:[%s15195_s4 + $0x414] sm:$0xf0] }
 0x2bd   : > { %v8147_v59 = vor.u32 %v10212_v28, %v8146_v9  ;;  %v8172_v9 = vld [vmem:[%s15195_s4 + $0x478] sm:$0xf0]  ;;  %v10235_v12 = vld [vmem:[%s15195_s4 + $0x50c] sm:$0xf] }
 0x2bf   : > { %3202 = vmatpush.bf16.msra.mxu1 %v7951_v58  ;;  %3188 = vmatpush.bf16.msra.mxu3 %v7823_v18  ;;  %v8151_v58 = vor.u32 %v10210_v0, %v8148_v50  ;;  %v8130_v18 = vld [vmem:[%s15195_s4 + $0x420] sm:$0xf] }
 0x2c0   : > { %3216 = vmatpush.bf16.msrb.mxu2 %v7827_v27  ;;  %3230 = vmatpush.bf16.msra.mxu0 %v7955_v5  ;;  %v10208_v27 = vld [vmem:[%s15195_s4 + $0x42c] sm:$0xf0]  ;;  %v10206_v5 = vld [vmem:[%s15195_s4 + $0x424] sm:$0xf] }
 0x2c1   : > { %v8131_v26 = vor.u32 %v10208_v27, %v8130_v18  ;;  %v10213_v18 = vld [vmem:[%s15195_s4 + $0x454] sm:$0xf0] }
 0x2c3   : > { %3203 = vmatpush.bf16.msra.mxu1 %v7935_v29  ;;  %3189 = vmatpush.bf16.msra.mxu3 %v7807_v48  ;;  %v8135_v29 = vor.u32 %v10206_v5, %v8132_v40  ;;  %v10204_v48 = vld [vmem:[%s15195_s4 + $0x40c] sm:$0xf0]  ;;  %v13055_v5 = vld [vmem:[#allocation2 + $0x10] sm:$0xff]  ;;  %v8071_v40 = vor.u32 %v10190_v16, %v8068_v23  ;;  %v10195_v23 = vld [vmem:[%s15195_s4 + $0x3cc] sm:$0xf] }
 0x2c4   : > { %3217 = vmatpush.bf16.msrb.mxu2 %v7811_v41  ;;  %3231 = vmatpush.bf16.msra.mxu0 %v7939_v19  ;;  %v8210_v41 = vld [vmem:[%s15195_s4 + $0x4c0] sm:$0xf]  ;;  %v10226_v19 = vld [vmem:[%s15195_s4 + $0x4c4] sm:$0xf]  ;;  %v8220_v16 = vld [vmem:[%s15195_s4 + $0x4d8] sm:$0xf0] }
 0x2c5   : > { %v8211_v35 = vor.u32 %v10228_v4, %v8210_v41  ;;  %v8215_v55 = vor.u32 %v10226_v19, %v8212_v21  ;;  %v10239_v4 = vld [vmem:[%s15195_s4 + $0x52c] sm:$0xf]  ;;  %v8140_v21 = vld [vmem:[%s15195_s4 + $0x438] sm:$0xf0] }
 0x2c6   : > { %v10207_v19 = vld [vmem:[%s15195_s4 + $0x42c] sm:$0xf] }
 0x2c7   : > { %3204 = vmatpush.bf16.msra.mxu1 %v7919_v36  ;;  %3190 = vmatpush.bf16.msra.mxu3 %v7791_v15  ;;  %v10200_v36 = vld [vmem:[%s15195_s4 + $0x3ec] sm:$0xf0] }
 0x2c8   : > { %3218 = vmatpush.bf16.msrb.mxu2 %v7795_v54  ;;  %3232 = vmatpush.bf16.msra.mxu0 %v7923_v14  ;;  %v10224_v15 = vld [vmem:[%s15195_s4 + $0x4ac] sm:$0xf0]  ;;  %v10198_v54 = vld [vmem:[%s15195_s4 + $0x3e4] sm:$0xf]  ;;  %v8099_v14 = vor.u32 %v10200_v36, %v8098_v37 }
 0x2c9   : > { %v8195_v20 = vor.u32 %v10224_v15, %v8194_v13  ;;  %v8103_v32 = vor.u32 %v10198_v54, %v8100_v22  ;;  %v8271_v13 = vor.u32 %v10239_v4, %v8268_v39  ;;  %v8250_v15 = vld [vmem:[%s15195_s4 + $0x508] sm:$0xf]  ;;  %v10237_v54 = vld [vmem:[%s15195_s4 + $0x514] sm:$0xf0]  ;;  %v8143_v22 = vor.u32 %v10207_v19, %v8140_v21  ;;  %v10187_v19 = vld [vmem:[%s15195_s4 + $0x38c] sm:$0xf] }
 0x2ca   : > { %v8186_v39 = vld [vmem:[%s15195_s4 + $0x488] sm:$0xf] }
 0x2cb   : > { %3205 = vmatpush.bf16.msra.mxu1 %v7903_v57  ;;  %3191 = vmatpush.bf16.msra.mxu3 %v7775_v17  ;;  %v8178_v57 = vld [vmem:[%s15195_s4 + $0x480] sm:$0xf]  ;;  %v8084_v17 = vld [vmem:[%s15195_s4 + $0x3d0] sm:$0xf0] }
 0x2cc   : > { %3219 = vmatpush.bf16.msrb.mxu2 %v7779_v2  ;;  %3233 = vmatpush.bf16.msra.mxu0 %v7907_v52  ;;  %v10218_v2 = vld [vmem:[%s15195_s4 + $0x484] sm:$0xf]  ;;  %v10217_v52 = vld [vmem:[%s15195_s4 + $0x474] sm:$0xf0]  ;;  %v8179_v28 = vor.u32 %v10220_v60, %v8178_v57  ;;  %v8087_v30 = vor.u32 %v10194_v24, %v8084_v17  ;;  %v8106_v60 = vld [vmem:[%s15195_s4 + $0x3e8] sm:$0xf] }
 0x2cd   : > { %v8183_v0 = vor.u32 %v10218_v2, %v8180_v25  ;;  %v8171_v50 = vor.u32 %v10217_v52, %v8170_v7  ;;  %v10233_v24 = vld [vmem:[%s15195_s4 + $0x4f4] sm:$0xf0]  ;;  %v10231_v25 = vld [vmem:[%s15195_s4 + $0x4ec] sm:$0xf]  ;;  %v8236_v7 = vld [vmem:[%s15195_s4 + $0x4f8] sm:$0xf0] }
 0x2ce   : > { %3192 = vmatmul.bf16.vlgmr.msra.gmra.mxu3 %v12755_v46  ;;  %7990 = vmatmul.msk.bf16.vlgmr.msra.gmra.mxu1 %vm2729_vm9, %v12757_v38  ;;  %v10201_v2 = vld [vmem:[%s15195_s4 + $0x3f4] sm:$0xf0]  ;;  %v10199_v52 = vld [vmem:[%s15195_s4 + $0x3ec] sm:$0xf] }
 0x2cf   : > { %3591 = vmatpush.bf16.msrb.mxu1 %v8163_v1  ;;  %3607 = vmatpush.bf16.msrb.mxu3 %v8259_v63  ;;  %v3245_v1 = vpack.c.bf16 %v12990_v44, %v3241_v47  ;;  %v8083_v63 = vor.u32 %v10196_v45, %v8082_v56  ;;  %v10203_v56 = vld [vmem:[%s15195_s4 + $0x40c] sm:$0xf]  ;;  %v8124_v47 = vld [vmem:[%s15195_s4 + $0x418] sm:$0xf0] }
 0x2d0   : > { %3619 = vmatpush.bf16.msrb.mxu0 %v8167_v8  ;;  %3635 = vmatpush.bf16.msra.mxu2 %v8263_v43  ;;  %v10215_v8 = vld [vmem:[%s15195_s4 + $0x46c] sm:$0xf]  ;;  %v8066_v43 = vld [vmem:[%s15195_s4 + $0x3a0] sm:$0xf]  ;;  %v8127_v17 = vor.u32 %v10203_v56, %v8124_v47  ;;  %v8544_v56 = vld [vmem:[%s15195_s4 + $0x6f0] sm:$0xf0] }
 0x2d1   : > { %3220 = vmatmul.bf16.vlgmr.msrb.gmra.mxu2 %v12755_v46  ;;  %7991 = vmatmul.msk.bf16.vlgmr.msra.gmra.mxu0 %vm2729_vm9, %v12757_v38  ;;  %v8114_v46 = vld [vmem:[%s15195_s4 + $0x400] sm:$0xf]  ;;  %v8231_v38 = vor.u32 %v10230_v61, %v8228_v53  ;;  %v8067_v27 = vor.u32 %v10192_v34, %v8066_v43  ;;  %v10188_v61 = vld [vmem:[%s15195_s4 + $0x38c] sm:$0xf0]  ;;  %v10186_v53 = vld [vmem:[%s15195_s4 + $0x384] sm:$0xf] }
 0x2d2   : > { %v8115_v62 = vor.u32 %v10204_v48, %v8114_v46  ;;  %v8266_v46 = vld [vmem:[%s15195_s4 + $0x528] sm:$0xf]  ;;  %v10241_v48 = vld [vmem:[%s15195_s4 + $0x534] sm:$0xf0]  ;;  %v8051_v10 = vor.u32 %v10188_v61, %v8050_v51 }
 0x2d3   : > { %3592 = vmatpush.bf16.msrb.mxu1 %v8147_v59  ;;  %3608 = vmatpush.bf16.msrb.mxu3 %v8243_v3  ;;  %v8175_v59 = vor.u32 %v10215_v8, %v8172_v9  ;;  %v13038_v3 = vrot.slane %v3245_v1, 1  ;;  %v8108_v1 = vld [vmem:[%s15195_s4 + $0x3f8] sm:$0xf0]  ;;  %v8107_v8 = vor.u32 %v10201_v2, %v8106_v60  ;;  %v8239_v9 = vor.u32 %v10231_v25, %v8236_v7  ;;  %v10229_v43 = vld [vmem:[%s15195_s4 + $0x4d4] sm:$0xf0] }
 0x2d4   : > { %3620 = vmatpush.bf16.msrb.mxu0 %v8151_v58  ;;  %3636 = vmatpush.bf16.msra.mxu2 %v8247_v49  ;;  %v8154_v58 = vld [vmem:[%s15195_s4 + $0x448] sm:$0xf]  ;;  %v8156_v49 = vld [vmem:[%s15195_s4 + $0x458] sm:$0xf0]  ;;  %v8111_v34 = vor.u32 %v10199_v52, %v8108_v1  ;;  %v10225_v51 = vld [vmem:[%s15195_s4 + $0x4b4] sm:$0xf0] }
 0x2d5   : > { %v8159_v41 = vor.u32 %v10211_v31, %v8156_v49  ;;  %v8074_v31 = vld [vmem:[%s15195_s4 + $0x3a8] sm:$0xf]  ;;  %v10193_v61 = vld [vmem:[%s15195_s4 + $0x3b4] sm:$0xf0]  ;;  %v8430_v60 = vld [vmem:[%s15195_s4 + $0x600] sm:$0xf] }
 0x2d6   : > { %v8202_v49 = vld [vmem:[%s15195_s4 + $0x4a8] sm:$0xf]  ;;  %v10292_v2 = vld [vmem:[%s15195_s4 + $0x6cc] sm:$0xf0]  ;;  %v10266_v25 = vld [vmem:[%s15195_s4 + $0x604] sm:$0xf] }
 0x2d7   : > { %3593 = vmatpush.bf16.msrb.mxu1 %v8131_v26  ;;  %3609 = vmatpush.bf16.msrb.mxu3 %v8227_v6  ;;  %v8052_v26 = vld [vmem:[%s15195_s4 + $0x390] sm:$0xf0]  ;;  %v8155_v6 = vor.u32 %v10213_v18, %v8154_v58  ;;  %v10290_v52 = vld [vmem:[%s15195_s4 + $0x6c4] sm:$0xf] }
 0x2d8   : > { %3621 = vmatpush.bf16.msrb.mxu0 %v8135_v29  ;;  %3637 = vmatpush.bf16.msra.mxu2 %v8231_v38  ;;  %v8138_v29 = vld [vmem:[%s15195_s4 + $0x428] sm:$0xf]  ;;  %v10209_v38 = vld [vmem:[%s15195_s4 + $0x434] sm:$0xf0]  ;;  %v8432_v7 = vld [vmem:[%s15195_s4 + $0x610] sm:$0xf0] }
 0x2d9   : > { %v8139_v36 = vor.u32 %v10209_v38, %v8138_v29  ;;  %v8076_v29 = vld [vmem:[%s15195_s4 + $0x3b8] sm:$0xf0]  ;;  %v8075_v38 = vor.u32 %v10193_v61, %v8074_v31  ;;  %v8528_v1 = vld [vmem:[%s15195_s4 + $0x6d0] sm:$0xf0]  ;;  %v10260_v61 = vld [vmem:[%s15195_s4 + $0x5cc] sm:$0xf0] }
 0x2db   : > { %3594 = vmatpush.bf16.msrb.mxu1 %v8115_v62  ;;  %3610 = vmatpush.bf16.msrb.mxu3 %v8211_v35  ;;  %v3240_v62 = vld [vmem:[#allocation2] sm:$0xfc]  ;;  %v8055_v35 = vor.u32 %v10186_v53, %v8052_v26  ;;  %v8204_v26 = vld [vmem:[%s15195_s4 + $0x4b8] sm:$0xf0] }
 0x2dc   : > { %3622 = vmatpush.bf16.msrb.mxu0 %v8119_v42  ;;  %3638 = vmatpush.bf16.msra.mxu2 %v8215_v55  ;;  %v8267_v42 = vor.u32 %v10241_v48, %v8266_v46  ;;  %v3244_v37 = vpack.c.bf16 %v13055_v5, %v3240_v62  ;;  %v8122_v55 = vld [vmem:[%s15195_s4 + $0x408] sm:$0xf]  ;;  %v10223_v53 = vld [vmem:[%s15195_s4 + $0x4ac] sm:$0xf]  ;;  %v8203_v46 = vor.u32 %v10225_v51, %v8202_v49  ;;  %v8060_v62 = vld [vmem:[%s15195_s4 + $0x398] sm:$0xf0] }
 0x2dd   : > { %v8123_v45 = vor.u32 %v10205_v11, %v8122_v55  ;;  %v8058_v48 = vld [vmem:[%s15195_s4 + $0x388] sm:$0xf]  ;;  %v8207_v4 = vor.u32 %v10223_v53, %v8204_v26  ;;  %v8063_v47 = vor.u32 %v10187_v19, %v8060_v62  ;;  %v10258_v26 = vld [vmem:[%s15195_s4 + $0x5c4] sm:$0xf]  ;;  %v10256_v62 = vld [vmem:[%s15195_s4 + $0x5ac] sm:$0xf0] }
 0x2de   : > { %v3711_v49 = vld [vmem:[#allocation2] sm:$0xf8] }
 0x2df   : > { %3595 = vmatpush.bf16.msrb.mxu1 %v8099_v14  ;;  %3611 = vmatpush.bf16.msrb.mxu3 %v8195_v20  ;;  %v8252_v14 = vld [vmem:[%s15195_s4 + $0x518] sm:$0xf0]  ;;  %v13119_v20 = vrot.slane %v3244_v37, 1  ;;  %v8446_v37 = vld [vmem:[%s15195_s4 + $0x620] sm:$0xf] }
 0x2e0   : > { %3623 = vmatpush.bf16.msrb.mxu0 %v8103_v32  ;;  %3639 = vmatpush.bf16.msra.mxu2 %v8199_v33  ;;  %v8251_v32 = vor.u32 %v10237_v54, %v8250_v15  ;;  %v8255_v57 = vor.u32 %v10235_v12, %v8252_v14  ;;  %v8234_v33 = vld [vmem:[%s15195_s4 + $0x4e8] sm:$0xf]  ;;  %v10296_v15 = vld [vmem:[%s15195_s4 + $0x6ec] sm:$0xf0]  ;;  %v10270_v54 = vld [vmem:[%s15195_s4 + $0x624] sm:$0xf] }
 0x2e1   : > { %v10294_v14 = vld [vmem:[%s15195_s4 + $0x6e4] sm:$0xf] }
 0x2e3   : > { %3596 = vmatpush.bf16.msrb.mxu1 %v8083_v63  ;;  %3612 = vmatpush.bf16.msrb.mxu3 %v8179_v28  ;;  %v8235_v63 = vor.u32 %v10233_v24, %v8234_v33  ;;  %v8090_v28 = vld [vmem:[%s15195_s4 + $0x3c8] sm:$0xf]  ;;  %v10268_v33 = vld [vmem:[%s15195_s4 + $0x60c] sm:$0xf0]  ;;  %v8526_v24 = vld [vmem:[%s15195_s4 + $0x6c0] sm:$0xf] }
 0x2e4   : > { %3624 = vmatpush.bf16.msrb.mxu0 %v8087_v30  ;;  %3640 = vmatpush.bf16.msra.mxu2 %v8183_v0  ;;  %v8218_v30 = vld [vmem:[%s15195_s4 + $0x4c8] sm:$0xf]  ;;  %v10197_v0 = vld [vmem:[%s15195_s4 + $0x3d4] sm:$0xf0] }
 0x2e5   : > { %v8219_v58 = vor.u32 %v10229_v43, %v8218_v30  ;;  %v8091_v18 = vor.u32 %v10197_v0, %v8090_v28  ;;  %v8414_v28 = vld [vmem:[%s15195_s4 + $0x5e0] sm:$0xf]  ;;  %v10264_v30 = vld [vmem:[%s15195_s4 + $0x5ec] sm:$0xf0] }
 0x2e6   : > { %8272 = vmatmul.msk.bf16.vlgmr.msrb.gmra.mxu3 %vm2729_vm9, %v13038_v3  ;;  %v8510_v43 = vld [vmem:[%s15195_s4 + $0x6a0] sm:$0xf]  ;;  %v10288_v0 = vld [vmem:[%s15195_s4 + $0x6ac] sm:$0xf0] }
 0x2e7   : > { %3647 = vmatpush.bf16.msra.mxu3 %v8171_v50  ;;  %3597 = vmatpush.bf16.msrb.mxu1 %v8067_v27  ;;  %v10227_v50 = vld [vmem:[%s15195_s4 + $0x4cc] sm:$0xf] }
 0x2e8   : > { %3675 = vmatpush.bf16.msrb.mxu2 %v8175_v59  ;;  %3625 = vmatpush.bf16.msrb.mxu0 %v8071_v40  ;;  %v8092_v59 = vld [vmem:[%s15195_s4 + $0x3d8] sm:$0xf0]  ;;  %v8223_v27 = vor.u32 %v10227_v50, %v8220_v16  ;;  %v10262_v50 = vld [vmem:[%s15195_s4 + $0x5e4] sm:$0xf]  ;;  %v8416_v16 = vld [vmem:[%s15195_s4 + $0x5f0] sm:$0xf0] }
 0x2e9   : > { %8273 = vmatmul.msk.bf16.vlgmr.msra.gmra.mxu2 %vm2729_vm9, %v13038_v3  ;;  %v8095_v40 = vor.u32 %v10195_v23, %v8092_v59  ;;  %v10286_v23 = vld [vmem:[%s15195_s4 + $0x6a4] sm:$0xf]  ;;  %v8512_v59 = vld [vmem:[%s15195_s4 + $0x6b0] sm:$0xf0]  ;;  %v8419_v51 = vor.u32 %v10262_v50, %v8416_v16 }
 0x2ea   : > { %v8515_v53 = vor.u32 %v10286_v23, %v8512_v59  ;;  %v10246_v59 = vld [vmem:[%s15195_s4 + $0x564] sm:$0xf] }
 0x2eb   : > { %3648 = vmatpush.bf16.msra.mxu3 %v8155_v6  ;;  %3598 = vmatpush.bf16.msrb.mxu1 %v8051_v10  ;;  %v10191_v6 = vld [vmem:[%s15195_s4 + $0x3ac] sm:$0xf]  ;;  %v10221_v10 = vld [vmem:[%s15195_s4 + $0x494] sm:$0xf0] }
 0x2ec   : > { %3676 = vmatpush.bf16.msrb.mxu2 %v8159_v41  ;;  %3626 = vmatpush.bf16.msrb.mxu0 %v8055_v35  ;;  %v10189_v41 = vld [vmem:[%s15195_s4 + $0x394] sm:$0xf0]  ;;  %v8079_v21 = vor.u32 %v10191_v6, %v8076_v29  ;;  %v10219_v35 = vld [vmem:[%s15195_s4 + $0x48c] sm:$0xf]  ;;  %v8187_v55 = vor.u32 %v10221_v10, %v8186_v39  ;;  %v8400_v6 = vld [vmem:[%s15195_s4 + $0x5d0] sm:$0xf0] }
 0x2ed   : > { %v8059_v11 = vor.u32 %v10189_v41, %v8058_v48  ;;  %v10282_v29 = vld [vmem:[%s15195_s4 + $0x684] sm:$0xf]  ;;  %v13323_v41 = vpack.c.bf16 %v13055_v5, %v3711_v49  ;;  %v8403_v19 = vor.u32 %v10258_v26, %v8400_v6  ;;  %v8478_v5 = vld [vmem:[%s15195_s4 + $0x660] sm:$0xf]  ;;  %v8438_v49 = vld [vmem:[%s15195_s4 + $0x608] sm:$0xf] }
 0x2ee   : > { %3599 = vmatmul.bf16.vlgmr.msrb.gmra.mxu1 %v13119_v20 }
 0x2ef   : > { %3663 = vmatpush.bf16.msra.mxu1 %v8267_v42  ;;  %3649 = vmatpush.bf16.msra.mxu3 %v8139_v36  ;;  %v8188_v42 = vld [vmem:[%s15195_s4 + $0x498] sm:$0xf0]  ;;  %v10272_v36 = vld [vmem:[%s15195_s4 + $0x62c] sm:$0xf0] }
 0x2f0   : > { %3691 = vmatpush.bf16.msra.mxu0 %v8271_v13  ;;  %3677 = vmatpush.bf16.msrb.mxu2 %v8143_v22  ;;  %v8542_v13 = vld [vmem:[%s15195_s4 + $0x6e0] sm:$0xf]  ;;  %v8448_v22 = vld [vmem:[%s15195_s4 + $0x630] sm:$0xf0]  ;;  %v8191_v12 = vor.u32 %v10219_v35, %v8188_v42  ;;  %v3715_v35 = vld [vmem:[#allocation2 + $0x20] sm:$0x1] }
 0x2f1   : > { %3627 = vmatmul.bf16.vlgmr.msrb.gmra.mxu0 %v13119_v20 }
 0x2f3   : > { %3664 = vmatpush.bf16.msra.mxu1 %v8251_v32  ;;  %3650 = vmatpush.bf16.msra.mxu3 %v8123_v45  ;;  %v8447_v32 = vor.u32 %v10272_v36, %v8446_v37  ;;  %v8543_v45 = vor.u32 %v10296_v15, %v8542_v13  ;;  %v10280_v37 = vld [vmem:[%s15195_s4 + $0x66c] sm:$0xf0]  ;;  %v10254_v36 = vld [vmem:[%s15195_s4 + $0x5a4] sm:$0xf]  ;;  %v8384_v13 = vld [vmem:[%s15195_s4 + $0x5b0] sm:$0xf0] }
 0x2f4   : > { %3692 = vmatpush.bf16.msra.mxu0 %v8255_v57  ;;  %3678 = vmatpush.bf16.msrb.mxu2 %v8127_v17  ;;  %v8451_v57 = vor.u32 %v10270_v54, %v8448_v22  ;;  %v8547_v17 = vor.u32 %v10294_v14, %v8544_v56  ;;  %v8480_v15 = vld [vmem:[%s15195_s4 + $0x670] sm:$0xf0]  ;;  %v3779_v22 = vshrl.u32 %v13323_v41, 16 }
 0x2f7   : > { %3665 = vmatpush.bf16.msra.mxu1 %v8235_v63  ;;  %3651 = vmatpush.bf16.msra.mxu3 %v8107_v8  ;;  %v8431_v63 = vor.u32 %v10268_v33, %v8430_v60  ;;  %v8527_v8 = vor.u32 %v10292_v2, %v8526_v24  ;;  %v8462_v60 = vld [vmem:[%s15195_s4 + $0x640] sm:$0xf]  ;;  %v10276_v33 = vld [vmem:[%s15195_s4 + $0x64c] sm:$0xf0]  ;;  %v8368_v2 = vld [vmem:[%s15195_s4 + $0x590] sm:$0xf0] }
 0x2f8   : > { %3693 = vmatpush.bf16.msra.mxu0 %v8239_v9  ;;  %3679 = vmatpush.bf16.msrb.mxu2 %v8111_v34  ;;  %v8435_v9 = vor.u32 %v10266_v25, %v8432_v7  ;;  %v8531_v34 = vor.u32 %v10290_v52, %v8528_v1  ;;  %v10274_v25 = vld [vmem:[%s15195_s4 + $0x644] sm:$0xf]  ;;  %v3719_v7 = vpack.c.bf16 %v3715_v35, %v3715_v35  ;;  %v8464_v52 = vld [vmem:[%s15195_s4 + $0x650] sm:$0xf0]  ;;  %v8454_v1 = vld [vmem:[%s15195_s4 + $0x628] sm:$0xf] }
 0x2f9   : > { %v8467_v50 = vor.u32 %v10274_v25, %v8464_v52  ;;  %v10295_v35 = vld [vmem:[%s15195_s4 + $0x6ec] sm:$0xf] }
 0x2fb   : > { %3666 = vmatpush.bf16.msra.mxu1 %v8219_v58  ;;  %3652 = vmatpush.bf16.msra.mxu3 %v8091_v18  ;;  %v3712_v58 = vld [vmem:[#allocation2 + $0x8] sm:$0xf8]  ;;  %v8415_v18 = vor.u32 %v10264_v30, %v8414_v28  ;;  %v8456_v28 = vld [vmem:[%s15195_s4 + $0x638] sm:$0xf0]  ;;  %v8463_v30 = vor.u32 %v10276_v33, %v8462_v60 }
 0x2fc   : > { %3694 = vmatpush.bf16.msra.mxu0 %v8223_v27  ;;  %3680 = vmatpush.bf16.msrb.mxu2 %v8095_v40  ;;  %v3716_v27 = vld [vmem:[#allocation2 + $0x28] sm:$0x1]  ;;  %v3718_v31 = vpack.c.bf16 %v12990_v44, %v3712_v58  ;;  %v8398_v40 = vld [vmem:[%s15195_s4 + $0x5c0] sm:$0xf]  ;;  %v8352_v58 = vld [vmem:[%s15195_s4 + $0x570] sm:$0xf0] }
 0x2fd   : > { %v10284_v44 = vld [vmem:[%s15195_s4 + $0x68c] sm:$0xf0]  ;;  %v3720_v48 = vpack.c.bf16 %v3716_v27, %v3716_v27  ;;  %v8355_v26 = vor.u32 %v10246_v59, %v8352_v58  ;;  %v8536_v60 = vld [vmem:[%s15195_s4 + $0x6d8] sm:$0xf0] }
 0x2fe   : > { %v3795_v39 = vshll.u32 %v3718_v31, 16  ;;  %v8392_v59 = vld [vmem:[%s15195_s4 + $0x5b8] sm:$0xf0] }
 0x2ff   : > { %3667 = vmatpush.bf16.msra.mxu1 %v8203_v46  ;;  %3653 = vmatpush.bf16.msra.mxu3 %v8075_v38  ;;  %v8496_v46 = vld [vmem:[%s15195_s4 + $0x690] sm:$0xf0]  ;;  %v8399_v38 = vor.u32 %v10260_v61, %v8398_v40  ;;  %v13349_v54 = vshll.u32 %v3720_v48, 16  ;;  %v10242_v48 = vld [vmem:[%s15195_s4 + $0x544] sm:$0xf] }
 0x300   : > { %3695 = vmatpush.bf16.msra.mxu0 %v8207_v4  ;;  %3681 = vmatpush.bf16.msrb.mxu2 %v8079_v21  ;;  %v3792_v4 = vshrl.u32 %v3718_v31, 16  ;;  %v8382_v21 = vld [vmem:[%s15195_s4 + $0x5a0] sm:$0xf]  ;;  %v8499_v42 = vor.u32 %v10282_v29, %v8496_v46  ;;  %v13357_v56 = vrot.slane %v3795_v39, 2  ;;  %v10244_v46 = vld [vmem:[%s15195_s4 + $0x54c] sm:$0xf0] }
 0x301   : > { %v3802_v23 = vrot.slane %v13349_v54, 2  ;;  %v8422_v39 = vld [vmem:[%s15195_s4 + $0x5e8] sm:$0xf] }
 0x302   : > { %v13355_v14 = vrot.slane %v3792_v4, 1 }
 0x303   : > { %3668 = vmatpush.bf16.msra.mxu1 %v8187_v55  ;;  %3654 = vmatpush.bf16.msra.mxu3 %v8059_v11  ;;  %v10278_v55 = vld [vmem:[%s15195_s4 + $0x664] sm:$0xf]  ;;  %v8383_v11 = vor.u32 %v10256_v62, %v8382_v21 }
 0x304   : > { %3696 = vmatpush.bf16.msra.mxu0 %v8191_v12  ;;  %3682 = vmatpush.bf16.msrb.mxu2 %v8063_v47  ;;  %v8366_v12 = vld [vmem:[%s15195_s4 + $0x580] sm:$0xf]  ;;  %v3782_v47 = vshll.u32 %v13323_v41, 16  ;;  %v8483_v24 = vor.u32 %v10278_v55, %v8480_v15  ;;  %v3798_v31 = vor.u32 %v13357_v56, %v13355_v14  ;;  %v8336_v41 = vld [vmem:[%s15195_s4 + $0x550] sm:$0xf0] }
 0x305   : > { %v8339_v55 = vor.u32 %v10242_v48, %v8336_v41  ;;  %v8406_v14 = vld [vmem:[%s15195_s4 + $0x5c8] sm:$0xf] }
 0x306   : > { %3655 = vmatmul.bf16.vlgmr.msra.gmra.mxu3 %v13119_v20  ;;  %8274 = vmatmul.msk.bf16.vlgmr.msra.gmra.mxu1 %vm2729_vm9, %v13038_v3  ;;  %v13418_v40 = vrot.slane %v3782_v47, 2  ;;  %v13450_v21 = vsel %vm800_vm4, %v3798_v31, %v3802_v23  ;;  %v8534_v56 = vld [vmem:[%s15195_s4 + $0x6c8] sm:$0xf]  ;;  %v10293_v47 = vld [vmem:[%s15195_s4 + $0x6d4] sm:$0xf0] }
 0x307   : > { %4088 = vmatpush.bf16.msrb.mxu1 %v8447_v32  ;;  %4104 = vmatpush.bf16.msrb.mxu3 %v8543_v45  ;;  %v8479_v32 = vor.u32 %v10280_v37, %v8478_v5  ;;  %v8387_v45 = vor.u32 %v10254_v36, %v8384_v13  ;;  %v10265_v5 = vld [vmem:[%s15195_s4 + $0x5f4] sm:$0xf0]  ;;  %v10263_v36 = vld [vmem:[%s15195_s4 + $0x5ec] sm:$0xf]  ;;  %v8424_v13 = vld [vmem:[%s15195_s4 + $0x5f8] sm:$0xf0] }
 0x308   : > { %4116 = vmatpush.bf16.msrb.mxu0 %v8451_v57  ;;  %4132 = vmatpush.bf16.msra.mxu2 %v8547_v17  ;;  %v10252_v57 = vld [vmem:[%s15195_s4 + $0x58c] sm:$0xf0]  ;;  %v10250_v17 = vld [vmem:[%s15195_s4 + $0x584] sm:$0xf]  ;;  %v10255_v23 = vld [vmem:[%s15195_s4 + $0x5ac] sm:$0xf] }
 0x309   : > { %3683 = vmatmul.bf16.vlgmr.msrb.gmra.mxu2 %v13119_v20  ;;  %8275 = vmatmul.msk.bf16.vlgmr.msra.gmra.mxu0 %vm2729_vm9, %v13038_v3  ;;  %v8511_v20 = vor.u32 %v10288_v0, %v8510_v43  ;;  %v8494_v3 = vld [vmem:[%s15195_s4 + $0x680] sm:$0xf]  ;;  %v8371_v43 = vor.u32 %v10250_v17, %v8368_v2  ;;  %v10248_v0 = vld [vmem:[%s15195_s4 + $0x56c] sm:$0xf0]  ;;  %v10259_v17 = vld [vmem:[%s15195_s4 + $0x5cc] sm:$0xf] }
 0x30a   : > { %v8495_v10 = vor.u32 %v10284_v44, %v8494_v3  ;;  %v10267_v3 = vld [vmem:[%s15195_s4 + $0x60c] sm:$0xf]  ;;  %v8334_v44 = vld [vmem:[%s15195_s4 + $0x540] sm:$0xf]  ;;  %v8408_v2 = vld [vmem:[%s15195_s4 + $0x5d8] sm:$0xf0] }
 0x30b   : > { %4089 = vmatpush.bf16.msrb.mxu1 %v8431_v63  ;;  %4105 = vmatpush.bf16.msrb.mxu3 %v8527_v8  ;;  %v10273_v63 = vld [vmem:[%s15195_s4 + $0x634] sm:$0xf0]  ;;  %v8367_v8 = vor.u32 %v10252_v57, %v8366_v12  ;;  %v8335_v37 = vor.u32 %v10244_v46, %v8334_v44  ;;  %v10291_v57 = vld [vmem:[%s15195_s4 + $0x6cc] sm:$0xf]  ;;  %v8374_v31 = vld [vmem:[%s15195_s4 + $0x588] sm:$0xf] }
 0x30c   : > { %4117 = vmatpush.bf16.msrb.mxu0 %v8435_v9  ;;  %4133 = vmatpush.bf16.msra.mxu2 %v8531_v34  ;;  %v10271_v9 = vld [vmem:[%s15195_s4 + $0x62c] sm:$0xf]  ;;  %v8350_v34 = vld [vmem:[%s15195_s4 + $0x560] sm:$0xf]  ;;  %v8455_v16 = vor.u32 %v10273_v63, %v8454_v1  ;;  %v8535_v1 = vor.u32 %v10293_v47, %v8534_v56 }
 0x30d   : > { %v8459_v27 = vor.u32 %v10271_v9, %v8456_v28  ;;  %v8351_v61 = vor.u32 %v10248_v0, %v8350_v34  ;;  %v8539_v9 = vor.u32 %v10291_v57, %v8536_v60  ;;  %v8390_v28 = vld [vmem:[%s15195_s4 + $0x5a8] sm:$0xf]  ;;  %v8411_v34 = vor.u32 %v10259_v17, %v8408_v2  ;;  %v10257_v0 = vld [vmem:[%s15195_s4 + $0x5b4] sm:$0xf0]  ;;  %v10243_v56 = vld [vmem:[%s15195_s4 + $0x54c] sm:$0xf] }
 0x30e   : > { %v8472_v57 = vld [vmem:[%s15195_s4 + $0x658] sm:$0xf0]  ;;  %v10328_v17 = vld [vmem:[%s15195_s4 + $0x7ec] sm:$0xf0]  ;;  %v8826_v2 = vld [vmem:[%s15195_s4 + $0x8a0] sm:$0xf] }
 0x30f   : > { %4090 = vmatpush.bf16.msrb.mxu1 %v8415_v18  ;;  %4106 = vmatpush.bf16.msrb.mxu3 %v8511_v20  ;;  %v13406_v18 = vshll.u32 %v3719_v7, 16  ;;  %v10269_v20 = vld [vmem:[%s15195_s4 + $0x614] sm:$0xf0] }
 0x310   : > { %4118 = vmatpush.bf16.msrb.mxu0 %v8419_v51  ;;  %4134 = vmatpush.bf16.msra.mxu2 %v8515_v53  ;;  %v13416_v51 = vrot.slane %v3779_v22, 1  ;;  %v8440_v53 = vld [vmem:[%s15195_s4 + $0x618] sm:$0xf0]  ;;  %v8439_v4 = vor.u32 %v10269_v20, %v8438_v49  ;;  %v8423_v22 = vor.u32 %v10265_v5, %v8422_v39  ;;  %v8502_v49 = vld [vmem:[%s15195_s4 + $0x688] sm:$0xf] }
 0x311   : > { %v8443_v62 = vor.u32 %v10267_v3, %v8440_v53  ;;  %v3789_v54 = vrot.slane %v13406_v18, 2  ;;  %v8391_v18 = vor.u32 %v10257_v0, %v8390_v28  ;;  %v10285_v20 = vld [vmem:[%s15195_s4 + $0x694] sm:$0xf0]  ;;  %v8504_v3 = vld [vmem:[%s15195_s4 + $0x698] sm:$0xf0] }
 0x312   : > { %v2742_v6 = vpop.f32.mrf.mxu0  ;;  %v2756_v29 = vpop.f32.mrf.mxu1  ;;  %v3785_v12 = vor.u32 %v13418_v40, %v13416_v51  ;;  %v8395_v51 = vor.u32 %v10255_v23, %v8392_v59  ;;  %v10253_v40 = vld [vmem:[%s15195_s4 + $0x594] sm:$0xf0]  ;;  %v8503_v48 = vor.u32 %v10285_v20, %v8502_v49  ;;  %v8828_v23 = vld [vmem:[%s15195_s4 + $0x8b0] sm:$0xf0]  ;;  %v10324_v49 = vld [vmem:[%s15195_s4 + $0x7cc] sm:$0xf0] }
 0x313   : > { %4091 = vmatpush.bf16.msrb.mxu1 %v8399_v38  ;;  %4107 = vmatpush.bf16.msrb.mxu3 %v8495_v10  ;;  %v13438_v38 = vadd.f32 %v2756_v29, %v2742_v6  ;;  %v8550_v10 = vld [vmem:[%s15195_s4 + $0x6e8] sm:$0xf]  ;;  %v8376_v6 = vld [vmem:[%s15195_s4 + $0x598] sm:$0xf0]  ;;  %v8810_v20 = vld [vmem:[%s15195_s4 + $0x880] sm:$0xf] }
 0x314   : > { %4119 = vmatpush.bf16.msrb.mxu0 %v8403_v19  ;;  %4135 = vmatpush.bf16.msra.mxu2 %v8499_v42  ;;  %v10297_v19 = vld [vmem:[%s15195_s4 + $0x6f4] sm:$0xf0]  ;;  %v8552_v42 = vld [vmem:[%s15195_s4 + $0x6f8] sm:$0xf0]  ;;  %v13505_v63 = vsel %vm800_vm4, %v3785_v12, %v3789_v54  ;;  %v8470_v12 = vld [vmem:[%s15195_s4 + $0x648] sm:$0xf] }
 0x315   : > { %v8551_v15 = vor.u32 %v10297_v19, %v8550_v10  ;;  %v8358_v10 = vld [vmem:[%s15195_s4 + $0x568] sm:$0xf]  ;;  %v10245_v54 = vld [vmem:[%s15195_s4 + $0x554] sm:$0xf0] }
 0x316   : > { %v8486_v19 = vld [vmem:[%s15195_s4 + $0x668] sm:$0xf] }
 0x317   : > { %4092 = vmatpush.bf16.msrb.mxu1 %v8383_v11  ;;  %4108 = vmatpush.bf16.msrb.mxu3 %v8479_v32  ;;  %v8555_v11 = vor.u32 %v10295_v35, %v8552_v42  ;;  %v8427_v32 = vor.u32 %v10263_v36, %v8424_v13  ;;  %v10249_v35 = vld [vmem:[%s15195_s4 + $0x574] sm:$0xf0]  ;;  %v10279_v42 = vld [vmem:[%s15195_s4 + $0x66c] sm:$0xf]  ;;  %v8360_v13 = vld [vmem:[%s15195_s4 + $0x578] sm:$0xf0] }
 0x318   : > { %4120 = vmatpush.bf16.msrb.mxu0 %v8387_v45  ;;  %4136 = vmatpush.bf16.msra.mxu2 %v8483_v24  ;;  %v10261_v45 = vld [vmem:[%s15195_s4 + $0x5d4] sm:$0xf0]  ;;  %v10247_v36 = vld [vmem:[%s15195_s4 + $0x56c] sm:$0xf] }
 0x319   : > { %v2770_v33 = vpop.f32.mrf.mxu2  ;;  %v2784_v24 = vpop.f32.mrf.mxu3  ;;  %v8363_v47 = vor.u32 %v10247_v36, %v8360_v13  ;;  %v10342_v13 = vld [vmem:[%s15195_s4 + $0x864] sm:$0xf] }
 0x31a   : > { %v13498_v25 = vadd.f32 %v2784_v24, %v2770_v33  ;;  %v13500_v7 = vpop.f32.mrf.mxu0  ;;  %v13502_v52 = vpop.f32.mrf.mxu1  ;;  %v8730_v24 = vld [vmem:[%s15195_s4 + $0x7e0] sm:$0xf] }
 0x31b   : > { %4093 = vmatpush.bf16.msrb.mxu1 %v8367_v8  ;;  %4109 = vmatpush.bf16.msrb.mxu3 %v8463_v30  ;;  %v8407_v8 = vor.u32 %v10261_v45, %v8406_v14  ;;  %v8518_v30 = vld [vmem:[%s15195_s4 + $0x6a8] sm:$0xf]  ;;  %v10277_v14 = vld [vmem:[%s15195_s4 + $0x654] sm:$0xf0]  ;;  %v10275_v45 = vld [vmem:[%s15195_s4 + $0x64c] sm:$0xf] }
 0x31c   : > { %4121 = vmatpush.bf16.msrb.mxu0 %v8371_v43  ;;  %4137 = vmatpush.bf16.msra.mxu2 %v8467_v50  ;;  %v10289_v43 = vld [vmem:[%s15195_s4 + $0x6b4] sm:$0xf0]  ;;  %v10287_v50 = vld [vmem:[%s15195_s4 + $0x6ac] sm:$0xf]  ;;  %v8471_v28 = vor.u32 %v10277_v14, %v8470_v12  ;;  %v8682_v14 = vld [vmem:[%s15195_s4 + $0x780] sm:$0xf] }
 0x31d   : > { %v8519_v58 = vor.u32 %v10289_v43, %v8518_v30  ;;  %v10352_v30 = vld [vmem:[%s15195_s4 + $0x8ac] sm:$0xf0]  ;;  %v10326_v43 = vld [vmem:[%s15195_s4 + $0x7e4] sm:$0xf] }
 0x31e   : > { %8556 = vmatmul.msk.bf16.vlgmr.msrb.gmra.mxu3 %vm2729_vm9, %v13450_v21 }
 0x31f   : > { %4144 = vmatpush.bf16.msra.mxu3 %v8455_v16  ;;  %4094 = vmatpush.bf16.msrb.mxu1 %v8351_v61  ;;  %v8520_v16 = vld [vmem:[%s15195_s4 + $0x6b8] sm:$0xf0]  ;;  %v10283_v61 = vld [vmem:[%s15195_s4 + $0x68c] sm:$0xf] }
 0x320   : > { %4172 = vmatpush.bf16.msrb.mxu2 %v8459_v27  ;;  %4122 = vmatpush.bf16.msrb.mxu0 %v8355_v26  ;;  %v8523_v27 = vor.u32 %v10287_v50, %v8520_v16  ;;  %v10251_v26 = vld [vmem:[%s15195_s4 + $0x58c] sm:$0xf]  ;;  %v8507_v39 = vor.u32 %v10283_v61, %v8504_v3  ;;  %v8475_v50 = vor.u32 %v10275_v45, %v8472_v57  ;;  %v10350_v16 = vld [vmem:[%s15195_s4 + $0x8a4] sm:$0xf]  ;;  %v8716_v3 = vld [vmem:[%s15195_s4 + $0x7d0] sm:$0xf0] }
 0x321   : > { %8557 = vmatmul.msk.bf16.vlgmr.msra.gmra.mxu2 %vm2729_vm9, %v13450_v21  ;;  %v13551_v53 = vpop.f32.mrf.mxu2  ;;  %v13553_v44 = vpop.f32.mrf.mxu3  ;;  %v8379_v5 = vor.u32 %v10251_v26, %v8376_v6  ;;  %v10322_v61 = vld [vmem:[%s15195_s4 + $0x7c4] sm:$0xf]  ;;  %v8812_v6 = vld [vmem:[%s15195_s4 + $0x890] sm:$0xf0] }
 0x322   : > { %v2798_v29 = vpop.f32.mrf.mxu0  ;;  %v2812_v46 = vpop.f32.mrf.mxu1  ;;  %v10346_v26 = vld [vmem:[%s15195_s4 + $0x884] sm:$0xf]  ;;  %v8780_v57 = vld [vmem:[%s15195_s4 + $0x850] sm:$0xf0] }
 0x323   : > { %4145 = vmatpush.bf16.msra.mxu3 %v8439_v4  ;;  %4095 = vmatpush.bf16.msrb.mxu1 %v8335_v37  ;;  %v13561_v41 = vadd.f32 %v2812_v46, %v2798_v29  ;;  %v8375_v4 = vor.u32 %v10253_v40, %v8374_v31  ;;  %v8488_v37 = vld [vmem:[%s15195_s4 + $0x678] sm:$0xf0]  ;;  %v8714_v31 = vld [vmem:[%s15195_s4 + $0x7c0] sm:$0xf]  ;;  %v10348_v40 = vld [vmem:[%s15195_s4 + $0x88c] sm:$0xf0] }
 0x324   : > { %4173 = vmatpush.bf16.msrb.mxu2 %v8443_v62  ;;  %4123 = vmatpush.bf16.msrb.mxu0 %v8339_v55  ;;  %v10281_v62 = vld [vmem:[%s15195_s4 + $0x674] sm:$0xf0]  ;;  %v8715_v29 = vor.u32 %v10324_v49, %v8714_v31  ;;  %v8811_v46 = vor.u32 %v10348_v40, %v8810_v20  ;;  %v10338_v45 = vld [vmem:[%s15195_s4 + $0x844] sm:$0xf]  ;;  %v8650_v31 = vld [vmem:[%s15195_s4 + $0x740] sm:$0xf] }
 0x325   : > { %v8487_v55 = vor.u32 %v10281_v62, %v8486_v19  ;;  %v10320_v19 = vld [vmem:[%s15195_s4 + $0x7ac] sm:$0xf0]  ;;  %v8794_v62 = vld [vmem:[%s15195_s4 + $0x860] sm:$0xf]  ;;  %v4209_v49 = vld [vmem:[#allocation2 + $0x8] sm:$0xf0] }
 0x326   : > { %4096 = vmatmul.bf16.vlgmr.msrb.gmra.mxu1 %v13505_v63  ;;  %v4211_v20 = vld [vmem:[#allocation2 + $0x28] sm:$0x3] }
 0x327   : > { %4160 = vmatpush.bf16.msra.mxu1 %v8551_v15  ;;  %4146 = vmatpush.bf16.msra.mxu3 %v8423_v22  ;;  %v8342_v15 = vld [vmem:[%s15195_s4 + $0x548] sm:$0xf]  ;;  %v8359_v22 = vor.u32 %v10249_v35, %v8358_v10  ;;  %v8698_v10 = vld [vmem:[%s15195_s4 + $0x7a0] sm:$0xf]  ;;  %v10344_v35 = vld [vmem:[%s15195_s4 + $0x86c] sm:$0xf0] }
 0x328   : > { %4188 = vmatpush.bf16.msra.mxu0 %v8555_v11  ;;  %4174 = vmatpush.bf16.msrb.mxu2 %v8427_v32  ;;  %v8491_v11 = vor.u32 %v10279_v42, %v8488_v37  ;;  %v8344_v32 = vld [vmem:[%s15195_s4 + $0x558] sm:$0xf0]  ;;  %v8343_v0 = vor.u32 %v10245_v54, %v8342_v15  ;;  %v10318_v42 = vld [vmem:[%s15195_s4 + $0x7a4] sm:$0xf]  ;;  %v8700_v37 = vld [vmem:[%s15195_s4 + $0x7b0] sm:$0xf0] }
 0x329   : > { %4124 = vmatmul.bf16.vlgmr.msrb.gmra.mxu0 %v13505_v63  ;;  %v2826_v60 = vpop.f32.mrf.mxu2  ;;  %v2840_v33 = vpop.f32.mrf.mxu3  ;;  %v8347_v59 = vor.u32 %v10243_v56, %v8344_v32  ;;  %v8703_v12 = vor.u32 %v10318_v42, %v8700_v37  ;;  %v10316_v56 = vld [vmem:[%s15195_s4 + $0x78c] sm:$0xf0]  ;;  %v8684_v32 = vld [vmem:[%s15195_s4 + $0x790] sm:$0xf0]  ;;  %v4215_v42 = vpack.c.bf16 %v4211_v20, %v4211_v20  ;;  %v10321_v20 = vld [vmem:[%s15195_s4 + $0x7b4] sm:$0xf0] }
 0x32b   : > { %4161 = vmatpush.bf16.msra.mxu1 %v8535_v1  ;;  %4147 = vmatpush.bf16.msra.mxu3 %v8407_v8  ;;  %v13620_v1 = vadd.f32 %v2840_v33, %v2826_v60  ;;  %v13622_v8 = vpop.f32.mrf.mxu0  ;;  %v8683_v60 = vor.u32 %v10316_v56, %v8682_v14  ;;  %v8636_v14 = vld [vmem:[%s15195_s4 + $0x730] sm:$0xf0]  ;;  %v4208_v56 = vld [vmem:[#allocation2] sm:$0xf0] }
 0x32c   : > { %4189 = vmatpush.bf16.msra.mxu0 %v8539_v9  ;;  %4175 = vmatpush.bf16.msrb.mxu2 %v8411_v34  ;;  %v13624_v9 = vpop.f32.mrf.mxu1  ;;  %v8732_v34 = vld [vmem:[%s15195_s4 + $0x7f0] sm:$0xf0] }
 0x32f   : > { %4162 = vmatpush.bf16.msra.mxu1 %v8519_v58  ;;  %4148 = vmatpush.bf16.msra.mxu3 %v8391_v18  ;;  %v8731_v58 = vor.u32 %v10328_v17, %v8730_v24  ;;  %v8827_v18 = vor.u32 %v10352_v30, %v8826_v2  ;;  %v8666_v17 = vld [vmem:[%s15195_s4 + $0x760] sm:$0xf]  ;;  %v10312_v2 = vld [vmem:[%s15195_s4 + $0x76c] sm:$0xf0]  ;;  %v8783_v30 = vor.u32 %v10338_v45, %v8780_v57  ;;  %v10325_v45 = vld [vmem:[%s15195_s4 + $0x7d4] sm:$0xf0] }
 0x330   : > { %4190 = vmatpush.bf16.msra.mxu0 %v8523_v27  ;;  %4176 = vmatpush.bf16.msrb.mxu2 %v8395_v51  ;;  %v8735_v27 = vor.u32 %v10326_v43, %v8732_v34  ;;  %v8831_v51 = vor.u32 %v10350_v16, %v8828_v23  ;;  %v10336_v34 = vld [vmem:[%s15195_s4 + $0x82c] sm:$0xf0] }
 0x333   : > { %4163 = vmatpush.bf16.msra.mxu1 %v8503_v48  ;;  %4149 = vmatpush.bf16.msra.mxu3 %v8375_v4  ;;  %v8719_v48 = vor.u32 %v10322_v61, %v8716_v3  ;;  %v13665_v4 = vpop.f32.mrf.mxu2  ;;  %v10308_v61 = vld [vmem:[%s15195_s4 + $0x74c] sm:$0xf0]  ;;  %v8746_v3 = vld [vmem:[%s15195_s4 + $0x800] sm:$0xf] }
 0x334   : > { %4191 = vmatpush.bf16.msra.mxu0 %v8507_v39  ;;  %4177 = vmatpush.bf16.msrb.mxu2 %v8379_v5  ;;  %v13667_v39 = vpop.f32.mrf.mxu3  ;;  %v8815_v5 = vor.u32 %v10346_v26, %v8812_v6  ;;  %v3137_v36 = vpop.f32.mrf.mxu1  ;;  %v10332_v26 = vld [vmem:[%s15195_s4 + $0x80c] sm:$0xf0]  ;;  %v8651_v37 = vor.u32 %v10308_v61, %v8650_v31 }
 0x335   : > { %v3138_v15 = vadd.f32 %v3137_v36, %v13438_v38  ;;  %v8778_v38 = vld [vmem:[%s15195_s4 + $0x840] sm:$0xf]  ;;  %v10327_v36 = vld [vmem:[%s15195_s4 + $0x7ec] sm:$0xf] }
 0x336   : > { %v3165_v54 = vpop.f32.mrf.mxu0 }
 0x337   : > { %4164 = vmatpush.bf16.msra.mxu1 %v8487_v55  ;;  %4150 = vmatpush.bf16.msra.mxu3 %v8359_v22  ;;  %v8796_v55 = vld [vmem:[%s15195_s4 + $0x870] sm:$0xf0]  ;;  %v8699_v22 = vor.u32 %v10320_v19, %v8698_v10  ;;  %v8738_v19 = vld [vmem:[%s15195_s4 + $0x7e8] sm:$0xf] }
 0x338   : > { %4192 = vmatpush.bf16.msra.mxu0 %v8491_v11  ;;  %4178 = vmatpush.bf16.msrb.mxu2 %v8363_v47  ;;  %v8795_v11 = vor.u32 %v10344_v35, %v8794_v62  ;;  %v10314_v47 = vld [vmem:[%s15195_s4 + $0x784] sm:$0xf]  ;;  %v8748_v10 = vld [vmem:[%s15195_s4 + $0x810] sm:$0xf0]  ;;  %v10329_v62 = vld [vmem:[%s15195_s4 + $0x7f4] sm:$0xf0] }
 0x339   : > { %v8687_v24 = vor.u32 %v10314_v47, %v8684_v32  ;;  %v4281_v47 = vrot.slane %v4215_v42, 2  ;;  %v8722_v32 = vld [vmem:[%s15195_s4 + $0x7c8] sm:$0xf] }
 0x33a   : > { %v8690_v42 = vld [vmem:[%s15195_s4 + $0x788] sm:$0xf] }
 0x33b   : > { %4165 = vmatpush.bf16.msra.mxu1 %v8471_v28  ;;  %4151 = vmatpush.bf16.msra.mxu3 %v8343_v0  ;;  %v8762_v28 = vld [vmem:[%s15195_s4 + $0x820] sm:$0xf]  ;;  %v10310_v0 = vld [vmem:[%s15195_s4 + $0x764] sm:$0xf] }
 0x33c   : > { %4193 = vmatpush.bf16.msra.mxu0 %v8475_v50  ;;  %4179 = vmatpush.bf16.msrb.mxu2 %v8347_v59  ;;  %v3151_v43 = vpop.f32.mrf.mxu3  ;;  %v8668_v50 = vld [vmem:[%s15195_s4 + $0x770] sm:$0xf0]  ;;  %v3179_v23 = vpop.f32.mrf.mxu2  ;;  %v10334_v59 = vld [vmem:[%s15195_s4 + $0x824] sm:$0xf] }
 0x33d   : > { %v13743_v16 = vadd.f32 %v3151_v43, %v3138_v15  ;;  %v8671_v40 = vor.u32 %v10310_v0, %v8668_v50  ;;  %v10607_v43 = vld [vmem:[#allocation2 + $0x10] sm:$0xff]  ;;  %v8723_v50 = vor.u32 %v10325_v45, %v8722_v32 }
 0x33e   : > { %4152 = vmatmul.bf16.vlgmr.msra.gmra.mxu3 %v13505_v63  ;;  %8558 = vmatmul.msk.bf16.vlgmr.msra.gmra.mxu1 %vm2729_vm9, %v13450_v21  ;;  %v10313_v45 = vld [vmem:[%s15195_s4 + $0x774] sm:$0xf0] }
 0x33f   : > { %4567 = vmatpush.bf16.msrb.mxu1 %v8731_v58  ;;  %4583 = vmatpush.bf16.msrb.mxu3 %v8827_v18  ;;  %v8764_v58 = vld [vmem:[%s15195_s4 + $0x830] sm:$0xf0] }
 0x340   : > { %4595 = vmatpush.bf16.msrb.mxu0 %v8735_v27  ;;  %4611 = vmatpush.bf16.msra.mxu2 %v8831_v51  ;;  %v8667_v27 = vor.u32 %v10312_v2, %v8666_v17  ;;  %v8763_v51 = vor.u32 %v10336_v34, %v8762_v28  ;;  %v8767_v6 = vor.u32 %v10334_v59, %v8764_v58  ;;  %v10300_v2 = vld [vmem:[%s15195_s4 + $0x70c] sm:$0xf0]  ;;  %v10298_v28 = vld [vmem:[%s15195_s4 + $0x704] sm:$0xf]  ;;  %v8834_v59 = vld [vmem:[%s15195_s4 + $0x8a8] sm:$0xf] }
 0x341   : > { %4180 = vmatmul.bf16.vlgmr.msrb.gmra.mxu2 %v13505_v63  ;;  %8559 = vmatmul.msk.bf16.vlgmr.msra.gmra.mxu0 %vm2729_vm9, %v13450_v21  ;;  %v3166_v63 = vadd.f32 %v3165_v54, %v13498_v25  ;;  %v8799_v21 = vor.u32 %v10342_v13, %v8796_v55  ;;  %v10340_v25 = vld [vmem:[%s15195_s4 + $0x84c] sm:$0xf0]  ;;  %v8740_v13 = vld [vmem:[%s15195_s4 + $0x7f8] sm:$0xf0]  ;;  %v8747_v55 = vor.u32 %v10332_v26, %v8746_v3  ;;  %v8634_v54 = vld [vmem:[%s15195_s4 + $0x720] sm:$0xf] }
 0x342   : > { %v8779_v33 = vor.u32 %v10340_v25, %v8778_v38  ;;  %v4210_v38 = vld [vmem:[#allocation2 + $0x20] sm:$0x3]  ;;  %v4212_v34 = vpack.c.bf16 %v10607_v43, %v4208_v56  ;;  %v10353_v58 = vld [vmem:[%s15195_s4 + $0x8b4] sm:$0xf0]  ;;  %v10319_v26 = vld [vmem:[%s15195_s4 + $0x7ac] sm:$0xf] }
 0x343   : > { %4568 = vmatpush.bf16.msrb.mxu1 %v8715_v29  ;;  %4584 = vmatpush.bf16.msrb.mxu3 %v8811_v46  ;;  %v13751_v18 = vadd.f32 %v3179_v23, %v3166_v63  ;;  %v10306_v29 = vld [vmem:[%s15195_s4 + $0x744] sm:$0xf]  ;;  %v8652_v46 = vld [vmem:[%s15195_s4 + $0x750] sm:$0xf0]  ;;  %v4214_v0 = vpack.c.bf16 %v4210_v38, %v4210_v38  ;;  %v8706_v23 = vld [vmem:[%s15195_s4 + $0x7a8] sm:$0xf] }
 0x344   : > { %4596 = vmatpush.bf16.msrb.mxu0 %v8719_v48  ;;  %4612 = vmatpush.bf16.msra.mxu2 %v8815_v5  ;;  %v10330_v48 = vld [vmem:[%s15195_s4 + $0x804] sm:$0xf]  ;;  %v8655_v15 = vor.u32 %v10306_v29, %v8652_v46  ;;  %v13848_v61 = vpop.f32.mrf.mxu2  ;;  %v13858_v29 = vpop.f32.mrf.mxu1  ;;  %v8674_v38 = vld [vmem:[%s15195_s4 + $0x768] sm:$0xf] }
 0x345   : > { %v10606_v5 = vld [vmem:[#allocation2 + $0x18] sm:$0xff]  ;;  %v8751_v63 = vor.u32 %v10330_v48, %v8748_v10  ;;  %v8835_v48 = vor.u32 %v10353_v58, %v8834_v59  ;;  %v4277_v10 = vrot.slane %v4212_v34, 2  ;;  %v8786_v59 = vld [vmem:[%s15195_s4 + $0x848] sm:$0xf] }
 0x346   : > { %v4213_v35 = vpack.c.bf16 %v10606_v5, %v4209_v49  ;;  %v8707_v5 = vor.u32 %v10321_v20, %v8706_v23  ;;  %v8658_v23 = vld [vmem:[%s15195_s4 + $0x748] sm:$0xf]  ;;  %v10309_v20 = vld [vmem:[%s15195_s4 + $0x754] sm:$0xf0] }
 0x347   : > { %4569 = vmatpush.bf16.msrb.mxu1 %v8699_v22  ;;  %4585 = vmatpush.bf16.msrb.mxu3 %v8795_v11  ;;  %v10304_v22 = vld [vmem:[%s15195_s4 + $0x72c] sm:$0xf0]  ;;  %v8739_v11 = vor.u32 %v10329_v62, %v8738_v19  ;;  %v4278_v19 = vrot.slane %v4214_v0, 2  ;;  %v13862_v62 = vpop.f32.mrf.mxu0 }
 0x348   : > { %4597 = vmatpush.bf16.msrb.mxu0 %v8703_v12  ;;  %4613 = vmatpush.bf16.msra.mxu2 %v8799_v21  ;;  %v10302_v12 = vld [vmem:[%s15195_s4 + $0x724] sm:$0xf]  ;;  %v8743_v21 = vor.u32 %v10327_v36, %v8740_v13  ;;  %v4280_v25 = vrot.slane %v4213_v35, 2  ;;  %v8635_v57 = vor.u32 %v10304_v22, %v8634_v54  ;;  %v10349_v36 = vld [vmem:[%s15195_s4 + $0x894] sm:$0xf0] }
 0x349   : > { %v8639_v17 = vor.u32 %v10302_v12, %v8636_v14  ;;  %v8820_v54 = vld [vmem:[%s15195_s4 + $0x898] sm:$0xf0]  ;;  %v10315_v22 = vld [vmem:[%s15195_s4 + $0x78c] sm:$0xf]  ;;  %v13889_v12 = vsel %vm413_vm0, %v4277_v10, %v4278_v19  ;;  %v8642_v10 = vld [vmem:[%s15195_s4 + $0x728] sm:$0xf] }
 0x34a   : > { %v13837_v31 = vsel %vm413_vm0, %v4280_v25, %v4281_v47  ;;  %v10345_v25 = vld [vmem:[%s15195_s4 + $0x874] sm:$0xf0]  ;;  %v8770_v19 = vld [vmem:[%s15195_s4 + $0x828] sm:$0xf] }
 0x34b   : > { %4570 = vmatpush.bf16.msrb.mxu1 %v8683_v60  ;;  %4586 = vmatpush.bf16.msrb.mxu3 %v8779_v33  ;;  %v10323_v60 = vld [vmem:[%s15195_s4 + $0x7cc] sm:$0xf]  ;;  %v8724_v33 = vld [vmem:[%s15195_s4 + $0x7d8] sm:$0xf0] }
 0x34c   : > { %4598 = vmatpush.bf16.msrb.mxu0 %v8687_v24  ;;  %4614 = vmatpush.bf16.msra.mxu2 %v8783_v30  ;;  %v8618_v24 = vld [vmem:[%s15195_s4 + $0x700] sm:$0xf]  ;;  %v8620_v30 = vld [vmem:[%s15195_s4 + $0x710] sm:$0xf0]  ;;  %v8727_v49 = vor.u32 %v10323_v60, %v8724_v33  ;;  %v8804_v60 = vld [vmem:[%s15195_s4 + $0x878] sm:$0xf0] }
 0x34d   : > { %v8619_v3 = vor.u32 %v10300_v2, %v8618_v24  ;;  %v8623_v46 = vor.u32 %v10298_v28, %v8620_v30  ;;  %v8676_v2 = vld [vmem:[%s15195_s4 + $0x778] sm:$0xf0]  ;;  %v3207_v28 = vpop.f32.mrf.mxu1 }
 0x34f   : > { %4571 = vmatpush.bf16.msrb.mxu1 %v8667_v27  ;;  %4587 = vmatpush.bf16.msrb.mxu3 %v8763_v51  ;;  %v13834_v27 = vpop.f32.mrf.mxu3  ;;  %v10351_v51 = vld [vmem:[%s15195_s4 + $0x8ac] sm:$0xf]  ;;  %v3235_v34 = vpop.f32.mrf.mxu0 }
 0x350   : > { %4599 = vmatpush.bf16.msrb.mxu0 %v8671_v40  ;;  %4615 = vmatpush.bf16.msra.mxu2 %v8767_v6  ;;  %v8836_v40 = vld [vmem:[%s15195_s4 + $0x8b8] sm:$0xf0] }
 0x351   : > { %v8708_v6 = vld [vmem:[%s15195_s4 + $0x7b8] sm:$0xf0]  ;;  %v8839_v35 = vor.u32 %v10351_v51, %v8836_v40  ;;  %v10339_v51 = vld [vmem:[%s15195_s4 + $0x84c] sm:$0xf] }
 0x352   : > { %v8711_v13 = vor.u32 %v10319_v26, %v8708_v6  ;;  %v8788_v40 = vld [vmem:[%s15195_s4 + $0x858] sm:$0xf0] }
 0x353   : > { %4572 = vmatpush.bf16.msrb.mxu1 %v8651_v37  ;;  %4588 = vmatpush.bf16.msrb.mxu3 %v8747_v55  ;;  %v8818_v37 = vld [vmem:[%s15195_s4 + $0x888] sm:$0xf]  ;;  %v10317_v55 = vld [vmem:[%s15195_s4 + $0x794] sm:$0xf0]  ;;  %v8660_v26 = vld [vmem:[%s15195_s4 + $0x758] sm:$0xf0] }
 0x354   : > { %4600 = vmatpush.bf16.msrb.mxu0 %v8655_v15  ;;  %4616 = vmatpush.bf16.msra.mxu2 %v8751_v63  ;;  %v10347_v15 = vld [vmem:[%s15195_s4 + $0x88c] sm:$0xf]  ;;  %v8692_v63 = vld [vmem:[%s15195_s4 + $0x798] sm:$0xf0]  ;;  %v8691_v14 = vor.u32 %v10317_v55, %v8690_v42  ;;  %v3221_v24 = vpop.f32.mrf.mxu2  ;;  %v10305_v42 = vld [vmem:[%s15195_s4 + $0x734] sm:$0xf0] }
 0x355   : > { %v8823_v56 = vor.u32 %v10347_v15, %v8820_v54  ;;  %v8695_v32 = vor.u32 %v10315_v22, %v8692_v63  ;;  %v3222_v30 = vadd.f32 %v3221_v24, %v13620_v1  ;;  %v10341_v1 = vld [vmem:[%s15195_s4 + $0x854] sm:$0xf0]  ;;  %v8644_v55 = vld [vmem:[%s15195_s4 + $0x738] sm:$0xf0]  ;;  %v8643_v54 = vor.u32 %v10305_v42, %v8642_v10  ;;  %v8626_v63 = vld [vmem:[%s15195_s4 + $0x708] sm:$0xf] }
 0x356   : > { %8840 = vmatmul.msk.bf16.vlgmr.msrb.gmra.mxu3 %vm2729_vm9, %v13837_v31  ;;  %v8787_v6 = vor.u32 %v10341_v1, %v8786_v59  ;;  %v8894_v10 = vld [vmem:[%s15197_s6 + $0x60] sm:$0xf]  ;;  %v8886_v42 = vld [vmem:[%s15197_s6 + $0x50] sm:$0xf] }
 0x357   : > { %4623 = vmatpush.bf16.msra.mxu3 %v8739_v11  ;;  %4573 = vmatpush.bf16.msrb.mxu1 %v8635_v57  ;;  %v8819_v11 = vor.u32 %v10349_v36, %v8818_v37  ;;  %v3193_v47 = vpop.f32.mrf.mxu3  ;;  %v10343_v57 = vld [vmem:[%s15195_s4 + $0x86c] sm:$0xf]  ;;  %v13930_v58 = vadd.f32 %v3235_v34, %v3222_v30  ;;  %v8772_v36 = vld [vmem:[%s15195_s4 + $0x838] sm:$0xf0] }
 0x358   : > { %4651 = vmatpush.bf16.msrb.mxu2 %v8743_v21  ;;  %4601 = vmatpush.bf16.msrb.mxu0 %v8639_v17  ;;  %v8802_v21 = vld [vmem:[%s15195_s4 + $0x868] sm:$0xf]  ;;  %v3194_v33 = vadd.f32 %v3193_v47, %v13561_v41  ;;  %v10311_v17 = vld [vmem:[%s15195_s4 + $0x76c] sm:$0xf]  ;;  %v8675_v41 = vor.u32 %v10313_v45, %v8674_v38  ;;  %v10301_v38 = vld [vmem:[%s15195_s4 + $0x714] sm:$0xf0] }
 0x359   : > { %8841 = vmatmul.msk.bf16.vlgmr.msra.gmra.mxu2 %vm2729_vm9, %v13837_v31  ;;  %v8803_v43 = vor.u32 %v10345_v25, %v8802_v21  ;;  %v10335_v37 = vld [vmem:[%s15195_s4 + $0x82c] sm:$0xf]  ;;  %v8756_v25 = vld [vmem:[%s15195_s4 + $0x818] sm:$0xf0] }
 0x35a   : > { %v13919_v0 = vadd.f32 %v3207_v28, %v3194_v33  ;;  %v8775_v22 = vor.u32 %v10335_v37, %v8772_v36  ;;  %v10331_v21 = vld [vmem:[%s15195_s4 + $0x80c] sm:$0xf]  ;;  %v8627_v33 = vor.u32 %v10301_v38, %v8626_v63  ;;  %v10365_v37 = vld [vmem:[%s15197_s6 + $0x54] sm:$0xf0] }
 0x35b   : > { %4624 = vmatpush.bf16.msra.mxu3 %v8723_v50  ;;  %4574 = vmatpush.bf16.msrb.mxu1 %v8619_v3  ;;  %v8807_v50 = vor.u32 %v10343_v57, %v8804_v60  ;;  %v10307_v3 = vld [vmem:[%s15195_s4 + $0x74c] sm:$0xf]  ;;  %v13995_v57 = vpop.f32.mrf.mxu1  ;;  %v8759_v24 = vor.u32 %v10331_v21, %v8756_v25  ;;  %v10361_v38 = vld [vmem:[%s15197_s6 + $0x34] sm:$0xf0]  ;;  %v8958_v21 = vld [vmem:[%s15197_s6 + $0xe0] sm:$0xf] }
 0x35c   : > { %4652 = vmatpush.bf16.msrb.mxu2 %v8727_v49  ;;  %4602 = vmatpush.bf16.msrb.mxu0 %v8623_v46  ;;  %v8679_v49 = vor.u32 %v10311_v17, %v8676_v2  ;;  %v8659_v46 = vor.u32 %v10309_v20, %v8658_v23  ;;  %v10299_v47 = vld [vmem:[%s15195_s4 + $0x70c] sm:$0xf]  ;;  %v13999_v17 = vpop.f32.mrf.mxu0  ;;  %v14001_v2 = vpop.f32.mrf.mxu2 }
 0x35e   : > { %4575 = vmatmul.bf16.vlgmr.msrb.gmra.mxu1 %v13889_v12 }
 0x35f   : > { %4639 = vmatpush.bf16.msra.mxu1 %v8835_v48  ;;  %4625 = vmatpush.bf16.msra.mxu3 %v8707_v5  ;;  %v8791_v48 = vor.u32 %v10339_v51, %v8788_v40  ;;  %v10337_v5 = vld [vmem:[%s15195_s4 + $0x834] sm:$0xf0]  ;;  %v13997_v60 = vpop.f32.mrf.mxu3 }
 0x360   : > { %4667 = vmatpush.bf16.msra.mxu0 %v8839_v35  ;;  %4653 = vmatpush.bf16.msrb.mxu2 %v8711_v13  ;;  %v8663_v35 = vor.u32 %v10307_v3, %v8660_v26  ;;  %v10303_v13 = vld [vmem:[%s15195_s4 + $0x72c] sm:$0xf]  ;;  %v8771_v15 = vor.u32 %v10337_v5, %v8770_v19 }
 0x361   : > { %4603 = vmatmul.bf16.vlgmr.msrb.gmra.mxu0 %v13889_v12 }
 0x363   : > { %4640 = vmatpush.bf16.msra.mxu1 %v8819_v11  ;;  %4626 = vmatpush.bf16.msra.mxu3 %v8691_v14  ;;  %v8754_v11 = vld [vmem:[%s15195_s4 + $0x808] sm:$0xf]  ;;  %v10333_v14 = vld [vmem:[%s15195_s4 + $0x814] sm:$0xf0] }
 0x364   : > { %4668 = vmatpush.bf16.msra.mxu0 %v8823_v56  ;;  %4654 = vmatpush.bf16.msrb.mxu2 %v8695_v32  ;;  %v8647_v56 = vor.u32 %v10303_v13, %v8644_v55  ;;  %v8628_v32 = vld [vmem:[%s15195_s4 + $0x718] sm:$0xf0]  ;;  %v8755_v45 = vor.u32 %v10333_v14, %v8754_v11  ;;  %v10385_v11 = vld [vmem:[%s15197_s6 + $0xf4] sm:$0xf0] }
 0x365   : > { %v8631_v28 = vor.u32 %v10299_v47, %v8628_v32  ;;  %v10383_v47 = vld [vmem:[%s15197_s6 + $0xe4] sm:$0xf0]  ;;  %v8862_v32 = vld [vmem:[%s15197_s6 + $0x20] sm:$0xf] }
 0x367   : > { %4641 = vmatpush.bf16.msra.mxu1 %v8803_v43  ;;  %4627 = vmatpush.bf16.msra.mxu3 %v8675_v41 }
 0x368   : > { %4669 = vmatpush.bf16.msra.mxu0 %v8807_v50  ;;  %4655 = vmatpush.bf16.msrb.mxu2 %v8679_v49 }
 0x369   : > { %v3614_v30 = vpop.f32.mrf.mxu3 }
 0x36b   : > { %4642 = vmatpush.bf16.msra.mxu1 %v8787_v6  ;;  %4628 = vmatpush.bf16.msra.mxu3 %v8659_v46  ;;  %v3600_v43 = vpop.f32.mrf.mxu1 }
 0x36c   : > { %4670 = vmatpush.bf16.msra.mxu0 %v8791_v48  ;;  %4656 = vmatpush.bf16.msrb.mxu2 %v8663_v35  ;;  %v3642_v34 = vpop.f32.mrf.mxu2  ;;  %v3615_v41 = vadd.f32 %v3614_v30, %v3600_v43  ;;  %v10369_v48 = vld [vmem:[%s15197_s6 + $0x74] sm:$0xf0] }
 0x36e   : > { %v3628_v50 = vpop.f32.mrf.mxu0  ;;  %v14010_v59 = vadd.f32 %v3615_v41, %v13743_v16 }
 0x36f   : > { %4643 = vmatpush.bf16.msra.mxu1 %v8771_v15  ;;  %4629 = vmatpush.bf16.msra.mxu3 %v8643_v54  ;;  %v3643_v23 = vadd.f32 %v3642_v34, %v3628_v50  ;;  %v8878_v15 = vld [vmem:[%s15197_s6 + $0x40] sm:$0xf]  ;;  %v10363_v54 = vld [vmem:[%s15197_s6 + $0x44] sm:$0xf0]  ;;  %v8854_v50 = vld [vmem:[%s15197_s6 + $0x10] sm:$0xf] }
 0x370   : > { %4671 = vmatpush.bf16.msra.mxu0 %v8775_v22  ;;  %4657 = vmatpush.bf16.msrb.mxu2 %v8647_v56  ;;  %v8966_v22 = vld [vmem:[%s15197_s6 + $0xf0] sm:$0xf]  ;;  %v8879_v63 = vor.u32 %v10363_v54, %v8878_v15 }
 0x371   : > { %v14013_v1 = vadd.f32 %v3643_v23, %v13751_v18  ;;  %v14017_v20 = vpop.f32.mrf.mxu3  ;;  %v8902_v18 = vld [vmem:[%s15197_s6 + $0x70] sm:$0xf]  ;;  %v8967_v14 = vor.u32 %v10385_v11, %v8966_v22  ;;  %v10357_v23 = vld [vmem:[%s15197_s6 + $0x14] sm:$0xf0] }
 0x372   : > { %v8903_v5 = vor.u32 %v10369_v48, %v8902_v18  ;;  %v8870_v56 = vld [vmem:[%s15197_s6 + $0x30] sm:$0xf]  ;;  %v10384_v18 = vld [vmem:[%s15197_s6 + $0xf4] sm:$0xf]  ;;  %v8968_v48 = vld [vmem:[%s15197_s6 + $0xf8] sm:$0xf0] }
 0x373   : > { %4644 = vmatpush.bf16.msra.mxu1 %v8755_v45  ;;  %4630 = vmatpush.bf16.msra.mxu3 %v8627_v33  ;;  %v14019_v51 = vpop.f32.mrf.mxu1  ;;  %v8871_v25 = vor.u32 %v10361_v38, %v8870_v56  ;;  %v10359_v45 = vld [vmem:[%s15197_s6 + $0x24] sm:$0xf0]  ;;  %v8959_v33 = vor.u32 %v10383_v47, %v8958_v21  ;;  %v10380_v56 = vld [vmem:[%s15197_s6 + $0xd4] sm:$0xf]  ;;  %v8952_v38 = vld [vmem:[%s15197_s6 + $0xd8] sm:$0xf0] }
 0x374   : > { %4672 = vmatpush.bf16.msra.mxu0 %v8759_v24  ;;  %4658 = vmatpush.bf16.msrb.mxu2 %v8631_v28  ;;  %v8950_v24 = vld [vmem:[%s15197_s6 + $0xd0] sm:$0xf]  ;;  %v10381_v28 = vld [vmem:[%s15197_s6 + $0xd4] sm:$0xf0]  ;;  %v8863_v30 = vor.u32 %v10359_v45, %v8862_v32  ;;  %v8955_v21 = vor.u32 %v10380_v56, %v8952_v38  ;;  %v10399_v56 = vld [vmem:[%s15197_s6 + $0x164] sm:$0xf0] }
 0x375   : > { %v8951_v43 = vor.u32 %v10381_v28, %v8950_v24  ;;  %v10373_v24 = vld [vmem:[%s15197_s6 + $0x94] sm:$0xf0]  ;;  %v10378_v28 = vld [vmem:[%s15197_s6 + $0xc4] sm:$0xf]  ;;  %v9054_v38 = vld [vmem:[%s15197_s6 + $0x1a0] sm:$0xf] }
 0x376   : > { %8842 = vmatmul.msk.bf16.vlgmr.msra.gmra.mxu1 %vm2729_vm9, %v13837_v31  ;;  %4631 = vmatmul.bf16.vlgmr.msra.gmra.mxu3 %v13889_v12  ;;  %v14015_v49 = vpop.f32.mrf.mxu0 }
 0x377   : > { %8843 = vmatmul.msk.bf16.vlgmr.msra.gmra.mxu0 %vm2729_vm9, %v13837_v31  ;;  %4659 = vmatmul.bf16.vlgmr.msrb.gmra.mxu2 %v13889_v12  ;;  %v14021_v31 = vpop.f32.mrf.mxu2 }
 0x378   : > { %5056 = vmatpush.bf16.msrb.mxu1 %v8903_v5  ;;  %5070 = vmatpush.bf16.msrb.mxu3 %v8967_v14 }
 0x37c   : > { %5071 = vmatpush.bf16.msrb.mxu3 %v8959_v33  ;;  %v8918_v33 = vld [vmem:[%s15197_s6 + $0x90] sm:$0xf] }
 0x380   : > { %5072 = vmatpush.bf16.msrb.mxu3 %v8951_v43  ;;  %v8944_v43 = vld [vmem:[%s15197_s6 + $0xc8] sm:$0xf0] }
 0x383   : > { %v3670_v40 = vpop.f32.mrf.mxu1 }
 0x386   : > { %v3698_v12 = vpop.f32.mrf.mxu0 }
 0x389   : > { %v3656_v3 = vpop.f32.mrf.mxu3 }
 0x38a   : > { %v3671_v26 = vadd.f32 %v3670_v40, %v3656_v3  ;;  %v8855_v40 = vor.u32 %v10357_v23, %v8854_v50  ;;  %v10379_v3 = vld [vmem:[%s15197_s6 + $0xc4] sm:$0xf0]  ;;  %v8910_v50 = vld [vmem:[%s15197_s6 + $0x80] sm:$0xf] }
 0x38b   : > { %v14087_v41 = vpop.f32.mrf.mxu1  ;;  %v10371_v23 = vld [vmem:[%s15197_s6 + $0x84] sm:$0xf0] }
 0x38c   : > { %v3684_v6 = vpop.f32.mrf.mxu2  ;;  %v14024_v16 = vadd.f32 %v3671_v26, %v13919_v0  ;;  %v10367_v0 = vld [vmem:[%s15197_s6 + $0x64] sm:$0xf0]  ;;  %v8846_v26 = vld [vmem:[%s15197_s6] sm:$0xf] }
 0x38d   : > { %v3699_v46 = vadd.f32 %v3698_v12, %v3684_v6  ;;  %v8895_v35 = vor.u32 %v10367_v0, %v8894_v10  ;;  %v8942_v12 = vld [vmem:[%s15197_s6 + $0xc0] sm:$0xf]  ;;  %v10355_v6 = vld [vmem:[%s15197_s6 + $0x4] sm:$0xf0]  ;;  %v8934_v10 = vld [vmem:[%s15197_s6 + $0xb0] sm:$0xf] }
 0x38e   : > { %v3700_v36 = vpop.f32.mrf.mxu0  ;;  %v8847_v5 = vor.u32 %v10355_v6, %v8846_v26  ;;  %v10377_v0 = vld [vmem:[%s15197_s6 + $0xb4] sm:$0xf0]  ;;  %v9062_v26 = vld [vmem:[%s15197_s6 + $0x1b0] sm:$0xf]  ;;  %v8911_v6 = vor.u32 %v10371_v23, %v8910_v50  ;;  %v10374_v50 = vld [vmem:[%s15197_s6 + $0xa4] sm:$0xf] }
 0x38f   : > { %v14036_v19 = vadd.f32 %v3699_v46, %v13930_v58  ;;  %5057 = vmatpush.bf16.msrb.mxu1 %v8895_v35  ;;  %v8887_v58 = vor.u32 %v10365_v37, %v8886_v42  ;;  %v8943_v46 = vor.u32 %v10379_v3, %v8942_v12  ;;  %v8971_v35 = vor.u32 %v10384_v18, %v8968_v48  ;;  %v10382_v37 = vld [vmem:[%s15197_s6 + $0xe4] sm:$0xf]  ;;  %v10401_v3 = vld [vmem:[%s15197_s6 + $0x174] sm:$0xf0]  ;;  %v10400_v48 = vld [vmem:[%s15197_s6 + $0x174] sm:$0xf] }
 0x390   : > { %v8935_v42 = vor.u32 %v10377_v0, %v8934_v10  ;;  %v8947_v12 = vor.u32 %v10378_v28, %v8944_v43  ;;  %v10409_v18 = vld [vmem:[%s15197_s6 + $0x1b4] sm:$0xf0]  ;;  %v9032_v10 = vld [vmem:[%s15197_s6 + $0x178] sm:$0xf0]  ;;  %v9024_v28 = vld [vmem:[%s15197_s6 + $0x168] sm:$0xf0] }
 0x391   : > { %v14085_v34 = vpop.f32.mrf.mxu3  ;;  %5073 = vmatpush.bf16.msrb.mxu3 %v8943_v46  ;;  %v9035_v0 = vor.u32 %v10400_v48, %v9032_v10  ;;  %v8928_v23 = vld [vmem:[%s15197_s6 + $0xa8] sm:$0xf0]  ;;  %v10396_v48 = vld [vmem:[%s15197_s6 + $0x154] sm:$0xf]  ;;  %v9016_v10 = vld [vmem:[%s15197_s6 + $0x158] sm:$0xf0] }
 0x393   : > { %5058 = vmatpush.bf16.msrb.mxu1 %v8887_v58  ;;  %v10375_v58 = vld [vmem:[%s15197_s6 + $0xa4] sm:$0xf0] }
 0x394   : > { %v3686_v13 = vpop.f32.mrf.mxu2 }
 0x395   : > { %v14047_v55 = vadd.f32 %v3700_v36, %v3686_v13  ;;  %v8960_v36 = vld [vmem:[%s15197_s6 + $0xe8] sm:$0xf0]  ;;  %v8926_v13 = vld [vmem:[%s15197_s6 + $0xa0] sm:$0xf]  ;;  %5074 = vmatpush.bf16.msrb.mxu3 %v8935_v42  ;;  %v8936_v42 = vld [vmem:[%s15197_s6 + $0xb8] sm:$0xf0] }
 0x396   : > { %v8963_v11 = vor.u32 %v10382_v37, %v8960_v36  ;;  %v8927_v14 = vor.u32 %v10375_v58, %v8926_v13 }
 0x397   : > { %5059 = vmatpush.bf16.msrb.mxu1 %v8879_v63 }
 0x399   : > { %5075 = vmatpush.bf16.msrb.mxu3 %v8927_v14  ;;  %v9022_v14 = vld [vmem:[%s15197_s6 + $0x160] sm:$0xf] }
 0x39b   : > { %5060 = vmatpush.bf16.msrb.mxu1 %v8871_v25 }
 0x39f   : > { %5061 = vmatpush.bf16.msrb.mxu1 %v8863_v30  ;;  %v8919_v30 = vor.u32 %v10373_v24, %v8918_v33  ;;  %v10407_v33 = vld [vmem:[%s15197_s6 + $0x1a4] sm:$0xf0]  ;;  %v10398_v24 = vld [vmem:[%s15197_s6 + $0x164] sm:$0xf] }
 0x3a0   : > { %v9027_v43 = vor.u32 %v10398_v24, %v9024_v28  ;;  %v10403_v24 = vld [vmem:[%s15197_s6 + $0x184] sm:$0xf0]  ;;  %v10368_v28 = vld [vmem:[%s15197_s6 + $0x74] sm:$0xf] }
 0x3a1   : > { %v14131_v15 = vpop.f32.mrf.mxu3  ;;  %5076 = vmatpush.bf16.msrb.mxu3 %v8919_v30  ;;  %v9055_v30 = vor.u32 %v10407_v33, %v9054_v38  ;;  %v9038_v33 = vld [vmem:[%s15197_s6 + $0x180] sm:$0xf] }
 0x3a3   : > { %5062 = vmatpush.bf16.msrb.mxu1 %v8855_v40  ;;  %v14135_v22 = vpop.f32.mrf.mxu1  ;;  %v9030_v40 = vld [vmem:[%s15197_s6 + $0x170] sm:$0xf] }
 0x3a4   : > { %v14133_v54 = vpop.f32.mrf.mxu2  ;;  %v9031_v46 = vor.u32 %v10401_v3, %v9030_v40  ;;  %v8931_v40 = vor.u32 %v10374_v50, %v8928_v23  ;;  %v10397_v3 = vld [vmem:[%s15197_s6 + $0x154] sm:$0xf0]  ;;  %v8904_v50 = vld [vmem:[%s15197_s6 + $0x78] sm:$0xf0]  ;;  %v10394_v23 = vld [vmem:[%s15197_s6 + $0x144] sm:$0xf] }
 0x3a5   : > { %5077 = vmatpush.bf16.msrb.mxu3 %v8911_v6  ;;  %v10405_v6 = vld [vmem:[%s15197_s6 + $0x194] sm:$0xf0] }
 0x3a6   : > { %v14137_v63 = vpop.f32.mrf.mxu0  ;;  %5084 = vmatpush.bf16.msrb.mxu0 %v9031_v46 }
 0x3a7   : > { %5063 = vmatpush.bf16.msrb.mxu1 %v8847_v5  ;;  %v9063_v5 = vor.u32 %v10409_v18, %v9062_v26  ;;  %v9046_v26 = vld [vmem:[%s15197_s6 + $0x190] sm:$0xf] }
 0x3a8   : > { %v9047_v18 = vor.u32 %v10405_v6, %v9046_v26  ;;  %v10370_v26 = vld [vmem:[%s15197_s6 + $0x84] sm:$0xf]  ;;  %v8912_v6 = vld [vmem:[%s15197_s6 + $0x88] sm:$0xf0] }
 0x3a9   : > { %v14145_v25 = vpop.f32.mrf.mxu3  ;;  %5102 = vmatpush.bf16.msra.mxu2 %v9063_v5  ;;  %5140 = vmatpush.bf16.msra.mxu3 %v9035_v0  ;;  %v10372_v5 = vld [vmem:[%s15197_s6 + $0x94] sm:$0xf] }
 0x3ab   : > { %5126 = vmatpush.bf16.msra.mxu1 %v8971_v35  ;;  %v14149_v32 = vpop.f32.mrf.mxu1  ;;  %v10376_v35 = vld [vmem:[%s15197_s6 + $0xb4] sm:$0xf] }
 0x3ac   : > { %v14147_v47 = vpop.f32.mrf.mxu2  ;;  %v8939_v36 = vor.u32 %v10376_v35, %v8936_v42  ;;  %v9019_v35 = vor.u32 %v10396_v48, %v9016_v10  ;;  %v8920_v42 = vld [vmem:[%s15197_s6 + $0x98] sm:$0xf0]  ;;  %v8907_v48 = vor.u32 %v10368_v28, %v8904_v50  ;;  %v8915_v10 = vor.u32 %v10370_v26, %v8912_v6  ;;  %v10390_v50 = vld [vmem:[%s15197_s6 + $0x124] sm:$0xf]  ;;  %v10364_v26 = vld [vmem:[%s15197_s6 + $0x54] sm:$0xf] }
 0x3ad   : > { %5103 = vmatpush.bf16.msra.mxu2 %v9055_v30  ;;  %5141 = vmatpush.bf16.msra.mxu3 %v9027_v43  ;;  %v8888_v6 = vld [vmem:[%s15197_s6 + $0x58] sm:$0xf0] }
 0x3ae   : > { %v14151_v45 = vpop.f32.mrf.mxu0 }
 0x3af   : > { %5127 = vmatpush.bf16.msra.mxu1 %v8963_v11 }
 0x3b1   : > { %5104 = vmatpush.bf16.msra.mxu2 %v9047_v18  ;;  %5142 = vmatpush.bf16.msra.mxu3 %v9019_v35  ;;  %v10393_v18 = vld [vmem:[%s15197_s6 + $0x134] sm:$0xf0]  ;;  %v8896_v35 = vld [vmem:[%s15197_s6 + $0x68] sm:$0xf0] }
 0x3b3   : > { %5128 = vmatpush.bf16.msra.mxu1 %v8955_v21  ;;  %v9023_v21 = vor.u32 %v10399_v56, %v9022_v14  ;;  %v10395_v14 = vld [vmem:[%s15197_s6 + $0x144] sm:$0xf0] }
 0x3b5   : > { %5085 = vmatpush.bf16.msrb.mxu0 %v9023_v21  ;;  %v8923_v21 = vor.u32 %v10372_v5, %v8920_v42  ;;  %v10366_v5 = vld [vmem:[%s15197_s6 + $0x64] sm:$0xf]  ;;  %v10392_v42 = vld [vmem:[%s15197_s6 + $0x134] sm:$0xf] }
 0x3b7   : > { %5129 = vmatpush.bf16.msra.mxu1 %v8947_v12  ;;  %v9014_v12 = vld [vmem:[%s15197_s6 + $0x150] sm:$0xf] }
 0x3b8   : > { %v9015_v46 = vor.u32 %v10397_v3, %v9014_v12  ;;  %v9008_v12 = vld [vmem:[%s15197_s6 + $0x148] sm:$0xf0] }
 0x3b9   : > { %v9011_v3 = vor.u32 %v10394_v23, %v9008_v12  ;;  %v8992_v23 = vld [vmem:[%s15197_s6 + $0x128] sm:$0xf0]  ;;  %v2759_v12 = vadd.f32 %v13502_v52, %v13500_v7  ;;  %v3617_v52 = vadd.f32 %v14017_v20, %v14019_v51  ;;  %v8982_v51 = vld [vmem:[%s15197_s6 + $0x110] sm:$0xf] }
 0x3ba   : > { %5086 = vmatpush.bf16.msrb.mxu0 %v9015_v46  ;;  %v8998_v46 = vld [vmem:[%s15197_s6 + $0x130] sm:$0xf] }
 0x3bb   : > { %v14197_v13 = vpop.f32.mrf.mxu1  ;;  %5130 = vmatpush.bf16.msra.mxu1 %v8939_v36  ;;  %v9006_v36 = vld [vmem:[%s15197_s6 + $0x140] sm:$0xf]  ;;  %5143 = vmatpush.bf16.msra.mxu3 %v9011_v3  ;;  %v3140_v7 = vadd.f32 %v13858_v29, %v2759_v12 }
 0x3bc   : > { %v9007_v43 = vor.u32 %v10395_v14, %v9006_v36  ;;  %v8999_v36 = vor.u32 %v10393_v18, %v8998_v46  ;;  %v9000_v14 = vld [vmem:[%s15197_s6 + $0x138] sm:$0xf0]  ;;  %v2787_v46 = vadd.f32 %v13553_v44, %v13551_v53  ;;  %v14343_v29 = vld [vmem:[%s15196_s5] sm:$0xf] }
 0x3bd   : > { %v3154_v44 = vadd.f32 %v13834_v27, %v3140_v7  ;;  %v4114_v27 = vadd.f32 %v14145_v25, %v14149_v32  ;;  %v10388_v25 = vld [vmem:[%s15197_s6 + $0x114] sm:$0xf]  ;;  %v8984_v32 = vld [vmem:[%s15197_s6 + $0x118] sm:$0xf0]  ;;  %v8976_v7 = vld [vmem:[%s15197_s6 + $0x108] sm:$0xf0] }
 0x3be   : > { %v14201_v11 = vpop.f32.mrf.mxu0  ;;  %5087 = vmatpush.bf16.msrb.mxu0 %v9007_v43  ;;  %v8899_v43 = vor.u32 %v10366_v5, %v8896_v35  ;;  %v4140_v5 = vadd.f32 %v14133_v54, %v14137_v63  ;;  %v8995_v35 = vor.u32 %v10390_v50, %v8992_v23  ;;  %v3168_v53 = vadd.f32 %v13862_v62, %v2787_v46  ;;  %v10389_v54 = vld [vmem:[%s15197_s6 + $0x114] sm:$0xf0] }
 0x3bf   : > { %5131 = vmatpush.bf16.msra.mxu1 %v8931_v40  ;;  %v9039_v40 = vor.u32 %v10403_v24, %v9038_v33  ;;  %v8990_v33 = vld [vmem:[%s15197_s6 + $0x120] sm:$0xf]  ;;  %v10391_v24 = vld [vmem:[%s15197_s6 + $0x124] sm:$0xf0]  ;;  %v4690_v50 = vperm.slane %v14343_v29, 1 }
 0x3c0   : > { %v8991_v18 = vor.u32 %v10391_v24, %v8990_v33  ;;  %v3182_v63 = vadd.f32 %v13848_v61, %v3168_v53  ;;  %v8974_v33 = vld [vmem:[%s15197_s6 + $0x100] sm:$0xf]  ;;  %v4689_v24 = vperm.slane %v14343_v29, 0 }
 0x3c1   : > { %v14195_v37 = vpop.f32.mrf.mxu3  ;;  %5105 = vmatpush.bf16.msra.mxu2 %v9039_v40 }
 0x3c2   : > { %5088 = vmatpush.bf16.msrb.mxu0 %v8999_v36  ;;  %v3707_v36 = vadd.f32 %v3617_v52, %v3154_v44 }
 0x3c3   : > { %v14259_v56 = vpop.f32.mrf.mxu1  ;;  %5132 = vmatpush.bf16.msra.mxu1 %v8923_v21  ;;  %v9003_v21 = vor.u32 %v10392_v42, %v9000_v14  ;;  %v8891_v14 = vor.u32 %v10364_v26, %v8888_v6 }
 0x3c4   : > { %v14199_v58 = vpop.f32.mrf.mxu2 }
 0x3c5   : > { %5112 = vmatpush.bf16.msrb.mxu2 %v8907_v48  ;;  %v4112_v48 = vadd.f32 %v14131_v15, %v14135_v22  ;;  %5144 = vmatpush.bf16.msra.mxu3 %v9003_v21  ;;  %v3645_v15 = vadd.f32 %v14021_v31, %v14015_v49  ;;  %v8983_v49 = vor.u32 %v10389_v54, %v8982_v51  ;;  %v10362_v31 = vld [vmem:[%s15197_s6 + $0x44] sm:$0xf]  ;;  %v8880_v22 = vld [vmem:[%s15197_s6 + $0x48] sm:$0xf0] }
 0x3c6   : > { %v14272_v30 = vpop.f32.mrf.mxu0  ;;  %5089 = vmatpush.bf16.msrb.mxu0 %v8991_v18  ;;  %v4201_v21 = vadd.f32 %v4140_v5, %v14013_v1  ;;  %v8883_v1 = vor.u32 %v10362_v31, %v8880_v22  ;;  %v10386_v18 = vld [vmem:[%s15197_s6 + $0x104] sm:$0xf]  ;;  %v9344_v22 = vld [vmem:[%s15197_s6 + $0x370] sm:$0xf] }
 0x3c7   : > { %5133 = vmatpush.bf16.msra.mxu1 %v8915_v10  ;;  %v4200_v62 = vadd.f32 %v4112_v48, %v14010_v59  ;;  %v4142_v59 = vadd.f32 %v14147_v47, %v14151_v45  ;;  %v10387_v47 = vld [vmem:[%s15197_s6 + $0x104] sm:$0xf0]  ;;  %v3708_v45 = vadd.f32 %v3645_v15, %v3182_v63  ;;  %v10465_v63 = vld [vmem:[%s15197_s6 + $0x374] sm:$0xf0] }
 0x3c8   : > { %v8975_v48 = vor.u32 %v10387_v47, %v8974_v33  ;;  %v9056_v47 = vld [vmem:[%s15197_s6 + $0x1a8] sm:$0xf0] }
 0x3c9   : > { %v14248_v0 = vpop.f32.mrf.mxu3  ;;  %5113 = vmatpush.bf16.msrb.mxu2 %v8899_v43  ;;  %5145 = vmatpush.bf16.msra.mxu3 %v8995_v35  ;;  %v4205_v52 = vadd.f32 %v4142_v59, %v3708_v45  ;;  %v8979_v35 = vor.u32 %v10386_v18, %v8976_v7  ;;  %v9296_v7 = vld [vmem:[%s15197_s6 + $0x310] sm:$0xf] }
 0x3ca   : > { %5090 = vmatpush.bf16.msrb.mxu0 %v8983_v49  ;;  %v10457_v49 = vld [vmem:[%s15197_s6 + $0x334] sm:$0xf0] }
 0x3cc   : > { %v14261_v38 = vpop.f32.mrf.mxu2 }
 0x3cd   : > { %5114 = vmatpush.bf16.msrb.mxu2 %v8891_v14  ;;  %v9064_v14 = vld [vmem:[%s15197_s6 + $0x1b8] sm:$0xf0] }
 0x3ce   : > { %5091 = vmatpush.bf16.msrb.mxu0 %v8975_v48 }
 0x3d1   : > { %5115 = vmatpush.bf16.msrb.mxu2 %v8883_v1  ;;  %v9304_v1 = vld [vmem:[%s15197_s6 + $0x320] sm:$0xf] }
 0x3d9   : > { %v4590_v28 = vpop.f32.mrf.mxu3 }
 0x3db   : > { %v4576_v3 = vpop.f32.mrf.mxu1 }
 0x3dc   : > { %v4618_v40 = vpop.f32.mrf.mxu2  ;;  %v4591_v42 = vadd.f32 %v4590_v28, %v4576_v3  ;;  %v8987_v28 = vor.u32 %v10388_v25, %v8984_v32  ;;  %v4204_v3 = vadd.f32 %v4114_v27, %v3707_v36  ;;  %v9312_v27 = vld [vmem:[%s15197_s6 + $0x330] sm:$0xf]  ;;  %v10358_v36 = vld [vmem:[%s15197_s6 + $0x24] sm:$0xf]  ;;  %v8864_v25 = vld [vmem:[%s15197_s6 + $0x28] sm:$0xf0] }
 0x3dd   : > { %v10406_v32 = vld [vmem:[%s15197_s6 + $0x1a4] sm:$0xf] }
 0x3de   : > { %v4604_v10 = vpop.f32.mrf.mxu0  ;;  %v4679_v61 = vadd.f32 %v4591_v42, %v4200_v62  ;;  %5146 = vmatpush.bf16.msra.mxu3 %v8987_v28  ;;  %v10408_v42 = vld [vmem:[%s15197_s6 + $0x1b4] sm:$0xf]  ;;  %v8867_v28 = vor.u32 %v10358_v36, %v8864_v25  ;;  %v10459_v36 = vld [vmem:[%s15197_s6 + $0x344] sm:$0xf0]  ;;  %v2843_v25 = vadd.f32 %v13667_v39, %v13665_v4  ;;  %v4196_v39 = vadd.f32 %v14201_v11, %v14199_v58 }
 0x3df   : > { %v4619_v20 = vadd.f32 %v4618_v40, %v4604_v10  ;;  %v10360_v40 = vld [vmem:[%s15197_s6 + $0x34] sm:$0xf]  ;;  %v8872_v10 = vld [vmem:[%s15197_s6 + $0x38] sm:$0xf0]  ;;  %v10447_v58 = vld [vmem:[%s15197_s6 + $0x2e4] sm:$0xf0] }
 0x3e0   : > { %v4697_v53 = vadd.f32 %v4689_v24, %v4679_v61  ;;  %v8875_v15 = vor.u32 %v10360_v40, %v8872_v10  ;;  %v10463_v40 = vld [vmem:[%s15197_s6 + $0x364] sm:$0xf0]  ;;  %v9048_v10 = vld [vmem:[%s15197_s6 + $0x198] sm:$0xf0]  ;;  %v3224_v4 = vadd.f32 %v14001_v2, %v2843_v25  ;;  %v9272_v2 = vld [vmem:[%s15197_s6 + $0x2e0] sm:$0xf] }
 0x3e1   : > { %v4680_v43 = vadd.f32 %v4619_v20, %v4201_v21  ;;  %v4592_v23 = vpop.f32.mrf.mxu3  ;;  %v9067_v20 = vor.u32 %v10408_v42, %v9064_v14  ;;  %v9328_v14 = vld [vmem:[%s15197_s6 + $0x350] sm:$0xf] }
 0x3e2   : > { %5147 = vmatpush.bf16.msra.mxu3 %v8979_v35  ;;  %v4705_v21 = vmax.f32 %v4697_v53, 0.0  ;;  %5116 = vmatpush.bf16.msrb.mxu2 %v8875_v15  ;;  %v8848_v53 = vld [vmem:[%s15197_s6 + $0x8] sm:$0xf0]  ;;  %v10402_v15 = vld [vmem:[%s15197_s6 + $0x184] sm:$0xf] }
 0x3e3   : > { %v4578_v12 = vpop.f32.mrf.mxu1  ;;  %v4698_v51 = vadd.f32 %v4690_v50, %v4680_v43  ;;  %5158 = vmatpush.bf16.msra.mxu0 %v9067_v20  ;;  %v10455_v43 = vld [vmem:[%s15197_s6 + $0x324] sm:$0xf0]  ;;  %v9040_v20 = vld [vmem:[%s15197_s6 + $0x188] sm:$0xf0] }
 0x3e4   : > { %v4620_v26 = vpop.f32.mrf.mxu2  ;;  %v4593_v6 = vadd.f32 %v4592_v23, %v4578_v12  ;;  %v9059_v23 = vor.u32 %v10406_v32, %v9056_v47  ;;  %v9336_v12 = vld [vmem:[%s15197_s6 + $0x360] sm:$0xf]  ;;  %v9305_v18 = vor.u32 %v10455_v43, %v9304_v1 }
 0x3e5   : > { %v4706_v33 = vmax.f32 %v4698_v51, 0.0  ;;  %v9337_v35 = vor.u32 %v10463_v40, %v9336_v12  ;;  %v4692_v40 = vperm.slane %v14343_v29, 3 }
 0x3e6   : > { %v4606_v46 = vpop.f32.mrf.mxu0  ;;  %v4683_v44 = vadd.f32 %v4593_v6, %v4204_v3  ;;  %v8856_v6 = vld [vmem:[%s15197_s6 + $0x18] sm:$0xf0]  ;;  %5117 = vmatpush.bf16.msrb.mxu2 %v8867_v28  ;;  %v9280_v28 = vld [vmem:[%s15197_s6 + $0x2f0] sm:$0xf] }
 0x3e7   : > { %v4621_v5 = vadd.f32 %v4620_v26, %v4606_v46  ;;  %v10356_v26 = vld [vmem:[%s15197_s6 + $0x14] sm:$0xf]  ;;  %5159 = vmatpush.bf16.msra.mxu0 %v9059_v23  ;;  %v4170_v23 = vadd.f32 %v14259_v56, %v14248_v0  ;;  %v4691_v0 = vperm.slane %v14343_v29, 2 }
 0x3e8   : > { %v4701_v62 = vadd.f32 %v4689_v24, %v4683_v44  ;;  %v9313_v24 = vor.u32 %v10457_v49, %v9312_v27  ;;  %v10404_v46 = vld [vmem:[%s15197_s6 + $0x194] sm:$0xf]  ;;  %v8859_v48 = vor.u32 %v10356_v26, %v8856_v6  ;;  %v10461_v44 = vld [vmem:[%s15197_s6 + $0x354] sm:$0xf0]  ;;  %v10451_v27 = vld [vmem:[%s15197_s6 + $0x304] sm:$0xf0] }
 0x3e9   : > { %v4684_v54 = vadd.f32 %v4621_v5, %v4205_v52  ;;  %v10354_v52 = vld [vmem:[%s15197_s6 + $0x4] sm:$0xf]  ;;  %v10453_v5 = vld [vmem:[%s15197_s6 + $0x314] sm:$0xf0]  ;;  %v9051_v42 = vor.u32 %v10404_v46, %v9048_v10  ;;  %v9329_v49 = vor.u32 %v10461_v44, %v9328_v14  ;;  %v9184_v14 = vld [vmem:[%s15197_s6 + $0x230] sm:$0xf] }
 0x3ea   : > { %v4709_v59 = vmax.f32 %v4701_v62, 0.0  ;;  %5118 = vmatpush.bf16.msrb.mxu2 %v8859_v48  ;;  %v8851_v51 = vor.u32 %v10354_v52, %v8848_v53  ;;  %v9288_v62 = vld [vmem:[%s15197_s6 + $0x300] sm:$0xf]  ;;  %v10425_v53 = vld [vmem:[%s15197_s6 + $0x234] sm:$0xf0] }
 0x3eb   : > { %v4702_v31 = vadd.f32 %v4690_v50, %v4684_v54  ;;  %v9345_v50 = vor.u32 %v10465_v63, %v9344_v22  ;;  %v9297_v54 = vor.u32 %v10453_v5, %v9296_v7  ;;  %5160 = vmatpush.bf16.msra.mxu0 %v9051_v42  ;;  %v9320_v63 = vld [vmem:[%s15197_s6 + $0x340] sm:$0xf]  ;;  %v9248_v44 = vld [vmem:[%s15197_s6 + $0x2b0] sm:$0xf] }
 0x3ec   : > { %v14423_v45 = vpack.c.bf16 %v4709_v59, %v4705_v21  ;;  %v2815_v21 = vadd.f32 %v13624_v9, %v13622_v8  ;;  %v10449_v8 = vld [vmem:[%s15197_s6 + $0x2f4] sm:$0xf0]  ;;  %v9321_v9 = vor.u32 %v10459_v36, %v9320_v63  ;;  %v9185_v36 = vor.u32 %v10425_v53, %v9184_v14  ;;  %v9154_v14 = vld [vmem:[%s15197_s6 + $0x1f8] sm:$0xf0] }
 0x3ed   : > { %v4710_v61 = vmax.f32 %v4702_v31, 0.0  ;;  %v9043_v31 = vor.u32 %v10402_v15, %v9040_v20  ;;  %v9281_v47 = vor.u32 %v10449_v8, %v9280_v28  ;;  %v10441_v20 = vld [vmem:[%s15197_s6 + $0x2b4] sm:$0xf0]  ;;  %v9240_v8 = vld [vmem:[%s15197_s6 + $0x2a0] sm:$0xf] }
 0x3ee   : > { %5064 = vmatmul.bf16.vlgmr.msrb.gmra.mxu1 %v14423_v45  ;;  %5119 = vmatpush.bf16.msrb.mxu2 %v8851_v51  ;;  %v10424_v51 = vld [vmem:[%s15197_s6 + $0x234] sm:$0xf] }
 0x3ef   : > { %v14434_v3 = vpack.c.bf16 %v4710_v61, %v4706_v33  ;;  %5533 = vmatpush.bf16.msrb.mxu1 %v9313_v24  ;;  %v9289_v33 = vor.u32 %v10451_v27, %v9288_v62  ;;  %v3196_v61 = vadd.f32 %v13997_v60, %v2815_v21  ;;  %v4168_v24 = vadd.f32 %v14197_v13, %v14195_v37  ;;  %v10464_v21 = vld [vmem:[%s15197_s6 + $0x374] sm:$0xf] }
 0x3f0   : > { %5161 = vmatpush.bf16.msra.mxu0 %v9043_v31  ;;  %v3673_v60 = vadd.f32 %v14087_v41, %v14085_v34  ;;  %v3238_v34 = vadd.f32 %v13999_v17, %v3224_v4  ;;  %v4203_v41 = vadd.f32 %v4196_v39, %v14036_v19  ;;  %v9273_v17 = vor.u32 %v10447_v58, %v9272_v2  ;;  %v10443_v31 = vld [vmem:[%s15197_s6 + $0x2c4] sm:$0xf0]  ;;  %v10422_v4 = vld [vmem:[%s15197_s6 + $0x224] sm:$0xf]  ;;  %v9178_v39 = vld [vmem:[%s15197_s6 + $0x228] sm:$0xf0] }
 0x3f1   : > { %5078 = vmatmul.bf16.vlgmr.msrb.gmra.mxu3 %v14434_v3  ;;  %v3210_v43 = vadd.f32 %v13995_v57, %v3196_v61  ;;  %v4198_v57 = vadd.f32 %v14272_v30, %v14261_v38  ;;  %v9264_v38 = vld [vmem:[%s15197_s6 + $0x2d0] sm:$0xf]  ;;  %v10445_v30 = vld [vmem:[%s15197_s6 + $0x2d4] sm:$0xf0]  ;;  %v9176_v61 = vld [vmem:[%s15197_s6 + $0x220] sm:$0xf]  ;;  %v9181_v2 = vor.u32 %v10422_v4, %v9178_v39 }
 0x3f2   : > { %5551 = vmatpush.bf16.msrb.mxu3 %v9345_v50  ;;  %v4202_v50 = vadd.f32 %v4168_v24, %v14024_v16  ;;  %v3710_v56 = vadd.f32 %v14047_v55, %v3238_v34  ;;  %v10423_v24 = vld [vmem:[%s15197_s6 + $0x224] sm:$0xf0]  ;;  %v9232_v58 = vld [vmem:[%s15197_s6 + $0x290] sm:$0xf]  ;;  %v10437_v34 = vld [vmem:[%s15197_s6 + $0x294] sm:$0xf0] }
 0x3f3   : > { %5534 = vmatpush.bf16.msrb.mxu1 %v9305_v18  ;;  %v4646_v22 = vpop.f32.mrf.mxu1  ;;  %v3709_v16 = vadd.f32 %v3673_v60, %v3210_v43  ;;  %v10411_v4 = vld [vmem:[%s15197_s6 + $0x1c4] sm:$0xf0]  ;;  %v9192_v39 = vld [vmem:[%s15197_s6 + $0x240] sm:$0xf] }
 0x3f4   : > { %v4674_v59 = vpop.f32.mrf.mxu0  ;;  %v4207_v55 = vadd.f32 %v4198_v57, %v3710_v56  ;;  %v9170_v57 = vld [vmem:[%s15197_s6 + $0x218] sm:$0xf0] }
 0x3f5   : > { %v4206_v46 = vadd.f32 %v4170_v23, %v3709_v16  ;;  %v10421_v23 = vld [vmem:[%s15197_s6 + $0x214] sm:$0xf0]  ;;  %v9330_v56 = vld [vmem:[%s15197_s6 + $0x358] sm:$0xf0] }
 0x3f6   : > { %5552 = vmatpush.bf16.msrb.mxu3 %v9337_v35  ;;  %v9265_v35 = vor.u32 %v10445_v30, %v9264_v38 }
 0x3f7   : > { %5535 = vmatpush.bf16.msrb.mxu1 %v9297_v54  ;;  %v9186_v54 = vld [vmem:[%s15197_s6 + $0x238] sm:$0xf0] }
 0x3f9   : > { %v4632_v32 = vpop.f32.mrf.mxu3 }
 0x3fa   : > { %v4660_v1 = vpop.f32.mrf.mxu2  ;;  %5553 = vmatpush.bf16.msrb.mxu3 %v9329_v49  ;;  %v4647_v37 = vadd.f32 %v4646_v22, %v4632_v32  ;;  %v9256_v49 = vld [vmem:[%s15197_s6 + $0x2c0] sm:$0xf]  ;;  %v9249_v32 = vor.u32 %v10441_v20, %v9248_v44 }
 0x3fb   : > { %v4675_v13 = vadd.f32 %v4674_v59, %v4660_v1  ;;  %5536 = vmatpush.bf16.msrb.mxu1 %v9289_v33  ;;  %v4648_v26 = vpop.f32.mrf.mxu1  ;;  %v9346_v59 = vld [vmem:[%s15197_s6 + $0x378] sm:$0xf0]  ;;  %v9189_v33 = vor.u32 %v10424_v51, %v9186_v54  ;;  %v9257_v28 = vor.u32 %v10443_v31, %v9256_v49  ;;  %v9144_v20 = vld [vmem:[%s15197_s6 + $0x1e0] sm:$0xf]  ;;  %v10415_v51 = vld [vmem:[%s15197_s6 + $0x1e4] sm:$0xf0] }
 0x3fc   : > { %v4681_v11 = vadd.f32 %v4647_v37, %v4202_v50  ;;  %v4676_v19 = vpop.f32.mrf.mxu0  ;;  %v9349_v60 = vor.u32 %v10464_v21, %v9346_v59  ;;  %v9177_v37 = vor.u32 %v10423_v24, %v9176_v61  ;;  %v9168_v50 = vld [vmem:[%s15197_s6 + $0x210] sm:$0xf]  ;;  %v10414_v49 = vld [vmem:[%s15197_s6 + $0x1e4] sm:$0xf]  ;;  %v9146_v31 = vld [vmem:[%s15197_s6 + $0x1e8] sm:$0xf0] }
 0x3fd   : > { %v4682_v12 = vadd.f32 %v4675_v13, %v4203_v41  ;;  %v10462_v13 = vld [vmem:[%s15197_s6 + $0x364] sm:$0xf]  ;;  %v10420_v41 = vld [vmem:[%s15197_s6 + $0x214] sm:$0xf]  ;;  %v10413_v21 = vld [vmem:[%s15197_s6 + $0x1d4] sm:$0xf0]  ;;  %v9149_v59 = vor.u32 %v10414_v49, %v9146_v31 }
 0x3fe   : > { %5554 = vmatpush.bf16.msrb.mxu3 %v9321_v9  ;;  %5134 = vmatmul.bf16.vlgmr.msra.gmra.mxu1 %v14434_v3  ;;  %v4699_v7 = vadd.f32 %v4691_v0, %v4681_v11  ;;  %v10439_v9 = vld [vmem:[%s15197_s6 + $0x2a4] sm:$0xf0]  ;;  %v9169_v11 = vor.u32 %v10421_v23, %v9168_v50  ;;  %v10412_v61 = vld [vmem:[%s15197_s6 + $0x1d4] sm:$0xf]  ;;  %v9138_v24 = vld [vmem:[%s15197_s6 + $0x1d8] sm:$0xf0] }
 0x3ff   : > { %5537 = vmatpush.bf16.msrb.mxu1 %v9281_v47  ;;  %v4700_v52 = vadd.f32 %v4692_v40, %v4682_v12  ;;  %v9338_v47 = vld [vmem:[%s15197_s6 + $0x368] sm:$0xf0]  ;;  %v9241_v43 = vor.u32 %v10439_v9, %v9240_v8  ;;  %v9233_v12 = vor.u32 %v10437_v34, %v9232_v58  ;;  %v9128_v8 = vld [vmem:[%s15197_s6 + $0x1c0] sm:$0xf]  ;;  %v10456_v50 = vld [vmem:[%s15197_s6 + $0x334] sm:$0xf] }
 0x400   : > { %v4707_v62 = vmax.f32 %v4699_v7, 0.0  ;;  %v9341_v16 = vor.u32 %v10462_v13, %v9338_v47  ;;  %v9216_v7 = vld [vmem:[%s15197_s6 + $0x270] sm:$0xf]  ;;  %v10410_v13 = vld [vmem:[%s15197_s6 + $0x1c4] sm:$0xf] }
 0x401   : > { %v4634_v6 = vpop.f32.mrf.mxu3  ;;  %v4708_v22 = vmax.f32 %v4700_v52, 0.0  ;;  %v10433_v52 = vld [vmem:[%s15197_s6 + $0x274] sm:$0xf0]  ;;  %v9250_v47 = vld [vmem:[%s15197_s6 + $0x2b8] sm:$0xf0] }
 0x402   : > { %v4649_v48 = vadd.f32 %v4648_v26, %v4634_v6  ;;  %v4662_v10 = vpop.f32.mrf.mxu2  ;;  %v10419_v26 = vld [vmem:[%s15197_s6 + $0x204] sm:$0xf0]  ;;  %v9173_v6 = vor.u32 %v10420_v41, %v9170_v57  ;;  %v9217_v44 = vor.u32 %v10433_v52, %v9216_v7  ;;  %v9314_v23 = vld [vmem:[%s15197_s6 + $0x338] sm:$0xf0]  ;;  %v10432_v7 = vld [vmem:[%s15197_s6 + $0x274] sm:$0xf] }
 0x403   : > { %v4677_v18 = vadd.f32 %v4676_v19, %v4662_v10  ;;  %5538 = vmatpush.bf16.msrb.mxu1 %v9273_v17  ;;  %v9224_v17 = vld [vmem:[%s15197_s6 + $0x280] sm:$0xf]  ;;  %v10418_v19 = vld [vmem:[%s15197_s6 + $0x204] sm:$0xf]  ;;  %v9317_v57 = vor.u32 %v10456_v50, %v9314_v23  ;;  %v10448_v52 = vld [vmem:[%s15197_s6 + $0x2f4] sm:$0xf] }
 0x404   : > { %v4685_v29 = vadd.f32 %v4649_v48, %v4206_v46  ;;  %v10435_v46 = vld [vmem:[%s15197_s6 + $0x284] sm:$0xf0]  ;;  %v9162_v48 = vld [vmem:[%s15197_s6 + $0x208] sm:$0xf0]  ;;  %v9266_v49 = vld [vmem:[%s15197_s6 + $0x2d8] sm:$0xf0] }
 0x405   : > { %v4686_v5 = vadd.f32 %v4677_v18, %v4207_v55  ;;  %v9225_v30 = vor.u32 %v10435_v46, %v9224_v17  ;;  %v9152_v55 = vld [vmem:[%s15197_s6 + $0x1f0] sm:$0xf]  ;;  %v10417_v18 = vld [vmem:[%s15197_s6 + $0x1f4] sm:$0xf0]  ;;  %v10452_v17 = vld [vmem:[%s15197_s6 + $0x314] sm:$0xf] }
 0x406   : > { %v4703_v42 = vadd.f32 %v4691_v0, %v4685_v29  ;;  %v10460_v0 = vld [vmem:[%s15197_s6 + $0x354] sm:$0xf]  ;;  %v9165_v29 = vor.u32 %v10418_v19, %v9162_v48  ;;  %v9153_v53 = vor.u32 %v10417_v18, %v9152_v55  ;;  %v9298_v46 = vld [vmem:[%s15197_s6 + $0x318] sm:$0xf0] }
 0x407   : > { %v4704_v15 = vadd.f32 %v4692_v40, %v4686_v5  ;;  %5539 = vmatpush.bf16.msrb.mxu1 %v9265_v35  ;;  %v9160_v40 = vld [vmem:[%s15197_s6 + $0x200] sm:$0xf]  ;;  %v9333_v10 = vor.u32 %v10460_v0, %v9330_v56  ;;  %v10458_v5 = vld [vmem:[%s15197_s6 + $0x344] sm:$0xf]  ;;  %v9322_v35 = vld [vmem:[%s15197_s6 + $0x348] sm:$0xf0]  ;;  %v9301_v48 = vor.u32 %v10452_v17, %v9298_v46 }
 0x408   : > { %v4711_v27 = vmax.f32 %v4703_v42, 0.0  ;;  %v9161_v38 = vor.u32 %v10419_v26, %v9160_v40  ;;  %v10416_v42 = vld [vmem:[%s15197_s6 + $0x1f4] sm:$0xf]  ;;  %v10454_v0 = vld [vmem:[%s15197_s6 + $0x324] sm:$0xf]  ;;  %v10493_v17 = vld [vmem:[%s15198_s7 + $0xd8] sm:$0xff] }
 0x409   : > { %v4712_v63 = vmax.f32 %v4704_v15, 0.0  ;;  %v9325_v15 = vor.u32 %v10458_v5, %v9322_v35  ;;  %v9157_v54 = vor.u32 %v10416_v42, %v9154_v14  ;;  %v9306_v56 = vld [vmem:[%s15197_s6 + $0x328] sm:$0xf0]  ;;  %v10436_v26 = vld [vmem:[%s15197_s6 + $0x294] sm:$0xf] }
 0x40a   : > { %v14558_v25 = vpack.c.bf16 %v4711_v27, %v4707_v62  ;;  %v9208_v62 = vld [vmem:[%s15197_s6 + $0x260] sm:$0xf]  ;;  %v10431_v27 = vld [vmem:[%s15197_s6 + $0x264] sm:$0xf0]  ;;  %v9309_v40 = vor.u32 %v10454_v0, %v9306_v56  ;;  %v9282_v5 = vld [vmem:[%s15197_s6 + $0x2f8] sm:$0xf0] }
 0x40b   : > { %v14566_v1 = vpack.c.bf16 %v4712_v63, %v4708_v22  ;;  %5540 = vmatpush.bf16.msrb.mxu1 %v9257_v28  ;;  %v9145_v22 = vor.u32 %v10415_v51, %v9144_v20  ;;  %v9209_v63 = vor.u32 %v10431_v27, %v9208_v62  ;;  %v9285_v42 = vor.u32 %v10448_v52, %v9282_v5  ;;  %v10430_v14 = vld [vmem:[%s15197_s6 + $0x264] sm:$0xf]  ;;  %v9202_v62 = vld [vmem:[%s15197_s6 + $0x258] sm:$0xf0]  ;;  %v10444_v27 = vld [vmem:[%s15197_s6 + $0x2d4] sm:$0xf] }
 0x40c   : > { %5092 = vmatmul.bf16.vlgmr.msrb.gmra.mxu0 %v14558_v25  ;;  %5148 = vmatmul.bf16.vlgmr.msra.gmra.mxu3 %v14558_v25  ;;  %v10468_v23 = vld [vmem:[%s15198_s7 + $0x10] sm:$0xff]  ;;  %v10505_v52 = vld [vmem:[%s15198_s7 + $0x138] sm:$0xff]  ;;  %v10474_v5 = vld [vmem:[%s15198_s7 + $0x40] sm:$0xff] }
 0x40d   : > { %9068 = vmatmul.msk.bf16.vlgmr.msra.gmra.mxu2 %vm1499_vm5, %v14566_v1  ;;  %5505 = vmatpush.bf16.msrb.mxu0 %v9185_v36  ;;  %v9136_v36 = vld [vmem:[%s15197_s6 + $0x1d0] sm:$0xf] }
 0x40e   : > { %5519 = vmatpush.bf16.msra.mxu2 %v9249_v32  ;;  %5561 = vmatpush.bf16.msra.mxu3 %v9189_v33  ;;  %v9200_v32 = vld [vmem:[%s15197_s6 + $0x250] sm:$0xf]  ;;  %v10429_v33 = vld [vmem:[%s15197_s6 + $0x254] sm:$0xf0]  ;;  %v9137_v28 = vor.u32 %v10413_v21, %v9136_v36  ;;  %v9194_v36 = vld [vmem:[%s15197_s6 + $0x248] sm:$0xf0] }
 0x40f   : > { %5607 = vmatpush.bf16.msra.mxu1 %v9349_v60  ;;  %v9201_v9 = vor.u32 %v10429_v33, %v9200_v32  ;;  %v10427_v60 = vld [vmem:[%s15197_s6 + $0x244] sm:$0xf0]  ;;  %v10442_v21 = vld [vmem:[%s15197_s6 + $0x2c4] sm:$0xf] }
 0x410   : > { %5541 = vmatmul.bf16.vlgmr.msrb.gmra.mxu1 %v14558_v25  ;;  %v9193_v58 = vor.u32 %v10427_v60, %v9192_v39 }
 0x411   : > { %5506 = vmatpush.bf16.msrb.mxu0 %v9177_v37  ;;  %v9141_v37 = vor.u32 %v10412_v61, %v9138_v24  ;;  %v10473_v24 = vld [vmem:[%s15198_s7 + $0x38] sm:$0xff] }
 0x412   : > { %5520 = vmatpush.bf16.msra.mxu2 %v9241_v43  ;;  %5562 = vmatpush.bf16.msra.mxu3 %v9181_v2  ;;  %v9130_v43 = vld [vmem:[%s15197_s6 + $0x1c8] sm:$0xf0]  ;;  %v9129_v2 = vor.u32 %v10411_v4, %v9128_v8  ;;  %v10472_v8 = vld [vmem:[%s15198_s7 + $0x30] sm:$0xff] }
 0x413   : > { %5608 = vmatpush.bf16.msra.mxu1 %v9341_v16  ;;  %v9133_v41 = vor.u32 %v10410_v13, %v9130_v43  ;;  %v10438_v16 = vld [vmem:[%s15197_s6 + $0x2a4] sm:$0xf]  ;;  %v10485_v13 = vld [vmem:[%s15198_s7 + $0x98] sm:$0xff]  ;;  %v10479_v43 = vld [vmem:[%s15198_s7 + $0x68] sm:$0xff] }
 0x415   : > { %5507 = vmatpush.bf16.msrb.mxu0 %v9169_v11  ;;  %v9242_v11 = vld [vmem:[%s15197_s6 + $0x2a8] sm:$0xf0] }
 0x416   : > { %5521 = vmatpush.bf16.msra.mxu2 %v9233_v12  ;;  %5563 = vmatpush.bf16.msra.mxu3 %v9173_v6  ;;  %v9245_v12 = vor.u32 %v10438_v16, %v9242_v11  ;;  %v9234_v6 = vld [vmem:[%s15197_s6 + $0x298] sm:$0xf0] }
 0x417   : > { %5609 = vmatpush.bf16.msra.mxu1 %v9333_v10  ;;  %v9237_v19 = vor.u32 %v10436_v26, %v9234_v6  ;;  %v10434_v10 = vld [vmem:[%s15197_s6 + $0x284] sm:$0xf]  ;;  %v10477_v16 = vld [vmem:[%s15198_s7 + $0x58] sm:$0xff] }
 0x418   : > { %v10466_v26 = vld [vmem:[%s15198_s7] sm:$0xff]  ;;  %v10481_v6 = vld [vmem:[%s15198_s7 + $0x78] sm:$0xff] }
 0x419   : > { %5508 = vmatpush.bf16.msrb.mxu0 %v9161_v38  ;;  %v9226_v38 = vld [vmem:[%s15197_s6 + $0x288] sm:$0xf0] }
 0x41a   : > { %5522 = vmatpush.bf16.msra.mxu2 %v9225_v30  ;;  %5564 = vmatpush.bf16.msra.mxu3 %v9165_v29  ;;  %v10450_v30 = vld [vmem:[%s15197_s6 + $0x304] sm:$0xf]  ;;  %v9229_v55 = vor.u32 %v10434_v10, %v9226_v38  ;;  %v9218_v29 = vld [vmem:[%s15197_s6 + $0x278] sm:$0xf0]  ;;  %v10480_v10 = vld [vmem:[%s15198_s7 + $0x70] sm:$0xff] }
 0x41b   : > { %5610 = vmatpush.bf16.msra.mxu1 %v9325_v15  ;;  %v9221_v35 = vor.u32 %v10432_v7, %v9218_v29  ;;  %v9274_v15 = vld [vmem:[%s15197_s6 + $0x2e8] sm:$0xf0]  ;;  %v10521_v7 = vld [vmem:[%s15198_s7 + $0x1b8] sm:$0xff] }
 0x41c   : > { %9069 = vmatmul.msk.bf16.vlgmr.msra.gmra.mxu0 %vm1499_vm5, %v14566_v1  ;;  %9350 = vmatmul.msk.bf16.vlgmr.msrb.gmra.mxu3 %vm1499_vm5, %v14566_v1  ;;  %v10491_v29 = vld [vmem:[%s15198_s7 + $0xc8] sm:$0xff] }
 0x41d   : > { %5120 = vmatmul.bf16.vlgmr.msrb.gmra.mxu2 %v14423_v45  ;;  %5509 = vmatpush.bf16.msrb.mxu0 %v9153_v53  ;;  %v9210_v53 = vld [vmem:[%s15197_s6 + $0x268] sm:$0xf0] }
 0x41e   : > { %5523 = vmatpush.bf16.msra.mxu2 %v9217_v44  ;;  %5565 = vmatpush.bf16.msra.mxu3 %v9157_v54  ;;  %v10446_v44 = vld [vmem:[%s15197_s6 + $0x2e4] sm:$0xf]  ;;  %v9213_v20 = vor.u32 %v10430_v14, %v9210_v53  ;;  %v10428_v54 = vld [vmem:[%s15197_s6 + $0x254] sm:$0xf]  ;;  %v10501_v14 = vld [vmem:[%s15198_s7 + $0x118] sm:$0xff] }
 0x41f   : > { %v9277_v51 = vor.u32 %v10446_v44, %v9274_v15  ;;  %v9205_v31 = vor.u32 %v10428_v54, %v9202_v62  ;;  %5747 = vmatpush.bf16.msrb.mxu1 %v10473_v24  ;;  %v10490_v15 = vld [vmem:[%s15198_s7 + $0xc0] sm:$0xff]  ;;  %v10519_v54 = vld [vmem:[%s15198_s7 + $0x1a8] sm:$0xff] }
 0x420   : > { %9351 = vmatmul.msk.bf16.vlgmr.msra.gmra.mxu1 %vm1499_vm5, %v14566_v1  ;;  %v10440_v1 = vld [vmem:[%s15197_s6 + $0x2b4] sm:$0xf]  ;;  %v10502_v24 = vld [vmem:[%s15198_s7 + $0x120] sm:$0xff] }
 0x421   : > { %5510 = vmatpush.bf16.msrb.mxu0 %v9145_v22  ;;  %v9253_v34 = vor.u32 %v10440_v1, %v9250_v47  ;;  %v9269_v22 = vor.u32 %v10444_v27, %v9266_v49  ;;  %v10469_v1 = vld [vmem:[%s15198_s7 + $0x18] sm:$0xff]  ;;  %v10484_v47 = vld [vmem:[%s15198_s7 + $0x90] sm:$0xff] }
 0x422   : > { %5524 = vmatpush.bf16.msra.mxu2 %v9209_v63  ;;  %5566 = vmatpush.bf16.msra.mxu3 %v9149_v59  ;;  %v10426_v63 = vld [vmem:[%s15197_s6 + $0x244] sm:$0xf]  ;;  %v9258_v59 = vld [vmem:[%s15197_s6 + $0x2c8] sm:$0xf0]  ;;  %v10500_v27 = vld [vmem:[%s15198_s7 + $0x110] sm:$0xff] }
 0x423   : > { %v9197_v32 = vor.u32 %v10426_v63, %v9194_v36  ;;  %v9261_v33 = vor.u32 %v10442_v21, %v9258_v59  ;;  %5748 = vmatpush.bf16.msrb.mxu1 %v10472_v8  ;;  %v10518_v36 = vld [vmem:[%s15198_s7 + $0x1a0] sm:$0xff]  ;;  %v10499_v21 = vld [vmem:[%s15198_s7 + $0x108] sm:$0xff] }
 0x425   : > { %5511 = vmatpush.bf16.msrb.mxu0 %v9137_v28 }
 0x426   : > { %5525 = vmatpush.bf16.msra.mxu2 %v9201_v9  ;;  %5567 = vmatpush.bf16.msra.mxu3 %v9141_v37  ;;  %v10487_v9 = vld [vmem:[%s15198_s7 + $0xa8] sm:$0xff]  ;;  %v10470_v37 = vld [vmem:[%s15198_s7 + $0x20] sm:$0xff] }
 0x429   : > { %5512 = vmatpush.bf16.msrb.mxu0 %v9129_v2  ;;  %v10483_v2 = vld [vmem:[%s15198_s7 + $0x88] sm:$0xff] }
 0x42a   : > { %5526 = vmatpush.bf16.msra.mxu2 %v9193_v58  ;;  %5568 = vmatpush.bf16.msra.mxu3 %v9133_v41  ;;  %v10478_v58 = vld [vmem:[%s15198_s7 + $0x60] sm:$0xff] }
 0x42b   : > { %v10482_v41 = vld [vmem:[%s15198_s7 + $0x80] sm:$0xff] }
 0x42c   : > { %5513 = vmatmul.bf16.vlgmr.msrb.gmra.mxu0 %v14423_v45 }
 0x42d   : > { %5575 = vmatpush.bf16.msra.mxu0 %v9253_v34  ;;  %5527 = vmatmul.bf16.vlgmr.msra.gmra.mxu2 %v14434_v3  ;;  %v10467_v34 = vld [vmem:[%s15198_s7 + $0x8] sm:$0xff] }
 0x42e   : > { %5589 = vmatpush.bf16.msrb.mxu2 %v9317_v57  ;;  %5569 = vmatmul.bf16.vlgmr.msra.gmra.mxu3 %v14423_v45  ;;  %v9290_v45 = vld [vmem:[%s15197_s6 + $0x308] sm:$0xf0] }
 0x42f   : > { %v9293_v18 = vor.u32 %v10450_v30, %v9290_v45  ;;  %5762 = vmatpush.bf16.msrb.mxu3 %v10479_v43  ;;  %v10492_v45 = vld [vmem:[%s15198_s7 + $0xd0] sm:$0xff] }
 0x431   : > { %5576 = vmatpush.bf16.msra.mxu0 %v9245_v12 }
 0x432   : > { %5590 = vmatpush.bf16.msrb.mxu2 %v9309_v40 }
 0x433   : > { %5763 = vmatpush.bf16.msrb.mxu3 %v10478_v58 }
 0x435   : > { %5577 = vmatpush.bf16.msra.mxu0 %v9237_v19  ;;  %v10507_v19 = vld [vmem:[%s15198_s7 + $0x148] sm:$0xff] }
 0x436   : > { %5591 = vmatpush.bf16.msrb.mxu2 %v9301_v48  ;;  %v10476_v48 = vld [vmem:[%s15198_s7 + $0x50] sm:$0xff] }
 0x437   : > { %5764 = vmatpush.bf16.msrb.mxu3 %v10477_v16  ;;  %v10512_v16 = vld [vmem:[%s15198_s7 + $0x170] sm:$0xff] }
 0x439   : > { %5578 = vmatpush.bf16.msra.mxu0 %v9229_v55  ;;  %v10506_v55 = vld [vmem:[%s15198_s7 + $0x140] sm:$0xff] }
 0x43a   : > { %5592 = vmatpush.bf16.msrb.mxu2 %v9293_v18  ;;  %v10475_v18 = vld [vmem:[%s15198_s7 + $0x48] sm:$0xff] }
 0x43b   : > { %5765 = vmatpush.bf16.msrb.mxu3 %v10476_v48  ;;  %v10511_v48 = vld [vmem:[%s15198_s7 + $0x168] sm:$0xff] }
 0x43d   : > { %5579 = vmatpush.bf16.msra.mxu0 %v9221_v35 }
 0x43e   : > { %5593 = vmatpush.bf16.msrb.mxu2 %v9285_v42  ;;  %v10520_v42 = vld [vmem:[%s15198_s7 + $0x1b0] sm:$0xff] }
 0x43f   : > { %5766 = vmatpush.bf16.msrb.mxu3 %v10475_v18 }
 0x441   : > { %5580 = vmatpush.bf16.msra.mxu0 %v9213_v20  ;;  %v10504_v20 = vld [vmem:[%s15198_s7 + $0x130] sm:$0xff] }
 0x442   : > { %5594 = vmatpush.bf16.msrb.mxu2 %v9277_v51 }
 0x443   : > { %5767 = vmatpush.bf16.msrb.mxu3 %v10474_v5  ;;  %v10526_v5 = vld [vmem:[%s15198_s7 + $0x1e0] sm:$0xff] }
 0x445   : > { %5581 = vmatpush.bf16.msra.mxu0 %v9205_v31  ;;  %v10489_v31 = vld [vmem:[%s15198_s7 + $0xb8] sm:$0xff] }
 0x446   : > { %5595 = vmatpush.bf16.msrb.mxu2 %v9269_v22  ;;  %v10503_v22 = vld [vmem:[%s15198_s7 + $0x128] sm:$0xff] }
 0x447   : > { %6041 = vmatpush.bf16.msra.mxu3 %v10501_v14  ;;  %v10540_v14 = vld [vmem:[%s15198_s7 + $0x250] sm:$0xff] }
 0x449   : > { %5582 = vmatpush.bf16.msra.mxu0 %v9197_v32 }
 0x44a   : > { %5596 = vmatpush.bf16.msrb.mxu2 %v9261_v33  ;;  %v10488_v33 = vld [vmem:[%s15198_s7 + $0xb0] sm:$0xff] }
 0x44b   : > { %6042 = vmatpush.bf16.msra.mxu3 %v10500_v27 }
 0x44c   : > { %5583 = vmatmul.bf16.vlgmr.msra.gmra.mxu0 %v14434_v3  ;;  %v10471_v3 = vld [vmem:[%s15198_s7 + $0x28] sm:$0xff] }
 0x44d   : > { %5597 = vmatmul.bf16.vlgmr.msrb.gmra.mxu2 %v14558_v25  ;;  %5895 = vmatpush.bf16.msrb.mxu0 %v10487_v9  ;;  %v10486_v25 = vld [vmem:[%s15198_s7 + $0xa0] sm:$0xff] }
 0x44e   : > { %5749 = vmatpush.bf16.msrb.mxu1 %v10471_v3  ;;  %5910 = vmatpush.bf16.msra.mxu2 %v10493_v17  ;;  %v10515_v3 = vld [vmem:[%s15198_s7 + $0x188] sm:$0xff]  ;;  %v10542_v17 = vld [vmem:[%s15198_s7 + $0x260] sm:$0xff] }
 0x44f   : > { %6043 = vmatpush.bf16.msra.mxu3 %v10499_v21 }
 0x451   : > { %5896 = vmatpush.bf16.msrb.mxu0 %v10486_v25  ;;  %v10517_v25 = vld [vmem:[%s15198_s7 + $0x198] sm:$0xff] }
 0x452   : > { %5750 = vmatpush.bf16.msrb.mxu1 %v10470_v37  ;;  %5911 = vmatpush.bf16.msra.mxu2 %v10492_v45  ;;  %v10494_v45 = vld [vmem:[%s15198_s7 + $0xe0] sm:$0xff] }
 0x455   : > { %5897 = vmatpush.bf16.msrb.mxu0 %v10485_v13 }
 0x456   : > { %5751 = vmatpush.bf16.msrb.mxu1 %v10469_v1  ;;  %5912 = vmatpush.bf16.msra.mxu2 %v10491_v29  ;;  %v10514_v1 = vld [vmem:[%s15198_s7 + $0x180] sm:$0xff]  ;;  %v10541_v29 = vld [vmem:[%s15198_s7 + $0x258] sm:$0xff] }
 0x459   : > { %5898 = vmatpush.bf16.msrb.mxu0 %v10484_v47  ;;  %v10516_v47 = vld [vmem:[%s15198_s7 + $0x190] sm:$0xff] }
 0x45a   : > { %5752 = vmatpush.bf16.msrb.mxu1 %v10468_v23  ;;  %5913 = vmatpush.bf16.msra.mxu2 %v10490_v15  ;;  %v10497_v23 = vld [vmem:[%s15198_s7 + $0xf8] sm:$0xff] }
 0x45d   : > { %5899 = vmatpush.bf16.msrb.mxu0 %v10483_v2  ;;  %v10513_v2 = vld [vmem:[%s15198_s7 + $0x178] sm:$0xff] }
 0x45e   : > { %5753 = vmatpush.bf16.msrb.mxu1 %v10467_v34  ;;  %5914 = vmatpush.bf16.msra.mxu2 %v10489_v31  ;;  %v10529_v34 = vld [vmem:[%s15198_s7 + $0x1f8] sm:$0xff]  ;;  %v10524_v31 = vld [vmem:[%s15198_s7 + $0x1d0] sm:$0xff] }
 0x461   : > { %5900 = vmatpush.bf16.msrb.mxu0 %v10482_v41  ;;  %v10496_v41 = vld [vmem:[%s15198_s7 + $0xf0] sm:$0xff] }
 0x462   : > { %5754 = vmatpush.bf16.msrb.mxu1 %v10466_v26  ;;  %5915 = vmatpush.bf16.msra.mxu2 %v10488_v33  ;;  %v10537_v33 = vld [vmem:[%s15198_s7 + $0x238] sm:$0xff] }
 0x465   : > { %5901 = vmatpush.bf16.msrb.mxu0 %v10481_v6 }
 0x466   : > { %6056 = vmatpush.bf16.msra.mxu1 %v10507_v19  ;;  %6187 = vmatpush.bf16.msrb.mxu2 %v10515_v3  ;;  %v10495_v19 = vld [vmem:[%s15198_s7 + $0xe8] sm:$0xff]  ;;  %v10522_v3 = vld [vmem:[%s15198_s7 + $0x1c0] sm:$0xff] }
 0x469   : > { %5902 = vmatpush.bf16.msrb.mxu0 %v10480_v10  ;;  %v10527_v10 = vld [vmem:[%s15198_s7 + $0x1e8] sm:$0xff] }
 0x46a   : > { %6057 = vmatpush.bf16.msra.mxu1 %v10506_v55  ;;  %6188 = vmatpush.bf16.msrb.mxu2 %v10514_v1 }
 0x46b   : > { %v14819_v61 = vpop.f32.mrf.mxu1 }
 0x46d   : > { %6202 = vmatpush.bf16.msra.mxu0 %v10521_v7  ;;  %v10510_v7 = vld [vmem:[%s15198_s7 + $0x160] sm:$0xff] }
 0x46e   : > { %6058 = vmatpush.bf16.msra.mxu1 %v10505_v52  ;;  %6189 = vmatpush.bf16.msrb.mxu2 %v10513_v2  ;;  %v10533_v2 = vld [vmem:[%s15198_s7 + $0x218] sm:$0xff] }
 0x471   : > { %6203 = vmatpush.bf16.msra.mxu0 %v10520_v42  ;;  %v10509_v42 = vld [vmem:[%s15198_s7 + $0x158] sm:$0xff] }
 0x472   : > { %6059 = vmatpush.bf16.msra.mxu1 %v10504_v20  ;;  %6190 = vmatpush.bf16.msrb.mxu2 %v10512_v16  ;;  %v10508_v20 = vld [vmem:[%s15198_s7 + $0x150] sm:$0xff]  ;;  %v10561_v16 = vld [vmem:[%s15198_s7 + $0x2f8] sm:$0xff] }
 0x473   : > { %v5067_v4 = vpop.f32.mrf.mxu1 }
 0x474   : > { %v14824_v28 = vpop.f32.mrf.mxu3 }
 0x475   : > { %6204 = vmatpush.bf16.msra.mxu0 %v10519_v54  ;;  %v5080_v8 = vadd.f32 %v14824_v28, %v14819_v61  ;;  %v10539_v54 = vld [vmem:[%s15198_s7 + $0x248] sm:$0xff] }
 0x476   : > { %6060 = vmatpush.bf16.msra.mxu1 %v10503_v22  ;;  %6191 = vmatpush.bf16.msrb.mxu2 %v10511_v48  ;;  %v10560_v48 = vld [vmem:[%s15198_s7 + $0x2f0] sm:$0xff] }
 0x479   : > { %6205 = vmatpush.bf16.msra.mxu0 %v10518_v36  ;;  %v10538_v36 = vld [vmem:[%s15198_s7 + $0x240] sm:$0xff] }
 0x47a   : > { %6061 = vmatpush.bf16.msra.mxu1 %v10502_v24  ;;  %6192 = vmatpush.bf16.msrb.mxu2 %v10510_v7 }
 0x47b   : > { %v14888_v46 = vpop.f32.mrf.mxu1 }
 0x47c   : > { %v5081_v39 = vpop.f32.mrf.mxu3 }
 0x47d   : > { %v5082_v60 = vadd.f32 %v5081_v39, %v5067_v4  ;;  %v10498_v39 = vld [vmem:[%s15198_s7 + $0x100] sm:$0xff]  ;;  %6206 = vmatpush.bf16.msra.mxu0 %v10517_v25 }
 0x47e   : > { %6044 = vmatpush.bf16.msra.mxu3 %v10498_v39  ;;  %6193 = vmatpush.bf16.msrb.mxu2 %v10509_v42  ;;  %v10556_v42 = vld [vmem:[%s15198_s7 + $0x2d0] sm:$0xff] }
 0x481   : > { %6207 = vmatpush.bf16.msra.mxu0 %v10516_v47  ;;  %v10562_v47 = vld [vmem:[%s15198_s7 + $0x300] sm:$0xff] }
 0x482   : > { %6045 = vmatpush.bf16.msra.mxu3 %v10497_v23  ;;  %6194 = vmatpush.bf16.msrb.mxu2 %v10508_v20  ;;  %v10553_v20 = vld [vmem:[%s15198_s7 + $0x2b8] sm:$0xff] }
 0x483   : > { %v5137_v53 = vpop.f32.mrf.mxu1 }
 0x486   : > { %6046 = vmatpush.bf16.msra.mxu3 %v10496_v41  ;;  %v10547_v41 = vld [vmem:[%s15198_s7 + $0x288] sm:$0xff] }
 0x489   : > { %v14853_v50 = vpop.f32.mrf.mxu0 }
 0x48a   : > { %6047 = vmatpush.bf16.msra.mxu3 %v10495_v19  ;;  %v10531_v19 = vld [vmem:[%s15198_s7 + $0x208] sm:$0xff] }
 0x48d   : > { %v5542_v4 = vpop.f32.mrf.mxu1 }
 0x48e   : > { %6048 = vmatpush.bf16.msra.mxu3 %v10494_v45 }
 0x48f   : > { %v14899_v38 = vpop.f32.mrf.mxu3 }
 0x490   : > { %v14870_v57 = vpop.f32.mrf.mxu2 }
 0x491   : > { %v5095_v11 = vpop.f32.mrf.mxu0 }
 0x492   : > { %v5096_v0 = vadd.f32 %v5095_v11, %v5082_v60  ;;  %v5094_v60 = vadd.f32 %v14853_v50, %v5080_v8  ;;  %v10543_v11 = vld [vmem:[%s15198_s7 + $0x268] sm:$0xff] }
 0x493   : > { %v10535_v8 = vld [vmem:[%s15198_s7 + $0x228] sm:$0xff] }
 0x494   : > { %v5108_v28 = vadd.f32 %v14870_v57, %v5094_v60  ;;  %v10549_v60 = vld [vmem:[%s15198_s7 + $0x298] sm:$0xff] }
 0x495   : > { %v5544_v55 = vpop.f32.mrf.mxu1 }
 0x497   : > { %v5151_v62 = vpop.f32.mrf.mxu3 }
 0x498   : > { %v5109_v56 = vpop.f32.mrf.mxu2 }
 0x499   : > { %v14875_v12 = vadd.f32 %v5109_v56, %v5096_v0  ;;  %v14877_v40 = vpop.f32.mrf.mxu0  ;;  %v10528_v56 = vld [vmem:[%s15198_s7 + $0x1f0] sm:$0xff] }
 0x49f   : > { %v5556_v61 = vpop.f32.mrf.mxu3 }
 0x4a0   : > { %v14901_v30 = vpop.f32.mrf.mxu2 }
 0x4a1   : > { %v5165_v35 = vpop.f32.mrf.mxu0  ;;  %v5136_v52 = vadd.f32 %v14888_v46, %v14901_v30 }
 0x4a3   : > { %v5150_v46 = vadd.f32 %v14899_v38, %v5136_v52  ;;  %v10559_v52 = vld [vmem:[%s15198_s7 + $0x2e8] sm:$0xff] }
 0x4a5   : > { %v5164_v27 = vadd.f32 %v14877_v40, %v5150_v46  ;;  %v10523_v40 = vld [vmem:[%s15198_s7 + $0x1c8] sm:$0xff] }
 0x4a7   : > { %v5558_v26 = vpop.f32.mrf.mxu3 }
 0x4a8   : > { %v5123_v44 = vpop.f32.mrf.mxu2 }
 0x4a9   : > { %v5138_v51 = vadd.f32 %v5137_v53, %v5123_v44  ;;  %v5514_v59 = vpop.f32.mrf.mxu0  ;;  %v10525_v44 = vld [vmem:[%s15198_s7 + $0x1d8] sm:$0xff] }
 0x4ab   : > { %v5152_v49 = vadd.f32 %v5151_v62, %v5138_v51  ;;  %v5612_v62 = vpop.f32.mrf.mxu1 }
 0x4ad   : > { %v14948_v63 = vadd.f32 %v5165_v35, %v5152_v49 }
 0x4b0   : > { %v5528_v32 = vpop.f32.mrf.mxu2 }
 0x4b1   : > { %v5529_v9 = vadd.f32 %v5528_v32, %v5514_v59  ;;  %v5516_v6 = vpop.f32.mrf.mxu0  ;;  %v5570_v53 = vpop.f32.mrf.mxu3 }
 0x4b3   : > { %v5543_v37 = vadd.f32 %v5542_v4, %v5529_v9 }
 0x4b5   : > { %v5557_v13 = vadd.f32 %v5556_v61, %v5543_v37  ;;  %v10563_v37 = vld [vmem:[%s15198_s7 + $0x308] sm:$0xff] }
 0x4b7   : > { %v5617_v43 = vmax.f32 %v5108_v28, %v5557_v13  ;;  %v10534_v28 = vld [vmem:[%s15198_s7 + $0x220] sm:$0xff]  ;;  %v10536_v13 = vld [vmem:[%s15198_s7 + $0x230] sm:$0xff] }
 0x4b8   : > { %v5530_v18 = vpop.f32.mrf.mxu2 }
 0x4b9   : > { %v5624_v50 = vrot.slane %v5617_v43, 1  ;;  %v5531_v38 = vadd.f32 %v5530_v18, %v5516_v6  ;;  %v10546_v6 = vld [vmem:[%s15198_s7 + $0x280] sm:$0xff]  ;;  %v10545_v18 = vld [vmem:[%s15198_s7 + $0x278] sm:$0xff] }
 0x4bb   : > { %v5628_v58 = vmax.f32 %v5617_v43, %v5624_v50  ;;  %v5545_v21 = vadd.f32 %v5544_v55, %v5531_v38  ;;  %v5572_v50 = vpop.f32.mrf.mxu3 }
 0x4bd   : > { %v14993_v57 = vpack.c.bf16 %v5628_v58, %v5628_v58  ;;  %v5559_v24 = vadd.f32 %v5558_v26, %v5545_v21 }
 0x4bf   : > { %5755 = vmatmul.bf16.vlgmr.msrb.gmra.mxu1 %v14993_v57  ;;  %v5805_v0 = vrot.slane %v14993_v57, 1  ;;  %v5619_v61 = vmax.f32 %v14875_v12, %v5559_v24  ;;  %v10548_v12 = vld [vmem:[%s15198_s7 + $0x290] sm:$0xff]  ;;  %v6097_v55 = vrot.slane %v14993_v57, 3 }
 0x4c0   : > { %6340 = vmatpush.bf16.msrb.mxu1 %v10529_v34 }
 0x4c1   : > { %5903 = vmatmul.bf16.vlgmr.msrb.gmra.mxu0 %v5805_v0  ;;  %v6216_v43 = vrot.slane %v5619_v61, 1  ;;  %v10532_v0 = vld [vmem:[%s15198_s7 + $0x210] sm:$0xff] }
 0x4c2   : > { %6488 = vmatpush.bf16.msrb.mxu0 %v10543_v11 }
 0x4c3   : > { %v6220_v11 = vmax.f32 %v5619_v61, %v6216_v43 }
 0x4c4   : > { %6341 = vmatpush.bf16.msrb.mxu1 %v10528_v56  ;;  %v5614_v56 = vpop.f32.mrf.mxu1 }
 0x4c6   : > { %6489 = vmatpush.bf16.msrb.mxu0 %v10542_v17  ;;  %v6222_v17 = vpack.c.bf16 %v6220_v11, %v6220_v11 }
 0x4c8   : > { %6342 = vmatpush.bf16.msrb.mxu1 %v10527_v10  ;;  %v5951_v10 = vrot.slane %v14993_v57, 2  ;;  %v6398_v7 = vrot.slane %v6222_v17, 1  ;;  %v6544_v38 = vrot.slane %v6222_v17, 2 }
 0x4c9   : > { %v5584_v35 = vpop.f32.mrf.mxu0 }
 0x4ca   : > { %6490 = vmatpush.bf16.msrb.mxu0 %v10541_v29  ;;  %v5585_v30 = vadd.f32 %v5584_v35, %v5570_v53  ;;  %v10530_v29 = vld [vmem:[%s15198_s7 + $0x200] sm:$0xff]  ;;  %v10555_v53 = vld [vmem:[%s15198_s7 + $0x2c8] sm:$0xff] }
 0x4cb   : > { %v10558_v35 = vld [vmem:[%s15198_s7 + $0x2e0] sm:$0xff] }
 0x4cc   : > { %6343 = vmatpush.bf16.msrb.mxu1 %v10526_v5  ;;  %v10544_v5 = vld [vmem:[%s15198_s7 + $0x270] sm:$0xff] }
 0x4ce   : > { %6491 = vmatpush.bf16.msrb.mxu0 %v10540_v14 }
 0x4d0   : > { %v5598_v15 = vpop.f32.mrf.mxu2  ;;  %6344 = vmatpush.bf16.msrb.mxu1 %v10525_v44 }
 0x4d1   : > { %v5599_v51 = vadd.f32 %v5598_v15, %v5585_v30  ;;  %v5586_v1 = vpop.f32.mrf.mxu0  ;;  %v10554_v30 = vld [vmem:[%s15198_s7 + $0x2c0] sm:$0xff] }
 0x4d2   : > { %6492 = vmatpush.bf16.msrb.mxu0 %v10539_v54  ;;  %v5587_v58 = vadd.f32 %v5586_v1, %v5572_v50  ;;  %v10551_v54 = vld [vmem:[%s15198_s7 + $0x2a8] sm:$0xff] }
 0x4d3   : > { %v5613_v49 = vadd.f32 %v5612_v62, %v5599_v51  ;;  %v10552_v51 = vld [vmem:[%s15198_s7 + $0x2b0] sm:$0xff]  ;;  %v10550_v62 = vld [vmem:[%s15198_s7 + $0x2a0] sm:$0xff] }
 0x4d4   : > { %6345 = vmatpush.bf16.msrb.mxu1 %v10524_v31 }
 0x4d5   : > { %v5618_v22 = vmax.f32 %v5164_v27, %v5613_v49 }
 0x4d6   : > { %6493 = vmatpush.bf16.msrb.mxu0 %v10538_v36 }
 0x4d7   : > { %v5625_v59 = vrot.slane %v5618_v22, 1 }
 0x4d8   : > { %6346 = vmatpush.bf16.msrb.mxu1 %v10523_v40  ;;  %v5600_v23 = vpop.f32.mrf.mxu2 }
 0x4d9   : > { %v5629_v32 = vmax.f32 %v5618_v22, %v5625_v59  ;;  %v5601_v34 = vadd.f32 %v5600_v23, %v5587_v58  ;;  %v5621_v59 = vld [vmem:[%s15199_s8] sm:$0x1] }
 0x4da   : > { %6494 = vmatpush.bf16.msrb.mxu0 %v10537_v33 }
 0x4db   : > { %v5631_v9 = vpack.c.bf16 %v5629_v32, %v5629_v32  ;;  %v5615_v26 = vadd.f32 %v5614_v56, %v5601_v34 }
 0x4dc   : > { %6347 = vmatpush.bf16.msrb.mxu1 %v10522_v3 }
 0x4dd   : > { %v5806_v25 = vrot.slane %v5631_v9, 1  ;;  %v5952_v4 = vrot.slane %v5631_v9, 2  ;;  %v6098_v39 = vrot.slane %v5631_v9, 3  ;;  %9408 = vmatmul.msk.bf16.vlgmr.msrb.gmra.mxu3 %vm2729_vm9, %v5631_v9  ;;  %v5620_v45 = vmax.f32 %v14948_v63, %v5615_v26  ;;  %v10557_v63 = vld [vmem:[%s15198_s7 + $0x2d8] sm:$0xff] }
 0x4de   : > { %6355 = vmatpush.bf16.msrb.mxu3 %v10535_v8  ;;  %6495 = vmatpush.bf16.msrb.mxu0 %v10536_v13 }
 0x4df   : > { %9493 = vmatmul.msk.bf16.vlgmr.msra.gmra.mxu2 %vm2729_vm9, %v5806_v25  ;;  %9578 = vmatmul.msk.bf16.vlgmr.msra.gmra.mxu1 %vm2729_vm9, %v5952_v4  ;;  %v6217_v57 = vrot.slane %v5620_v45, 1 }
 0x4e0   : > { %9663 = vmatmul.msk.bf16.vlgmr.msra.gmra.mxu0 %vm2729_vm9, %v6098_v39  ;;  %6503 = vmatpush.bf16.msra.mxu2 %v10549_v60 }
 0x4e1   : > { %6649 = vmatpush.bf16.msra.mxu1 %v10563_v37  ;;  %v6221_v14 = vmax.f32 %v5620_v45, %v6217_v57 }
 0x4e2   : > { %6356 = vmatpush.bf16.msrb.mxu3 %v10534_v28 }
 0x4e3   : > { %v6223_v46 = vpack.c.bf16 %v6221_v14, %v6221_v14 }
 0x4e4   : > { %6504 = vmatpush.bf16.msra.mxu2 %v10548_v12 }
 0x4e5   : > { %6650 = vmatpush.bf16.msra.mxu1 %v10562_v47  ;;  %v6399_v44 = vrot.slane %v6223_v46, 1  ;;  %v6545_v15 = vrot.slane %v6223_v46, 2 }
 0x4e6   : > { %6357 = vmatpush.bf16.msrb.mxu3 %v10533_v2 }
 0x4e8   : > { %6505 = vmatpush.bf16.msra.mxu2 %v10547_v41 }
 0x4e9   : > { %6651 = vmatpush.bf16.msra.mxu1 %v10561_v16 }
 0x4ea   : > { %6358 = vmatpush.bf16.msrb.mxu3 %v10532_v0 }
 0x4ec   : > { %6506 = vmatpush.bf16.msra.mxu2 %v10546_v6 }
 0x4ed   : > { %6049 = vmatmul.bf16.vlgmr.msra.gmra.mxu3 %v5951_v10  ;;  %6652 = vmatpush.bf16.msra.mxu1 %v10560_v48 }
 0x4ee   : > { %6359 = vmatpush.bf16.msrb.mxu3 %v10531_v19 }
 0x4ef   : > { %6195 = vmatmul.bf16.vlgmr.msrb.gmra.mxu2 %v6097_v55  ;;  %6348 = vmatmul.bf16.vlgmr.msrb.gmra.mxu1 %v6222_v17 }
 0x4f0   : > { %6496 = vmatmul.bf16.vlgmr.msrb.gmra.mxu0 %v6398_v7  ;;  %6507 = vmatpush.bf16.msra.mxu2 %v10545_v18 }
 0x4f1   : > { %6653 = vmatpush.bf16.msra.mxu1 %v10559_v52 }
 0x4f2   : > { %6360 = vmatpush.bf16.msrb.mxu3 %v10530_v29 }
 0x4f4   : > { %6508 = vmatpush.bf16.msra.mxu2 %v10544_v5 }
 0x4f5   : > { %6654 = vmatpush.bf16.msra.mxu1 %v10558_v35 }
 0x4f6   : > { %6634 = vmatpush.bf16.msra.mxu3 %v10557_v63 }
 0x4fa   : > { %6635 = vmatpush.bf16.msra.mxu3 %v10556_v42 }
 0x4fd   : > { %9748 = vmatmul.msk.bf16.vlgmr.msrb.gmra.mxu3 %vm2729_vm9, %v6223_v46 }
 0x4fe   : > { %6636 = vmatpush.bf16.msra.mxu3 %v10555_v53 }
 0x4ff   : > { %9833 = vmatmul.msk.bf16.vlgmr.msra.gmra.mxu2 %vm2729_vm9, %v6399_v44  ;;  %9918 = vmatmul.msk.bf16.vlgmr.msra.gmra.mxu1 %vm2729_vm9, %v6545_v15 }
 0x502   : > { %6637 = vmatpush.bf16.msra.mxu3 %v10554_v30 }
 0x506   : > { %6638 = vmatpush.bf16.msra.mxu3 %v10553_v20 }
 0x50a   : > { %6639 = vmatpush.bf16.msra.mxu3 %v10552_v51 }
 0x50e   : > { %6640 = vmatpush.bf16.msra.mxu3 %v10551_v54 }
 0x512   : > { %6641 = vmatpush.bf16.msra.mxu3 %v10550_v62 }
 0x515   : > { %6642 = vmatmul.bf16.vlgmr.msra.gmra.mxu3 %v6544_v38 }
 0x53c   : > { %v5756_v27 = vpop.f32.mrf.mxu1 }
 0x53e   : > { %v5904_v49 = vpop.f32.mrf.mxu0 }
 0x544   : > { %v5758_v31 = vpop.f32.mrf.mxu1 }
 0x546   : > { %v5906_v22 = vpop.f32.mrf.mxu0 }
 0x55c   : > { %v6063_v36 = vpop.f32.mrf.mxu1 }
 0x55d   : > { %v6209_v21 = vpop.f32.mrf.mxu0 }
 0x560   : > { %v5769_v40 = vpop.f32.mrf.mxu3 }
 0x561   : > { %v5770_v32 = vadd.f32 %v5769_v40, %v5756_v27 }
 0x562   : > { %v5917_v33 = vpop.f32.mrf.mxu2 }
 0x563   : > { %v5773_v24 = vadd.f32 %v5770_v32, %v5621_v59  ;;  %v5918_v8 = vadd.f32 %v5917_v33, %v5904_v49 }
 0x564   : > { %v6065_v9 = vpop.f32.mrf.mxu1 }
 0x565   : > { %v5921_v3 = vadd.f32 %v5918_v8, %v5773_v24  ;;  %v6211_v25 = vpop.f32.mrf.mxu0 }
 0x568   : > { %v5771_v4 = vpop.f32.mrf.mxu3 }
 0x56a   : > { %v5919_v39 = vpop.f32.mrf.mxu2 }
 0x56c   : > { %v6349_v60 = vpop.f32.mrf.mxu1 }
 0x56d   : > { %v6497_v37 = vpop.f32.mrf.mxu0 }
 0x570   : > { %v6050_v61 = vpop.f32.mrf.mxu3 }
 0x571   : > { %v6064_v58 = vadd.f32 %v6063_v36, %v6050_v61 }
 0x572   : > { %v6196_v28 = vpop.f32.mrf.mxu2 }
 0x573   : > { %v6067_v16 = vadd.f32 %v6064_v58, %v5921_v3  ;;  %v6210_v11 = vadd.f32 %v6209_v21, %v6196_v28 }
 0x574   : > { %v6351_v13 = vpop.f32.mrf.mxu1 }
 0x575   : > { %v6499_v1 = vpop.f32.mrf.mxu0  ;;  %v6213_v56 = vadd.f32 %v6210_v11, %v6067_v16 }
 0x578   : > { %v6052_v12 = vpop.f32.mrf.mxu3 }
 0x57a   : > { %v6198_v47 = vpop.f32.mrf.mxu2 }
 0x57c   : > { %v6656_v43 = vpop.f32.mrf.mxu1 }
 0x580   : > { %v6362_v50 = vpop.f32.mrf.mxu3 }
 0x581   : > { %v6363_v0 = vadd.f32 %v6362_v50, %v6349_v60 }
 0x582   : > { %v6510_v23 = vpop.f32.mrf.mxu2 }
 0x583   : > { %v6366_v26 = vadd.f32 %v6363_v0, %v6213_v56  ;;  %v6511_v6 = vadd.f32 %v6510_v23, %v6497_v37 }
 0x584   : > { %v6658_v2 = vpop.f32.mrf.mxu1 }
 0x585   : > { %v6514_v19 = vadd.f32 %v6511_v6, %v6366_v26 }
 0x588   : > { %v6364_v34 = vpop.f32.mrf.mxu3 }
 0x58a   : > { %v6512_v41 = vpop.f32.mrf.mxu2 }
 0x598   : > { %v6643_v17 = vpop.f32.mrf.mxu3 }
 0x599   : > { %v6657_v48 = vadd.f32 %v6656_v43, %v6643_v17 }
 0x59b   : > { %v6660_v10 = vadd.f32 %v6657_v48, %v6514_v19 }
 0x59d   : > { %6661 = vst [vmem:[%s324_s21] sm:$0x1] %v6660_v10 }
 0x59e   : > { %10635 = shalt.err (!%p10632_p3)
}
 0x59f   : > { %10566 = dma.vmem_to_hbm [thread:$0]  (%p10761_p5), %s6674_s29, 16, %s6676_s22, %s6663_s23  }
 0x5a0   : > { %v6645_v45 = vpop.f32.mrf.mxu3 }
 0x5a1 PF: > { %p10572_p4 = scmp.ge.s32.totalorder %s10670_s12, 2  ;;  %s6687_s27 = sand.u32 1, %s10658_s30  }
 0x5a2   : > { %s6688_s17 = scalar_lea.sflag [#allocation4], %s6687_s27 }
 0x5a3   : > { %p10569_p7 = pnand %p10572_p4, %p10765_p6 }
 0x5a5   : > { %p10570_p8 = pneg %p10569_p7 }
 0x5a7   : > { %10653 = dma.done.wait (%p10570_p8), %s6688_s17, 16  }
 0x5a8   : > { %10655 = vsyncadd (%p10570_p8), %s6688_s17, 4294967280  ;;  %p19_p9 = scmp.ge.s32.totalorder %s10748_s15, 4   ;;  %s15205_s30 = smov %s10662_s10 }
 0x5a9   : > { %s15206_s10 = smov %s10666_s11  ;;  %s15207_s11 = smov %s10759_s18 }
 0x5aa   : > { %s15208_s12 = smov %s10748_s15  ;;  %21 = sbr.rel (!%p19_p9) target bundleno = 3 (0x3), region = 131 }
 0x5af   :  { %6693 = vsyncpa [#allocation4], 1 }
 0x5b0   :  { %6695 = vsyncpa [#allocation4 + $0x1], 1 }

</bundles_post_ra>
